<compile_context>
chip_gen: v7x
topology: tpu7x:2x2x1
jax: 0.10.0
libtpu: 0.0.40
codegen_flags: <defaults>
</compile_context>

<pallas_src>
import jax
import jax.numpy as jnp
from jax import lax
from jax.experimental import pallas as pl
from jax.experimental.pallas import tpu as pltpu
import numpy as np

# Full f32 matmul precision so the hoisted XLA-side projection, the in-kernel f32
# recurrence, and the pure-JAX reference all agree to tight tolerance.
jax.config.update("jax_default_matmul_precision", "highest")


def _round_up(x, m):
    return (x + m - 1) // m * m


def lstm_recurrence_kernel(xp_ref, whh_ref, h_out_ref, c_out_ref):
    """Whole LSTM recurrence in one invocation (PyTorch gate order: i, f, g, o).

    xp_ref : (T, Bp, 4*Hp) f32 -- precomputed x_t @ W_ih^T + (b_ih + b_hh), gate-blocked
    whh_ref: (Hp, 4*Hp)    f32 -- W_hh^T, gate-blocked (each gate in a 128-lane slab)
    outputs: h_n, c_n (Bp, Hp) f32
    """
    T = xp_ref.shape[0]
    Bp, Hp = h_out_ref.shape

    whh = whh_ref[...]  # load once; resident across the whole recurrence

    def step(t, carry):
        h_prev, c_prev = carry
        # gates = x_proj[t] + h_prev @ W_hh^T     (only serial-path matmul)
        gates = xp_ref[t] + jnp.dot(h_prev, whh, preferred_element_type=jnp.float32)
        # Lane-aligned gate slabs (each slice is whole 128-lane vregs).
        i_g = jax.nn.sigmoid(gates[:, 0 * Hp:1 * Hp])
        f_g = jax.nn.sigmoid(gates[:, 1 * Hp:2 * Hp])
        g_g = jnp.tanh(gates[:, 2 * Hp:3 * Hp])
        o_g = jax.nn.sigmoid(gates[:, 3 * Hp:4 * Hp])
        c_new = f_g * c_prev + i_g * g_g
        h_new = o_g * jnp.tanh(c_new)
        return h_new, c_new

    h0 = jnp.zeros((Bp, Hp), jnp.float32)
    c0 = jnp.zeros((Bp, Hp), jnp.float32)
    # Fully unroll short sequences for LLO scheduler visibility.
    unroll = True if T <= 32 else 8
    h_n, c_n = lax.fori_loop(0, T, step, (h0, c0), unroll=unroll)

    h_out_ref[...] = h_n
    c_out_ref[...] = c_n


def encoder_forward(en_index, params):
    """Pallas implementation of Encoder.forward. Returns (h_n, c_n), each (1, B, H)."""
    B, T = en_index.shape
    E = params["embedding"].shape[1]
    H = params["w_hh"].shape[1]
    f32 = jnp.float32

    if T == 0:  # degenerate empty sequence: return zero initial state defensively
        z = jnp.zeros((1, B, H), f32)
        return z, z

    Bp = _round_up(B, 8)      # sublane alignment
    Hp = _round_up(H, 128)    # each gate gets a lane-aligned 128-wide slab
    G = 4 * Hp

    # --- glue: time-major embedding gather (no separate (B,T,E)->(T,B,E) transpose) ---
    x = jnp.take(params["embedding"].astype(f32), en_index.T, axis=0)       # (T, B, E)
    if Bp != B:
        x = jnp.pad(x, ((0, 0), (0, Bp - B), (0, 0)))                       # (T, Bp, E)

    # --- gate-blocked, zero-padded weights (gate k occupies cols [k*Hp, (k+1)*Hp)) ---
    def pad_gates_t(w, in_dim, in_pad):
        # w: (4H, in_dim) -> (in_pad, 4*Hp), transposed, zero-padded per-gate.
        w = w.reshape(4, H, in_dim)
        w = jnp.pad(w, ((0, 0), (0, Hp - H), (0, in_pad - in_dim)))
        return w.reshape(4 * Hp, in_pad).T.astype(f32)

    w_ih_t = pad_gates_t(params["w_ih"], E, E)        # (E, G)
    w_hh_t = pad_gates_t(params["w_hh"], H, Hp)       # (Hp, G)
    bias = jnp.pad((params["b_ih"] + params["b_hh"]).reshape(4, H),
                   ((0, 0), (0, Hp - H))).reshape(G).astype(f32)            # (G,)

    # --- hoisted input projection: one batched matmul over all timesteps ---
    # (T*Bp, E) x (E, G): far better MXU occupancy than T tiny per-step matmuls.
    xp = jnp.einsum("tbe,eg->tbg", x, w_ih_t) + bias                        # (T, Bp, G)

    # TODO(synk): for very large T*B*4H (esp. v7x 64 MiB VMEM), stream xp in T-chunks
    # instead of keeping it fully resident; trivially fits at these shapes (~128 KB).
    h_pad, c_pad = pl.pallas_call(
        lstm_recurrence_kernel,
        out_shape=(jax.ShapeDtypeStruct((Bp, Hp), f32),
                   jax.ShapeDtypeStruct((Bp, Hp), f32)),
        grid=(1,),
        in_specs=[
            pl.BlockSpec((T, Bp, G), lambda i: (0, 0, 0)),   # whole x_proj resident
            pl.BlockSpec((Hp, G), lambda i: (0, 0)),         # W_hh^T resident
        ],
        out_specs=(
            pl.BlockSpec((Bp, Hp), lambda i: (0, 0)),        # h_n
            pl.BlockSpec((Bp, Hp), lambda i: (0, 0)),        # c_n
        ),
        compiler_params=pltpu.CompilerParams(
            dimension_semantics=("arbitrary",),
        ),
    )(xp, w_hh_t)

    # Slice off batch / hidden padding; add PyTorch's leading num_layers=1 dim.
    return h_pad[:B, :H][None, :, :], c_pad[:B, :H][None, :, :]


def encoder_forward_ref(en_index, params):
    """Pure-JAX reference (for correctness check)."""
    emb = jnp.take(params["embedding"], en_index, axis=0)   # (B, T, E)
    x = jnp.transpose(emb, (1, 0, 2))                       # (T, B, E)
    B = x.shape[1]
    H = params["w_hh"].shape[1]
    b = params["b_ih"] + params["b_hh"]

    def step(carry, x_t):
        h, c = carry
        gates = x_t @ params["w_ih"].T + h @ params["w_hh"].T + b
        i = jax.nn.sigmoid(gates[:, 0 * H:1 * H])
        f = jax.nn.sigmoid(gates[:, 1 * H:2 * H])
        g = jnp.tanh(gates[:, 2 * H:3 * H])
        o = jax.nn.sigmoid(gates[:, 3 * H:4 * H])
        c = f * c + i * g
        h = o * jnp.tanh(c)
        return (h, c), None

    h0 = jnp.zeros((B, H), jnp.float32)
    c0 = jnp.zeros((B, H), jnp.float32)
    (h_n, c_n), _ = lax.scan(step, (h0, c0), x)
    return h_n[None], c_n[None]


def init_params(key, vocab, emb_dim, hidden):
    """Deterministic parameter init (shapes match nn.Embedding / nn.LSTM)."""
    k_e, k_wi, k_wh, k_bi, k_bh = jax.random.split(key, 5)
    bound = 1.0 / np.sqrt(hidden)
    return {
        "embedding": jax.random.normal(k_e, (vocab, emb_dim), jnp.float32),
        "w_ih": jax.random.uniform(k_wi, (4 * hidden, emb_dim), jnp.float32, -bound, bound),
        "w_hh": jax.random.uniform(k_wh, (4 * hidden, hidden), jnp.float32, -bound, bound),
        "b_ih": jax.random.uniform(k_bi, (4 * hidden,), jnp.float32, -bound, bound),
        "b_hh": jax.random.uniform(k_bh, (4 * hidden,), jnp.float32, -bound, bound),
    }


if __name__ == "__main__":
    # Small shapes consistent with the module.
    en_corpus_num = 50          # vocab size
    encoder_embeding_num = 16   # embedding dim
    encoder_hidden_num = 32     # LSTM hidden dim
    B, T = 2, 8                 # batch, sequence length

    key = jax.random.PRNGKey(0)
    k_params, k_idx = jax.random.split(key)
    params = init_params(k_params, en_corpus_num, encoder_embeding_num, encoder_hidden_num)
    en_index = jax.random.randint(k_idx, (B, T), 0, en_corpus_num, dtype=jnp.int32)

    h_n, c_n = encoder_forward(en_index, params)
    jax.block_until_ready((h_n, c_n))

    h_ref, c_ref = encoder_forward_ref(en_index, params)
    np.testing.assert_allclose(np.asarray(h_n), np.asarray(h_ref), rtol=1e-5, atol=1e-5)
    np.testing.assert_allclose(np.asarray(c_n), np.asarray(c_ref), rtol=1e-5, atol=1e-5)

    assert h_n.shape == (1, B, encoder_hidden_num)
    assert c_n.shape == (1, B, encoder_hidden_num)
    print("KERNEL_OK")
</pallas_src>

<mosaic_0001>
module attributes {stable_mosaic.version = 11 : i64} {
  func.func @lstm_recurrence_kernel(%arg0: i32, %arg1: memref<8x8x512xf32, #tpu.memory_space<vmem>>, %arg2: memref<128x512xf32, #tpu.memory_space<vmem>>, %arg3: memref<8x128xf32, #tpu.memory_space<vmem>>, %arg4: memref<8x128xf32, #tpu.memory_space<vmem>>) attributes {dimension_semantics = [#tpu.dimension_semantics<arbitrary>], iteration_bounds = array<i64: 1>, scalar_prefetch = 0 : i64, scratch_operands = 0 : i64, tpu.core_type = #tpu.core_type<tc>, window_params = [{pipeline_mode = #tpu.pipeline_mode<synchronous>, transform_indices = @transform_0, window_bounds = array<i64: 8, 8, 512>}, {pipeline_mode = #tpu.pipeline_mode<synchronous>, transform_indices = @transform_1, window_bounds = array<i64: 128, 512>}, {pipeline_mode = #tpu.pipeline_mode<synchronous>, transform_indices = @transform_2, window_bounds = array<i64: 8, 128>}, {pipeline_mode = #tpu.pipeline_mode<synchronous>, transform_indices = @transform_3, window_bounds = array<i64: 8, 128>}]} {
    %c0 = arith.constant 0 : index
    %c0_0 = arith.constant 0 : index
    %0 = vector.load %arg2[%c0, %c0_0] : memref<128x512xf32, #tpu.memory_space<vmem>>, vector<128x512xf32>
    %cst = arith.constant 0.000000e+00 : f32
    %1 = vector.broadcast %cst : f32 to vector<8x128xf32>
    %cst_1 = arith.constant 0.000000e+00 : f32
    %2 = vector.broadcast %cst_1 : f32 to vector<8x128xf32>
    %c0_i32 = arith.constant 0 : i32
    %3 = arith.index_cast %c0_i32 : i32 to index
    %c0_2 = arith.constant 0 : index
    %c0_3 = arith.constant 0 : index
    %4 = vector.load %arg1[%3, %c0_2, %c0_3] : memref<8x8x512xf32, #tpu.memory_space<vmem>>, vector<1x8x512xf32>
    %5 = vector.shape_cast %4 : vector<1x8x512xf32> to vector<8x512xf32>
    %cst_4 = arith.constant dense<0.000000e+00> : vector<8x512xf32>
    %6 = tpu.matmul %1, %0, %cst_4 {dimension_numbers = #tpu.dot_dimension_numbers<[1], [0], [0], [1], [0, 0, 1, 1], [], []>, precision = #tpu.contract_precision<fp32>} : vector<8x128xf32>, vector<128x512xf32>, vector<8x512xf32> -> vector<8x512xf32>
    %7 = arith.addf %5, %6 : vector<8x512xf32>
    %8 = vector.extract_strided_slice %7 {offsets = [0, 0], sizes = [8, 128], strides = [1, 1]} : vector<8x512xf32> to vector<8x128xf32>
    %9 = arith.negf %8 : vector<8x128xf32>
    %10 = math.exp %9 : vector<8x128xf32>
    %cst_5 = arith.constant 1.000000e+00 : f32
    %11 = vector.broadcast %cst_5 : f32 to vector<8x128xf32>
    %12 = arith.addf %11, %10 : vector<8x128xf32>
    %13 = arith.divf %11, %12 : vector<8x128xf32>
    %14 = vector.extract_strided_slice %7 {offsets = [0, 128], sizes = [8, 128], strides = [1, 1]} : vector<8x512xf32> to vector<8x128xf32>
    %15 = arith.negf %14 : vector<8x128xf32>
    %16 = math.exp %15 : vector<8x128xf32>
    %cst_6 = arith.constant 1.000000e+00 : f32
    %17 = vector.broadcast %cst_6 : f32 to vector<8x128xf32>
    %18 = arith.addf %17, %16 : vector<8x128xf32>
    %19 = arith.divf %17, %18 : vector<8x128xf32>
    %20 = vector.extract_strided_slice %7 {offsets = [0, 256], sizes = [8, 128], strides = [1, 1]} : vector<8x512xf32> to vector<8x128xf32>
    %21 = math.tanh %20 : vector<8x128xf32>
    %22 = vector.extract_strided_slice %7 {offsets = [0, 384], sizes = [8, 128], strides = [1, 1]} : vector<8x512xf32> to vector<8x128xf32>
    %23 = arith.negf %22 : vector<8x128xf32>
    %24 = math.exp %23 : vector<8x128xf32>
    %cst_7 = arith.constant 1.000000e+00 : f32
    %25 = vector.broadcast %cst_7 : f32 to vector<8x128xf32>
    %26 = arith.addf %25, %24 : vector<8x128xf32>
    %27 = arith.divf %25, %26 : vector<8x128xf32>
    %28 = arith.mulf %19, %2 : vector<8x128xf32>
    %29 = arith.mulf %13, %21 : vector<8x128xf32>
    %30 = arith.addf %28, %29 : vector<8x128xf32>
    %31 = math.tanh %30 : vector<8x128xf32>
    %32 = arith.mulf %27, %31 : vector<8x128xf32>
    %c1_i32 = arith.constant 1 : i32
    %33 = arith.index_cast %c1_i32 : i32 to index
    %c0_8 = arith.constant 0 : index
    %c0_9 = arith.constant 0 : index
    %34 = vector.load %arg1[%33, %c0_8, %c0_9] : memref<8x8x512xf32, #tpu.memory_space<vmem>>, vector<1x8x512xf32>
    %35 = vector.shape_cast %34 : vector<1x8x512xf32> to vector<8x512xf32>
    %cst_10 = arith.constant dense<0.000000e+00> : vector<8x512xf32>
    %36 = tpu.matmul %32, %0, %cst_10 {dimension_numbers = #tpu.dot_dimension_numbers<[1], [0], [0], [1], [0, 0, 1, 1], [], []>, precision = #tpu.contract_precision<fp32>} : vector<8x128xf32>, vector<128x512xf32>, vector<8x512xf32> -> vector<8x512xf32>
    %37 = arith.addf %35, %36 : vector<8x512xf32>
    %38 = vector.extract_strided_slice %37 {offsets = [0, 0], sizes = [8, 128], strides = [1, 1]} : vector<8x512xf32> to vector<8x128xf32>
    %39 = arith.negf %38 : vector<8x128xf32>
    %40 = math.exp %39 : vector<8x128xf32>
    %cst_11 = arith.constant 1.000000e+00 : f32
    %41 = vector.broadcast %cst_11 : f32 to vector<8x128xf32>
    %42 = arith.addf %41, %40 : vector<8x128xf32>
    %43 = arith.divf %41, %42 : vector<8x128xf32>
    %44 = vector.extract_strided_slice %37 {offsets = [0, 128], sizes = [8, 128], strides = [1, 1]} : vector<8x512xf32> to vector<8x128xf32>
    %45 = arith.negf %44 : vector<8x128xf32>
    %46 = math.exp %45 : vector<8x128xf32>
    %cst_12 = arith.constant 1.000000e+00 : f32
    %47 = vector.broadcast %cst_12 : f32 to vector<8x128xf32>
    %48 = arith.addf %47, %46 : vector<8x128xf32>
    %49 = arith.divf %47, %48 : vector<8x128xf32>
    %50 = vector.extract_strided_slice %37 {offsets = [0, 256], sizes = [8, 128], strides = [1, 1]} : vector<8x512xf32> to vector<8x128xf32>
    %51 = math.tanh %50 : vector<8x128xf32>
    %52 = vector.extract_strided_slice %37 {offsets = [0, 384], sizes = [8, 128], strides = [1, 1]} : vector<8x512xf32> to vector<8x128xf32>
    %53 = arith.negf %52 : vector<8x128xf32>
    %54 = math.exp %53 : vector<8x128xf32>
    %cst_13 = arith.constant 1.000000e+00 : f32
    %55 = vector.broadcast %cst_13 : f32 to vector<8x128xf32>
    %56 = arith.addf %55, %54 : vector<8x128xf32>
    %57 = arith.divf %55, %56 : vector<8x128xf32>
    %58 = arith.mulf %49, %30 : vector<8x128xf32>
    %59 = arith.mulf %43, %51 : vector<8x128xf32>
    %60 = arith.addf %58, %59 : vector<8x128xf32>
    %61 = math.tanh %60 : vector<8x128xf32>
    %62 = arith.mulf %57, %61 : vector<8x128xf32>
    %c2_i32 = arith.constant 2 : i32
    %63 = arith.index_cast %c2_i32 : i32 to index
    %c0_14 = arith.constant 0 : index
    %c0_15 = arith.constant 0 : index
    %64 = vector.load %arg1[%63, %c0_14, %c0_15] : memref<8x8x512xf32, #tpu.memory_space<vmem>>, vector<1x8x512xf32>
    %65 = vector.shape_cast %64 : vector<1x8x512xf32> to vector<8x512xf32>
    %cst_16 = arith.constant dense<0.000000e+00> : vector<8x512xf32>
    %66 = tpu.matmul %62, %0, %cst_16 {dimension_numbers = #tpu.dot_dimension_numbers<[1], [0], [0], [1], [0, 0, 1, 1], [], []>, precision = #tpu.contract_precision<fp32>} : vector<8x128xf32>, vector<128x512xf32>, vector<8x512xf32> -> vector<8x512xf32>
    %67 = arith.addf %65, %66 : vector<8x512xf32>
    %68 = vector.extract_strided_slice %67 {offsets = [0, 0], sizes = [8, 128], strides = [1, 1]} : vector<8x512xf32> to vector<8x128xf32>
    %69 = arith.negf %68 : vector<8x128xf32>
    %70 = math.exp %69 : vector<8x128xf32>
    %cst_17 = arith.constant 1.000000e+00 : f32
    %71 = vector.broadcast %cst_17 : f32 to vector<8x128xf32>
    %72 = arith.addf %71, %70 : vector<8x128xf32>
    %73 = arith.divf %71, %72 : vector<8x128xf32>
    %74 = vector.extract_strided_slice %67 {offsets = [0, 128], sizes = [8, 128], strides = [1, 1]} : vector<8x512xf32> to vector<8x128xf32>
    %75 = arith.negf %74 : vector<8x128xf32>
    %76 = math.exp %75 : vector<8x128xf32>
    %cst_18 = arith.constant 1.000000e+00 : f32
    %77 = vector.broadcast %cst_18 : f32 to vector<8x128xf32>
    %78 = arith.addf %77, %76 : vector<8x128xf32>
    %79 = arith.divf %77, %78 : vector<8x128xf32>
    %80 = vector.extract_strided_slice %67 {offsets = [0, 256], sizes = [8, 128], strides = [1, 1]} : vector<8x512xf32> to vector<8x128xf32>
    %81 = math.tanh %80 : vector<8x128xf32>
    %82 = vector.extract_strided_slice %67 {offsets = [0, 384], sizes = [8, 128], strides = [1, 1]} : vector<8x512xf32> to vector<8x128xf32>
    %83 = arith.negf %82 : vector<8x128xf32>
    %84 = math.exp %83 : vector<8x128xf32>
    %cst_19 = arith.constant 1.000000e+00 : f32
    %85 = vector.broadcast %cst_19 : f32 to vector<8x128xf32>
    %86 = arith.addf %85, %84 : vector<8x128xf32>
    %87 = arith.divf %85, %86 : vector<8x128xf32>
    %88 = arith.mulf %79, %60 : vector<8x128xf32>
    %89 = arith.mulf %73, %81 : vector<8x128xf32>
    %90 = arith.addf %88, %89 : vector<8x128xf32>
    %91 = math.tanh %90 : vector<8x128xf32>
    %92 = arith.mulf %87, %91 : vector<8x128xf32>
    %c3_i32 = arith.constant 3 : i32
    %93 = arith.index_cast %c3_i32 : i32 to index
    %c0_20 = arith.constant 0 : index
    %c0_21 = arith.constant 0 : index
    %94 = vector.load %arg1[%93, %c0_20, %c0_21] : memref<8x8x512xf32, #tpu.memory_space<vmem>>, vector<1x8x512xf32>
    %95 = vector.shape_cast %94 : vector<1x8x512xf32> to vector<8x512xf32>
    %cst_22 = arith.constant dense<0.000000e+00> : vector<8x512xf32>
    %96 = tpu.matmul %92, %0, %cst_22 {dimension_numbers = #tpu.dot_dimension_numbers<[1], [0], [0], [1], [0, 0, 1, 1], [], []>, precision = #tpu.contract_precision<fp32>} : vector<8x128xf32>, vector<128x512xf32>, vector<8x512xf32> -> vector<8x512xf32>
    %97 = arith.addf %95, %96 : vector<8x512xf32>
    %98 = vector.extract_strided_slice %97 {offsets = [0, 0], sizes = [8, 128], strides = [1, 1]} : vector<8x512xf32> to vector<8x128xf32>
    %99 = arith.negf %98 : vector<8x128xf32>
    %100 = math.exp %99 : vector<8x128xf32>
    %cst_23 = arith.constant 1.000000e+00 : f32
    %101 = vector.broadcast %cst_23 : f32 to vector<8x128xf32>
    %102 = arith.addf %101, %100 : vector<8x128xf32>
    %103 = arith.divf %101, %102 : vector<8x128xf32>
    %104 = vector.extract_strided_slice %97 {offsets = [0, 128], sizes = [8, 128], strides = [1, 1]} : vector<8x512xf32> to vector<8x128xf32>
    %105 = arith.negf %104 : vector<8x128xf32>
    %106 = math.exp %105 : vector<8x128xf32>
    %cst_24 = arith.constant 1.000000e+00 : f32
    %107 = vector.broadcast %cst_24 : f32 to vector<8x128xf32>
    %108 = arith.addf %107, %106 : vector<8x128xf32>
    %109 = arith.divf %107, %108 : vector<8x128xf32>
    %110 = vector.extract_strided_slice %97 {offsets = [0, 256], sizes = [8, 128], strides = [1, 1]} : vector<8x512xf32> to vector<8x128xf32>
    %111 = math.tanh %110 : vector<8x128xf32>
    %112 = vector.extract_strided_slice %97 {offsets = [0, 384], sizes = [8, 128], strides = [1, 1]} : vector<8x512xf32> to vector<8x128xf32>
    %113 = arith.negf %112 : vector<8x128xf32>
    %114 = math.exp %113 : vector<8x128xf32>
    %cst_25 = arith.constant 1.000000e+00 : f32
    %115 = vector.broadcast %cst_25 : f32 to vector<8x128xf32>
    %116 = arith.addf %115, %114 : vector<8x128xf32>
    %117 = arith.divf %115, %116 : vector<8x128xf32>
    %118 = arith.mulf %109, %90 : vector<8x128xf32>
    %119 = arith.mulf %103, %111 : vector<8x128xf32>
    %120 = arith.addf %118, %119 : vector<8x128xf32>
    %121 = math.tanh %120 : vector<8x128xf32>
    %122 = arith.mulf %117, %121 : vector<8x128xf32>
    %c4_i32 = arith.constant 4 : i32
    %123 = arith.index_cast %c4_i32 : i32 to index
    %c0_26 = arith.constant 0 : index
    %c0_27 = arith.constant 0 : index
    %124 = vector.load %arg1[%123, %c0_26, %c0_27] : memref<8x8x512xf32, #tpu.memory_space<vmem>>, vector<1x8x512xf32>
    %125 = vector.shape_cast %124 : vector<1x8x512xf32> to vector<8x512xf32>
    %cst_28 = arith.constant dense<0.000000e+00> : vector<8x512xf32>
    %126 = tpu.matmul %122, %0, %cst_28 {dimension_numbers = #tpu.dot_dimension_numbers<[1], [0], [0], [1], [0, 0, 1, 1], [], []>, precision = #tpu.contract_precision<fp32>} : vector<8x128xf32>, vector<128x512xf32>, vector<8x512xf32> -> vector<8x512xf32>
    %127 = arith.addf %125, %126 : vector<8x512xf32>
    %128 = vector.extract_strided_slice %127 {offsets = [0, 0], sizes = [8, 128], strides = [1, 1]} : vector<8x512xf32> to vector<8x128xf32>
    %129 = arith.negf %128 : vector<8x128xf32>
    %130 = math.exp %129 : vector<8x128xf32>
    %cst_29 = arith.constant 1.000000e+00 : f32
    %131 = vector.broadcast %cst_29 : f32 to vector<8x128xf32>
    %132 = arith.addf %131, %130 : vector<8x128xf32>
    %133 = arith.divf %131, %132 : vector<8x128xf32>
    %134 = vector.extract_strided_slice %127 {offsets = [0, 128], sizes = [8, 128], strides = [1, 1]} : vector<8x512xf32> to vector<8x128xf32>
    %135 = arith.negf %134 : vector<8x128xf32>
    %136 = math.exp %135 : vector<8x128xf32>
    %cst_30 = arith.constant 1.000000e+00 : f32
    %137 = vector.broadcast %cst_30 : f32 to vector<8x128xf32>
    %138 = arith.addf %137, %136 : vector<8x128xf32>
    %139 = arith.divf %137, %138 : vector<8x128xf32>
    %140 = vector.extract_strided_slice %127 {offsets = [0, 256], sizes = [8, 128], strides = [1, 1]} : vector<8x512xf32> to vector<8x128xf32>
    %141 = math.tanh %140 : vector<8x128xf32>
    %142 = vector.extract_strided_slice %127 {offsets = [0, 384], sizes = [8, 128], strides = [1, 1]} : vector<8x512xf32> to vector<8x128xf32>
    %143 = arith.negf %142 : vector<8x128xf32>
    %144 = math.exp %143 : vector<8x128xf32>
    %cst_31 = arith.constant 1.000000e+00 : f32
    %145 = vector.broadcast %cst_31 : f32 to vector<8x128xf32>
    %146 = arith.addf %145, %144 : vector<8x128xf32>
    %147 = arith.divf %145, %146 : vector<8x128xf32>
    %148 = arith.mulf %139, %120 : vector<8x128xf32>
    %149 = arith.mulf %133, %141 : vector<8x128xf32>
    %150 = arith.addf %148, %149 : vector<8x128xf32>
    %151 = math.tanh %150 : vector<8x128xf32>
    %152 = arith.mulf %147, %151 : vector<8x128xf32>
    %c5_i32 = arith.constant 5 : i32
    %153 = arith.index_cast %c5_i32 : i32 to index
    %c0_32 = arith.constant 0 : index
    %c0_33 = arith.constant 0 : index
    %154 = vector.load %arg1[%153, %c0_32, %c0_33] : memref<8x8x512xf32, #tpu.memory_space<vmem>>, vector<1x8x512xf32>
    %155 = vector.shape_cast %154 : vector<1x8x512xf32> to vector<8x512xf32>
    %cst_34 = arith.constant dense<0.000000e+00> : vector<8x512xf32>
    %156 = tpu.matmul %152, %0, %cst_34 {dimension_numbers = #tpu.dot_dimension_numbers<[1], [0], [0], [1], [0, 0, 1, 1], [], []>, precision = #tpu.contract_precision<fp32>} : vector<8x128xf32>, vector<128x512xf32>, vector<8x512xf32> -> vector<8x512xf32>
    %157 = arith.addf %155, %156 : vector<8x512xf32>
    %158 = vector.extract_strided_slice %157 {offsets = [0, 0], sizes = [8, 128], strides = [1, 1]} : vector<8x512xf32> to vector<8x128xf32>
    %159 = arith.negf %158 : vector<8x128xf32>
    %160 = math.exp %159 : vector<8x128xf32>
    %cst_35 = arith.constant 1.000000e+00 : f32
    %161 = vector.broadcast %cst_35 : f32 to vector<8x128xf32>
    %162 = arith.addf %161, %160 : vector<8x128xf32>
    %163 = arith.divf %161, %162 : vector<8x128xf32>
    %164 = vector.extract_strided_slice %157 {offsets = [0, 128], sizes = [8, 128], strides = [1, 1]} : vector<8x512xf32> to vector<8x128xf32>
    %165 = arith.negf %164 : vector<8x128xf32>
    %166 = math.exp %165 : vector<8x128xf32>
    %cst_36 = arith.constant 1.000000e+00 : f32
    %167 = vector.broadcast %cst_36 : f32 to vector<8x128xf32>
    %168 = arith.addf %167, %166 : vector<8x128xf32>
    %169 = arith.divf %167, %168 : vector<8x128xf32>
    %170 = vector.extract_strided_slice %157 {offsets = [0, 256], sizes = [8, 128], strides = [1, 1]} : vector<8x512xf32> to vector<8x128xf32>
    %171 = math.tanh %170 : vector<8x128xf32>
    %172 = vector.extract_strided_slice %157 {offsets = [0, 384], sizes = [8, 128], strides = [1, 1]} : vector<8x512xf32> to vector<8x128xf32>
    %173 = arith.negf %172 : vector<8x128xf32>
    %174 = math.exp %173 : vector<8x128xf32>
    %cst_37 = arith.constant 1.000000e+00 : f32
    %175 = vector.broadcast %cst_37 : f32 to vector<8x128xf32>
    %176 = arith.addf %175, %174 : vector<8x128xf32>
    %177 = arith.divf %175, %176 : vector<8x128xf32>
    %178 = arith.mulf %169, %150 : vector<8x128xf32>
    %179 = arith.mulf %163, %171 : vector<8x128xf32>
    %180 = arith.addf %178, %179 : vector<8x128xf32>
    %181 = math.tanh %180 : vector<8x128xf32>
    %182 = arith.mulf %177, %181 : vector<8x128xf32>
    %c6_i32 = arith.constant 6 : i32
    %183 = arith.index_cast %c6_i32 : i32 to index
    %c0_38 = arith.constant 0 : index
    %c0_39 = arith.constant 0 : index
    %184 = vector.load %arg1[%183, %c0_38, %c0_39] : memref<8x8x512xf32, #tpu.memory_space<vmem>>, vector<1x8x512xf32>
    %185 = vector.shape_cast %184 : vector<1x8x512xf32> to vector<8x512xf32>
    %cst_40 = arith.constant dense<0.000000e+00> : vector<8x512xf32>
    %186 = tpu.matmul %182, %0, %cst_40 {dimension_numbers = #tpu.dot_dimension_numbers<[1], [0], [0], [1], [0, 0, 1, 1], [], []>, precision = #tpu.contract_precision<fp32>} : vector<8x128xf32>, vector<128x512xf32>, vector<8x512xf32> -> vector<8x512xf32>
    %187 = arith.addf %185, %186 : vector<8x512xf32>
    %188 = vector.extract_strided_slice %187 {offsets = [0, 0], sizes = [8, 128], strides = [1, 1]} : vector<8x512xf32> to vector<8x128xf32>
    %189 = arith.negf %188 : vector<8x128xf32>
    %190 = math.exp %189 : vector<8x128xf32>
    %cst_41 = arith.constant 1.000000e+00 : f32
    %191 = vector.broadcast %cst_41 : f32 to vector<8x128xf32>
    %192 = arith.addf %191, %190 : vector<8x128xf32>
    %193 = arith.divf %191, %192 : vector<8x128xf32>
    %194 = vector.extract_strided_slice %187 {offsets = [0, 128], sizes = [8, 128], strides = [1, 1]} : vector<8x512xf32> to vector<8x128xf32>
    %195 = arith.negf %194 : vector<8x128xf32>
    %196 = math.exp %195 : vector<8x128xf32>
    %cst_42 = arith.constant 1.000000e+00 : f32
    %197 = vector.broadcast %cst_42 : f32 to vector<8x128xf32>
    %198 = arith.addf %197, %196 : vector<8x128xf32>
    %199 = arith.divf %197, %198 : vector<8x128xf32>
    %200 = vector.extract_strided_slice %187 {offsets = [0, 256], sizes = [8, 128], strides = [1, 1]} : vector<8x512xf32> to vector<8x128xf32>
    %201 = math.tanh %200 : vector<8x128xf32>
    %202 = vector.extract_strided_slice %187 {offsets = [0, 384], sizes = [8, 128], strides = [1, 1]} : vector<8x512xf32> to vector<8x128xf32>
    %203 = arith.negf %202 : vector<8x128xf32>
    %204 = math.exp %203 : vector<8x128xf32>
    %cst_43 = arith.constant 1.000000e+00 : f32
    %205 = vector.broadcast %cst_43 : f32 to vector<8x128xf32>
    %206 = arith.addf %205, %204 : vector<8x128xf32>
    %207 = arith.divf %205, %206 : vector<8x128xf32>
    %208 = arith.mulf %199, %180 : vector<8x128xf32>
    %209 = arith.mulf %193, %201 : vector<8x128xf32>
    %210 = arith.addf %208, %209 : vector<8x128xf32>
    %211 = math.tanh %210 : vector<8x128xf32>
    %212 = arith.mulf %207, %211 : vector<8x128xf32>
    %c7_i32 = arith.constant 7 : i32
    %213 = arith.index_cast %c7_i32 : i32 to index
    %c0_44 = arith.constant 0 : index
    %c0_45 = arith.constant 0 : index
    %214 = vector.load %arg1[%213, %c0_44, %c0_45] : memref<8x8x512xf32, #tpu.memory_space<vmem>>, vector<1x8x512xf32>
    %215 = vector.shape_cast %214 : vector<1x8x512xf32> to vector<8x512xf32>
    %cst_46 = arith.constant dense<0.000000e+00> : vector<8x512xf32>
    %216 = tpu.matmul %212, %0, %cst_46 {dimension_numbers = #tpu.dot_dimension_numbers<[1], [0], [0], [1], [0, 0, 1, 1], [], []>, precision = #tpu.contract_precision<fp32>} : vector<8x128xf32>, vector<128x512xf32>, vector<8x512xf32> -> vector<8x512xf32>
    %217 = arith.addf %215, %216 : vector<8x512xf32>
    %218 = vector.extract_strided_slice %217 {offsets = [0, 0], sizes = [8, 128], strides = [1, 1]} : vector<8x512xf32> to vector<8x128xf32>
    %219 = arith.negf %218 : vector<8x128xf32>
    %220 = math.exp %219 : vector<8x128xf32>
    %cst_47 = arith.constant 1.000000e+00 : f32
    %221 = vector.broadcast %cst_47 : f32 to vector<8x128xf32>
    %222 = arith.addf %221, %220 : vector<8x128xf32>
    %223 = arith.divf %221, %222 : vector<8x128xf32>
    %224 = vector.extract_strided_slice %217 {offsets = [0, 128], sizes = [8, 128], strides = [1, 1]} : vector<8x512xf32> to vector<8x128xf32>
    %225 = arith.negf %224 : vector<8x128xf32>
    %226 = math.exp %225 : vector<8x128xf32>
    %cst_48 = arith.constant 1.000000e+00 : f32
    %227 = vector.broadcast %cst_48 : f32 to vector<8x128xf32>
    %228 = arith.addf %227, %226 : vector<8x128xf32>
    %229 = arith.divf %227, %228 : vector<8x128xf32>
    %230 = vector.extract_strided_slice %217 {offsets = [0, 256], sizes = [8, 128], strides = [1, 1]} : vector<8x512xf32> to vector<8x128xf32>
    %231 = math.tanh %230 : vector<8x128xf32>
    %232 = vector.extract_strided_slice %217 {offsets = [0, 384], sizes = [8, 128], strides = [1, 1]} : vector<8x512xf32> to vector<8x128xf32>
    %233 = arith.negf %232 : vector<8x128xf32>
    %234 = math.exp %233 : vector<8x128xf32>
    %cst_49 = arith.constant 1.000000e+00 : f32
    %235 = vector.broadcast %cst_49 : f32 to vector<8x128xf32>
    %236 = arith.addf %235, %234 : vector<8x128xf32>
    %237 = arith.divf %235, %236 : vector<8x128xf32>
    %238 = arith.mulf %229, %210 : vector<8x128xf32>
    %239 = arith.mulf %223, %231 : vector<8x128xf32>
    %240 = arith.addf %238, %239 : vector<8x128xf32>
    %241 = math.tanh %240 : vector<8x128xf32>
    %242 = arith.mulf %237, %241 : vector<8x128xf32>
    %c8_i32 = arith.constant 8 : i32
    %c0_50 = arith.constant 0 : index
    %c0_51 = arith.constant 0 : index
    %243 = vector.load %arg3[%c0_50, %c0_51] : memref<8x128xf32, #tpu.memory_space<vmem>>, vector<8x128xf32>
    tpu.vector_store %arg3[%c0_50, %c0_51], %242 {strides = array<i32>} : memref<8x128xf32, #tpu.memory_space<vmem>>, vector<8x128xf32>,
    %c0_52 = arith.constant 0 : index
    %c0_53 = arith.constant 0 : index
    %244 = vector.load %arg4[%c0_52, %c0_53] : memref<8x128xf32, #tpu.memory_space<vmem>>, vector<8x128xf32>
    tpu.vector_store %arg4[%c0_52, %c0_53], %240 {strides = array<i32>} : memref<8x128xf32, #tpu.memory_space<vmem>>, vector<8x128xf32>,
    return
  }
  func.func @transform_0(%arg0: i32) -> (i32, i32, i32) {
    %c0_i32 = arith.constant 0 : i32
    %c0_i32_0 = arith.constant 0 : i32
    %c0_i32_1 = arith.constant 0 : i32
    %c0_i32_2 = arith.constant 0 : i32
    return %c0_i32, %c0_i32_0, %c0_i32_1 : i32, i32, i32
  }
  func.func @transform_1(%arg0: i32) -> (i32, i32) {
    %c0_i32 = arith.constant 0 : i32
    %c0_i32_0 = arith.constant 0 : i32
    %c0_i32_1 = arith.constant 0 : i32
    return %c0_i32, %c0_i32_0 : i32, i32
  }
  func.func @transform_2(%arg0: i32) -> (i32, i32) {
    %c0_i32 = arith.constant 0 : i32
    %c0_i32_0 = arith.constant 0 : i32
    %c0_i32_1 = arith.constant 0 : i32
    return %c0_i32, %c0_i32_0 : i32, i32
  }
  func.func @transform_3(%arg0: i32) -> (i32, i32) {
    %c0_i32 = arith.constant 0 : i32
    %c0_i32_0 = arith.constant 0 : i32
    %c0_i32_1 = arith.constant 0 : i32
    return %c0_i32, %c0_i32_0 : i32, i32
  }
}

</mosaic_0001>

<bundles_post_ra>
// kernel: tpu_custom_call.1
= control target key start
LH: loop header
LB: loop body
LE: loop exit
PB: predicated region body
PF: predicated region fallthrough
CT: control target
= control target key end

     0   :  { %9 = vsyncpa [#allocation3], 0  ;;  %s20774_s0 = inlined_call_operand.hbm [shape: f32[8,8,512], index: 0, kind: input, shape index: {}]   ;;  %s20775_s1 = inlined_call_operand.hbm [shape: f32[128,512], index: 1, kind: input, shape index: {}]   ;;  %s20776_s2 = inlined_call_operand.hbm [shape: f32[8,128], index: 2, kind: output, shape index: {0}]   ;;  %s20777_s3 = inlined_call_operand.hbm [shape: f32[8,128], index: 3, kind: output, shape index: {1}]  }
   0x1   :  { %10 = vsyncpa [#allocation6], 0 }
   0x2   :  { %11 = vsyncpa [#allocation4], 0 }
   0x3   :  { %12 = vsyncpa [#allocation9], 0  ;;  %s17543_s12 = smov [#allocation2]   ;;  %s17447_s16 = scalar_lea.hbm %s20774_s0, 4096 }
   0x4   :  { %s18_s13 = sshll.u32 %s17543_s12, 4  ;;  %p17448_p0 = scmp.ne.s32.totalorder %s20774_s0, %s17447_s16  ;;  %s19_s13 = int_to_ptr.vmem [resolvable:$true] %s18_s13 }
   0x5   :  { %p17451_p1 = scmp.lt.u32.totalorder %s17447_s16, %s20774_s0 }
   0x7   :  { %p17453_p2 = pnand %p17451_p1, %p17448_p0 }
   0x9   :  { %17456 = shalt.err (!%p17453_p2)
}
   0xa   :  { %s17457_s21 = scalar_lea.vmem %s19_s13, 4096  ;;  %p17462_p4 = scmp.lt.s32.totalorder %s19_s13, %s19_s13 }
   0xb   :  { %p17458_p3 = scmp.ne.s32.totalorder %s19_s13, %s17457_s21  ;;  %p17463_p5 = scmp.lt.s32.totalorder %s17457_s21, %s17457_s21 }
   0xd   :  { %p17464_p6 = por %p17463_p5, %p17462_p4 }
   0xf   :  { %p17465_p7 = pnand %p17464_p6, %p17458_p3 }
  0x11   :  { %17468 = shalt.err (!%p17465_p7)
}
  0x12   :  { %s17544_s22 = smov 512   ;;  %s17545_s23 = smov 32  }
  0x13   :  { %24 = dma.hbm_to_vmem [thread:$0]  %s20774_s0, 4096, %s19_s13, [#allocation3], %s17544_s22, %s17544_s22, %s17545_s23  }
  0x14   :  { %s17546_s26 = smov [#allocation5]   ;;  %s17469_s30 = scalar_lea.hbm %s20775_s1, 8192 }
  0x15   :  { %s30_s27 = sshll.u32 %s17546_s26, 4  ;;  %p17470_p8 = scmp.ne.s32.totalorder %s20775_s1, %s17469_s30  ;;  %s31_s27 = int_to_ptr.vmem [resolvable:$true] %s30_s27 }
  0x16   :  { %p17473_p9 = scmp.lt.u32.totalorder %s17469_s30, %s20775_s1 }
  0x18   :  { %p17475_p10 = pnand %p17473_p9, %p17470_p8 }
  0x1a   :  { %17478 = shalt.err (!%p17475_p10)
}
  0x1b   :  { %s17479_s8 = scalar_lea.vmem %s31_s27, 8192  ;;  %p17484_p12 = scmp.lt.s32.totalorder %s31_s27, %s31_s27 }
  0x1c   :  { %p17480_p11 = scmp.ne.s32.totalorder %s31_s27, %s17479_s8  ;;  %p17485_p13 = scmp.lt.s32.totalorder %s17479_s8, %s17479_s8 }
  0x1e   :  { %p17486_p0 = por %p17485_p13, %p17484_p12 }
  0x20   :  { %p17487_p1 = pnand %p17486_p0, %p17480_p11 }
  0x22   :  { %17490 = shalt.err (!%p17487_p1)
}
  0x23   :  { %36 = dma.hbm_to_vmem [thread:$0]  %s20775_s1, 8192, %s31_s27, [#allocation6], %s17544_s22, %s17544_s22, %s17545_s23  }
  0x24   :  { %17535 = dma.done.wait [#allocation3], 4096  }
  0x25   :  { %17536 = vsyncadd [#allocation3], 4294963200 }
  0x26   :  { %17537 = dma.done.wait [#allocation6], 8192  }
  0x27   :  { %17538 = vsyncadd [#allocation6], 4294959104  ;;  %v20782_v0 = vmov 0.0   ;;  %v17596_v1 = vld [vmem:[#allocation5 + $0x8] sm:$0xff]  ;;  %v17600_v3 = vld [vmem:[#allocation5 + $0x18] sm:$0xff]  ;;  %s17548_s1 = smov [#allocation8]  }
  0x28   :  { %207 = vmatprep.mubr.f32.mxu0 %v20782_v0  ;;  %1049 = vmatprep.mubr.f32.mxu1 %v20782_v0  ;;  %v17598_v2 = vld [vmem:[#allocation5 + $0x28] sm:$0xff]  ;;  %v20805_v4 = vand.u32 4294901760, %v17596_v1  ;;  %v17604_v6 = vld [vmem:[#allocation5 + $0x38] sm:$0xff]  ;;  %v20801_v7 = vand.u32 4294901760, %v17600_v3  ;;  %v17607_v8 = vld [vmem:[#allocation5] sm:$0xff]  ;;  %s14042_s10 = sshll.u32 %s17548_s1, 4  ;;  %s14043_s10 = int_to_ptr.vmem [resolvable:$true] %s14042_s10 }
  0x29   :  { %v20804_v5 = vand.u32 4294901760, %v17598_v2  ;;  %v17609_v9 = vld [vmem:[#allocation5 + $0x20] sm:$0xff]  ;;  %v20800_v10 = vand.u32 4294901760, %v17604_v6  ;;  %v20799_v11 = vand.u32 4294901760, %v17607_v8  ;;  %v17614_v13 = vld [vmem:[#allocation5 + $0x10] sm:$0xff]  ;;  %v17618_v15 = vld [vmem:[#allocation5 + $0x48] sm:$0xff]  ;;  %p17496_p3 = scmp.lt.s32.totalorder %s14043_s10, %s14043_s10 }
  0x2a   :  { %v20798_v12 = vand.u32 4294901760, %v17609_v9  ;;  %v17616_v14 = vld [vmem:[#allocation5 + $0x30] sm:$0xff]  ;;  %v20797_v17 = vand.u32 4294901760, %v17614_v13  ;;  %v17628_v19 = vld [vmem:[#allocation5 + $0x68] sm:$0xff]  ;;  %v20793_v20 = vand.u32 4294901760, %v17618_v15  ;;  %v17631_v21 = vld [vmem:[#allocation5 + $0x58] sm:$0xff] }
  0x2b   :  { %v17624_v16 = vpack.c.bf16 %v20804_v5, %v20805_v4  ;;  %v20796_v18 = vand.u32 4294901760, %v17616_v14  ;;  %v17633_v22 = vld [vmem:[#allocation5 + $0x78] sm:$0xff]  ;;  %v17639_v23 = vpack.c.bf16 %v20800_v10, %v20801_v7  ;;  %v20792_v25 = vand.u32 4294901760, %v17628_v19  ;;  %v17649_v27 = vld [vmem:[#allocation5 + $0x40] sm:$0xff]  ;;  %v17653_v29 = vld [vmem:[#allocation5 + $0x50] sm:$0xff]  ;;  %s17491_s11 = scalar_lea.vmem %s14043_s10, 128 }
  0x2c   :  { %v17645_v24 = vpack.c.bf16 %v20798_v12, %v20799_v11  ;;  %v20791_v26 = vand.u32 4294901760, %v17631_v21  ;;  %v17651_v28 = vld [vmem:[#allocation5 + $0x60] sm:$0xff]  ;;  %v20786_v31 = vand.u32 4294901760, %v17633_v22  ;;  %v20785_v32 = vand.u32 4294901760, %v17649_v27  ;;  %v17665_v34 = vld [vmem:[#allocation5 + $0x70] sm:$0xff]  ;;  %v17667_v35 = vld [vmem:[#allocation5 + $0x88] sm:$0xff]  ;;  %p17492_p2 = scmp.ne.s32.totalorder %s14043_s10, %s17491_s11  ;;  %p17497_p4 = scmp.lt.s32.totalorder %s17491_s11, %s17491_s11 }
  0x2d   :  { %21227 = vst [vmem:[#allocation14_spill] sm:$0xff] %v17624_v16  ;;  %21228 = vst [vmem:[#allocation15_spill] sm:$0xff] %v17639_v23  ;;  %14081 = vmatprep.subr.bf16.mxu0 %v17624_v16  ;;  %v17660_v30 = vpack.c.bf16 %v20796_v18, %v20797_v17  ;;  %v20784_v33 = vand.u32 4294901760, %v17651_v28  ;;  %v17669_v36 = vld [vmem:[#allocation5 + $0xa8] sm:$0xff]  ;;  %14273 = vmatprep.subr.bf16.mxu1 %v17639_v23  ;;  %v17677_v37 = vpack.c.bf16 %v20792_v25, %v20793_v20  ;;  %v17682_v41 = vld [vmem:[#allocation5 + $0x98] sm:$0xff] }
  0x2e   :  { %21229 = vst [vmem:[#allocation16_spill] sm:$0xff] %v17645_v24  ;;  %14083 = vmatpush1.bf16.msra.mxu0 %v17645_v24  ;;  %v20781_v38 = vand.u32 4294901760, %v17653_v29  ;;  %v20778_v39 = vand.u32 4294901760, %v17665_v34  ;;  %v20780_v40 = vand.u32 4294901760, %v17667_v35  ;;  %v17684_v42 = vld [vmem:[#allocation5 + $0xb8] sm:$0xff]  ;;  %v17686_v43 = vld [vmem:[#allocation5 + $0x80] sm:$0xff]  ;;  %v17693_v44 = vpack.c.bf16 %v20786_v31, %v20791_v26  ;;  %p17498_p5 = por %p17497_p4, %p17496_p3 }
  0x2f   :  { %21230 = vst [vmem:[#allocation17_spill] sm:$0xff] %v17660_v30  ;;  %21231 = vst [vmem:[#allocation18_spill] sm:$0xff] %v17677_v37  ;;  %14275 = vmatpush1.bf16.msra.mxu1 %v17660_v30  ;;  %v17699_v45 = vpack.c.bf16 %v20784_v33, %v20785_v32  ;;  %v20779_v46 = vand.u32 4294901760, %v17669_v36  ;;  %v20790_v47 = vand.u32 4294901760, %v17682_v41  ;;  %v17703_v48 = vld [vmem:[#allocation5 + $0xa0] sm:$0xff]  ;;  %v17705_v49 = vld [vmem:[#allocation5 + $0x90] sm:$0xff]  ;;  %14085 = vmatprep.subr.bf16.mxu0 %v17677_v37 }
  0x30   :  { %21232 = vst [vmem:[#allocation19_spill] sm:$0xff] %v17693_v44  ;;  %v17707_v50 = vld [vmem:[#allocation5 + $0xb0] sm:$0xff]  ;;  %v17714_v51 = vpack.c.bf16 %v20778_v39, %v20781_v38  ;;  %v20789_v52 = vand.u32 4294901760, %v17684_v42  ;;  %v20788_v53 = vand.u32 4294901760, %v17686_v43  ;;  %v20787_v54 = vand.u32 4294901760, %v17703_v48  ;;  %v17719_v55 = vld [vmem:[#allocation5 + $0xc8] sm:$0xff]  ;;  %14277 = vmatprep.subr.bf16.mxu1 %v17693_v44  ;;  %p17499_p6 = pnand %p17498_p5, %p17492_p2 }
  0x31   :  { %21233 = vst [vmem:[#allocation20_spill] sm:$0xff] %v17699_v45  ;;  %v17721_v56 = vld [vmem:[#allocation5 + $0xe8] sm:$0xff]  ;;  %v17723_v57 = vld [vmem:[#allocation5 + $0xd8] sm:$0xff]  ;;  %v17730_v58 = vpack.c.bf16 %v20779_v46, %v20780_v40  ;;  %v20795_v59 = vand.u32 4294901760, %v17705_v49  ;;  %v20794_v60 = vand.u32 4294901760, %v17707_v50  ;;  %v20803_v61 = vand.u32 4294901760, %v17719_v55 }
  0x32   :  { %21234 = vst [vmem:[#allocation21_spill] sm:$0xff] %v17714_v51  ;;  %v17735_v62 = vld [vmem:[#allocation5 + $0xf8] sm:$0xff]  ;;  %v17737_v63 = vld [vmem:[#allocation5 + $0xc0] sm:$0xff]  ;;  %14087 = vmatpush1.bf16.msra.mxu0 %v17699_v45  ;;  %v17746_v46 = vpack.c.bf16 %v20789_v52, %v20790_v47  ;;  %v17752_v40 = vpack.c.bf16 %v20787_v54, %v20788_v53  ;;  %v20802_v38 = vand.u32 4294901760, %v17721_v56  ;;  %v20807_v0 = vand.u32 4294901760, %v17723_v57  ;;  %v17756_v33 = vld [vmem:[#allocation5 + $0xd0] sm:$0xff] }
  0x33   :  { %21235 = vst [vmem:[#allocation22_spill] sm:$0xff] %v17730_v58  ;;  %v17739_v39 = vld [vmem:[#allocation5 + $0xe0] sm:$0xff]  ;;  %v17758_v32 = vld [vmem:[#allocation5 + $0xf0] sm:$0xff]  ;;  %v17760_v31 = vld [vmem:[#allocation5 + $0x108] sm:$0xff]  ;;  %14279 = vmatpush1.bf16.msra.mxu1 %v17714_v51  ;;  %14089 = vmatprep.subr.bf16.mxu0 %v17730_v58  ;;  %v17768_v54 = vpack.c.bf16 %v20794_v60, %v20795_v59  ;;  %v20806_v53 = vand.u32 4294901760, %v17735_v62  ;;  %v20809_v52 = vand.u32 4294901760, %v17737_v63 }
  0x34   :  { %21236 = vst [vmem:[#allocation23_spill] sm:$0xff] %v17746_v46  ;;  %21237 = vst [vmem:[#allocation24_spill] sm:$0xff] %v17752_v40  ;;  %v20808_v47 = vand.u32 4294901760, %v17739_v39  ;;  %v17773_v26 = vld [vmem:[#allocation5 + $0x128] sm:$0xff]  ;;  %v17775_v25 = vld [vmem:[#allocation5 + $0x118] sm:$0xff]  ;;  %14281 = vmatprep.subr.bf16.mxu1 %v17746_v46  ;;  %v17784_v60 = vpack.c.bf16 %v20802_v38, %v20803_v61  ;;  %v20816_v59 = vand.u32 4294901760, %v17756_v33 }
  0x35   :  { %21238 = vst [vmem:[#allocation25_spill] sm:$0xff] %v17768_v54  ;;  %21239 = vst [vmem:[#allocation26_spill] sm:$0xff] %v17775_v25  ;;  %v17777_v20 = vld [vmem:[#allocation5 + $0x138] sm:$0xff]  ;;  %v17789_v12 = vld [vmem:[#allocation5 + $0x100] sm:$0xff]  ;;  %v17799_v7 = vpack.c.bf16 %v20806_v53, %v20807_v0  ;;  %v21250_v53 = vand.u32 4294901760, %v17758_v32 }
  0x36   :  { %21240 = vst [vmem:[#allocation27_spill] sm:$0xff] %v17777_v20  ;;  %21241 = vst [vmem:[#allocation28_spill] sm:$0xff] %v17784_v60  ;;  %v17791_v11 = vld [vmem:[#allocation5 + $0x120] sm:$0xff]  ;;  %v17793_v10 = vld [vmem:[#allocation5 + $0x110] sm:$0xff]  ;;  %v17805_v38 = vpack.c.bf16 %v20808_v47, %v20809_v52  ;;  %14091 = vmatpush1.bf16.msra.mxu0 %v17752_v40  ;;  %v21255_v40 = vand.u32 4294901760, %v17760_v31 }
  0x37   :  { %21242 = vst [vmem:[#allocation29_spill] sm:$0xff] %v17789_v12  ;;  %21243 = vst [vmem:[#allocation30_spill] sm:$0xff] %v17791_v11  ;;  %v17809_v4 = vld [vmem:[#allocation5 + $0x130] sm:$0xff]  ;;  %v17811_v17 = vld [vmem:[#allocation5 + $0x148] sm:$0xff]  ;;  %v17820_v0 = vpack.c.bf16 %v21250_v53, %v20816_v59  ;;  %14283 = vmatpush1.bf16.msra.mxu1 %v17768_v54  ;;  %14093 = vmatprep.subr.bf16.mxu0 %v17784_v60  ;;  %v21256_v53 = vand.u32 4294901760, %v17773_v26  ;;  %v21261_v54 = vand.u32 4294901760, %v17775_v25 }
  0x38   :  { %21244 = vst [vmem:[#allocation31_spill] sm:$0xff] %v17793_v10  ;;  %21245 = vst [vmem:[#allocation32_spill] sm:$0xff] %v17799_v7  ;;  %v17813_v18 = vld [vmem:[#allocation5 + $0x168] sm:$0xff]  ;;  %v17825_v61 = vld [vmem:[#allocation5 + $0x158] sm:$0xff]  ;;  %14285 = vmatprep.subr.bf16.mxu1 %v17799_v7  ;;  %v21262_v60 = vand.u32 4294901760, %v17777_v20  ;;  %v21265_v5 = vand.u32 4294901760, %v17791_v11 }
  0x39   :  { %21246 = vst [vmem:[#allocation33_spill] sm:$0xff] %v17805_v38  ;;  %21247 = vst [vmem:[#allocation34_spill] sm:$0xff] %v17809_v4  ;;  %v17827_v46 = vld [vmem:[#allocation5 + $0x178] sm:$0xff]  ;;  %v17829_v51 = vld [vmem:[#allocation5 + $0x140] sm:$0xff]  ;;  %v17837_v59 = vpack.c.bf16 %v21256_v53, %v21255_v40  ;;  %v21264_v53 = vand.u32 4294901760, %v17789_v12  ;;  %v21268_v23 = vand.u32 4294901760, %v17793_v10 }
  0x3a   :  { %21248 = vst [vmem:[#allocation35_spill] sm:$0xff] %v17811_v17  ;;  %21249 = vst [vmem:[#allocation36_spill] sm:$0xff] %v17813_v18  ;;  %v17842_v58 = vld [vmem:[#allocation5 + $0x160] sm:$0xff]  ;;  %v17844_v45 = vld [vmem:[#allocation5 + $0x150] sm:$0xff]  ;;  %v17853_v40 = vpack.c.bf16 %v21262_v60, %v21261_v54  ;;  %v21269_v54 = vand.u32 4294901760, %v17809_v4  ;;  %14095 = vmatpush1.bf16.msra.mxu0 %v17805_v38  ;;  %v21273_v10 = vand.u32 4294901760, %v17811_v17 }
  0x3b   :  { %21251 = vst [vmem:[#allocation37_spill] sm:$0xff] %v17820_v0  ;;  %21252 = vst [vmem:[#allocation38_spill] sm:$0xff] %v17825_v61  ;;  %v17846_v44 = vld [vmem:[#allocation5 + $0x170] sm:$0xff]  ;;  %v17859_v52 = vpack.c.bf16 %v21265_v5, %v21264_v53  ;;  %v17863_v37 = vld [vmem:[#allocation5 + $0x188] sm:$0xff]  ;;  %v21274_v4 = vand.u32 4294901760, %v17813_v18  ;;  %14287 = vmatpush1.bf16.msra.mxu1 %v17820_v0  ;;  %14097 = vmatprep.subr.bf16.mxu0 %v17837_v59  ;;  %v21276_v38 = vand.u32 4294901760, %v17825_v61 }
  0x3c   :  { %21253 = vst [vmem:[#allocation39_spill] sm:$0xff] %v17827_v46  ;;  %21254 = vst [vmem:[#allocation40_spill] sm:$0xff] %v17829_v51  ;;  %v17865_v24 = vld [vmem:[#allocation5 + $0x1a8] sm:$0xff]  ;;  %v17867_v7 = vld [vmem:[#allocation5 + $0x198] sm:$0xff]  ;;  %v17873_v60 = vpack.c.bf16 %v21269_v54, %v21268_v23  ;;  %v21279_v5 = vand.u32 4294901760, %v17829_v51  ;;  %v21280_v53 = vand.u32 4294901760, %v17842_v58  ;;  %14289 = vmatprep.subr.bf16.mxu1 %v17853_v40 }
  0x3d   :  { %21257 = vst [vmem:[#allocation41_spill] sm:$0xff] %v17837_v59  ;;  %21258 = vst [vmem:[#allocation42_spill] sm:$0xff] %v17842_v58  ;;  %v17878_v47 = vld [vmem:[#allocation5 + $0x1b8] sm:$0xff]  ;;  %v17880_v30 = vld [vmem:[#allocation5 + $0x180] sm:$0xff]  ;;  %v17889_v23 = vpack.c.bf16 %v21274_v4, %v21273_v10  ;;  %v21277_v4 = vand.u32 4294901760, %v17827_v46  ;;  %v21282_v59 = vand.u32 4294901760, %v17844_v45 }
  0x3e   :  { %21259 = vst [vmem:[#allocation43_spill] sm:$0xff] %v17844_v45  ;;  %21260 = vst [vmem:[#allocation44_spill] sm:$0xff] %v17846_v44  ;;  %v17882_v11 = vld [vmem:[#allocation5 + $0x1a0] sm:$0xff]  ;;  %v17894_v16 = vld [vmem:[#allocation5 + $0x190] sm:$0xff]  ;;  %v17912_v54 = vpack.c.bf16 %v21280_v53, %v21279_v5  ;;  %v21287_v45 = vand.u32 4294901760, %v17865_v24  ;;  %14099 = vmatpush1.bf16.msra.mxu0 %v17859_v52 }
  0x3f   :  { %21263 = vst [vmem:[#allocation45_spill] sm:$0xff] %v17853_v40  ;;  %21266 = vst [vmem:[#allocation46_spill] sm:$0xff] %v17859_v52  ;;  %v17896_v12 = vld [vmem:[#allocation5 + $0x1b0] sm:$0xff]  ;;  %v17898_v20 = vld [vmem:[#allocation5 + $0x1c8] sm:$0xff]  ;;  %v17906_v10 = vpack.c.bf16 %v21277_v4, %v21276_v38  ;;  %v21283_v38 = vand.u32 4294901760, %v17846_v44  ;;  %v21286_v40 = vand.u32 4294901760, %v17863_v37  ;;  %14291 = vmatpush1.bf16.msra.mxu1 %v17873_v60  ;;  %14101 = vmatprep.subr.bf16.mxu0 %v17889_v23 }
  0x40   :  { %21267 = vst [vmem:[#allocation47_spill] sm:$0xff] %v17863_v37  ;;  %21270 = vst [vmem:[#allocation48_spill] sm:$0xff] %v17873_v60  ;;  %v17916_v25 = vld [vmem:[#allocation5 + $0x1e8] sm:$0xff]  ;;  %v17918_v0 = vld [vmem:[#allocation5 + $0x1d8] sm:$0xff]  ;;  %v21289_v44 = vand.u32 4294901760, %v17867_v7  ;;  %v21290_v37 = vand.u32 4294901760, %v17878_v47 }
  0x41   :  { %21271 = vst [vmem:[#allocation49_spill] sm:$0xff] %v17878_v47  ;;  %21272 = vst [vmem:[#allocation50_spill] sm:$0xff] %v17882_v11  ;;  %v17925_v4 = vpack.c.bf16 %v21283_v38, %v21282_v59  ;;  %v17930_v18 = vld [vmem:[#allocation5 + $0x1f8] sm:$0xff]  ;;  %v17932_v17 = vld [vmem:[#allocation5 + $0x1c0] sm:$0xff]  ;;  %v17940_v46 = vpack.c.bf16 %v21287_v45, %v21286_v40  ;;  %v21292_v45 = vand.u32 4294901760, %v17880_v30  ;;  %v21293_v40 = vand.u32 4294901760, %v17882_v11  ;;  %14293 = vmatprep.subr.bf16.mxu1 %v17906_v10 }
  0x42   :  { %21275 = vst [vmem:[#allocation51_spill] sm:$0xff] %v17889_v23  ;;  %21278 = vst [vmem:[#allocation52_spill] sm:$0xff] %v17906_v10  ;;  %v17934_v51 = vld [vmem:[#allocation5 + $0x1e0] sm:$0xff]  ;;  %v17945_v58 = vld [vmem:[#allocation5 + $0x1d0] sm:$0xff]  ;;  %v17954_v61 = vpack.c.bf16 %v21290_v37, %v21289_v44  ;;  %v20889_v5 = vand.u32 4294901760, %v17916_v25  ;;  %v21295_v52 = vand.u32 4294901760, %v17894_v16  ;;  %14103 = vmatpush1.bf16.msra.mxu0 %v17912_v54 }
  0x43   :  { %21281 = vst [vmem:[#allocation53_spill] sm:$0xff] %v17912_v54  ;;  %21284 = vst [vmem:[#allocation54_spill] sm:$0xff] %v17925_v4  ;;  %v17947_v53 = vld [vmem:[#allocation5 + $0x1f0] sm:$0xff]  ;;  %v17960_v59 = vpack.c.bf16 %v21293_v40, %v21292_v45  ;;  %v21296_v47 = vand.u32 4294901760, %v17896_v12  ;;  %v20890_v44 = vand.u32 4294901760, %v17930_v18  ;;  %v21298_v40 = vand.u32 4294901760, %v17898_v20  ;;  %14295 = vmatpush1.bf16.msra.mxu1 %v17925_v4  ;;  %14105 = vmatprep.subr.bf16.mxu0 %v17940_v46 }
  0x44   :  { %21285 = vst [vmem:[#allocation55_spill] sm:$0xff] %v17932_v17  ;;  %21288 = vst [vmem:[#allocation56_spill] sm:$0xff] %v17940_v46  ;;  %v21301_v11 = vand.u32 4294901760, %v17918_v0  ;;  %v21303_v10 = vand.u32 4294901760, %v17932_v17  ;;  %v21306_v60 = vand.u32 4294901760, %v17598_v2  ;;  %14297 = vmatprep.subr.bf16.mxu1 %v17954_v61  ;;  %v21319_v4 = vand.u32 4294901760, %v17616_v14 }
  0x45   :  { %21291 = vst [vmem:[#allocation57_spill] sm:$0xff] %v17954_v61  ;;  %21294 = vst [vmem:[#allocation58_spill] sm:$0xff] %v17960_v59  ;;  %v17970_v37 = vpack.c.bf16 %v21296_v47, %v21295_v52  ;;  %v17980_v38 = vpack.c.bf16 %v20889_v5, %v21298_v40  ;;  %v21300_v47 = vand.u32 4294901760, %v17596_v1  ;;  %v21304_v40 = vand.u32 4294901760, %v17934_v51 }
  0x46   :  { %v17993_v45 = vpack.c.bf16 %v20890_v44, %v21301_v11  ;;  %v18004_v23 = vsub.f32 %v17598_v2, %v21306_v60  ;;  %v21308_v11 = vand.u32 4294901760, %v17945_v58  ;;  %v21309_v44 = vand.u32 4294901760, %v17947_v53  ;;  %14107 = vmatpush1.bf16.msra.mxu0 %v17960_v59 }
  0x47   :  { %21297 = vst [vmem:[#allocation59_spill] sm:$0xff] %v17970_v37  ;;  %21299 = vst [vmem:[#allocation60_spill] sm:$0xff] %v17980_v38  ;;  %v17987_v52 = vsub.f32 %v17596_v1, %v21300_v47  ;;  %v17999_v5 = vpack.c.bf16 %v21304_v40, %v21303_v10  ;;  %v21307_v1 = vand.u32 4294901760, %v17600_v3  ;;  %v21311_v40 = vand.u32 4294901760, %v17604_v6  ;;  %14299 = vmatpush1.bf16.msra.mxu1 %v17970_v37 }
  0x48   :  { %21302 = vst [vmem:[#allocation61_spill] sm:$0xff] %v17993_v45  ;;  %v18016_v17 = vpack.c.bf16 %v21309_v44, %v21308_v11  ;;  %v21313_v60 = vand.u32 4294901760, %v17607_v8  ;;  %v21315_v11 = vand.u32 4294901760, %v17609_v9  ;;  %14109 = vmatprep.subr.bf16.mxu0 %v17980_v38  ;;  %14301 = vmatprep.subr.bf16.mxu1 %v17993_v45  ;;  %v21325_v38 = vand.u32 4294901760, %v17618_v15 }
  0x49   :  { %21305 = vst [vmem:[#allocation62_spill] sm:$0xff] %v17999_v5  ;;  %v18009_v47 = vsub.f32 %v17600_v3, %v21307_v1  ;;  %v18022_v2 = vsub.f32 %v17604_v6, %v21311_v40  ;;  %v21317_v6 = vand.u32 4294901760, %v17614_v13  ;;  %v21329_v45 = vand.u32 4294901760, %v17631_v21 }
  0x4a   :  { %21310 = vst [vmem:[#allocation63_spill] sm:$0xff] %v18016_v17  ;;  %v18027_v3 = vsub.f32 %v17607_v8, %v21313_v60  ;;  %v18036_v10 = vsub.f32 %v17609_v9, %v21315_v11  ;;  %v21318_v8 = vand.u32 4294901760, %v17987_v52  ;;  %v18052_v9 = vsub.f32 %v17616_v14, %v21319_v4  ;;  %14111 = vmatpush1.bf16.msra.mxu0 %v17999_v5  ;;  %v21402_v5 = vld [vmem:[#allocation35_spill] sm:$0xff] }
  0x4b   :  { %21312 = vst [vmem:[#allocation64_spill] sm:$0xff] %v18022_v2  ;;  %v18041_v40 = vsub.f32 %v17614_v13, %v21317_v6  ;;  %v20903_v1 = vand.u32 4294901760, %v18022_v2  ;;  %v21320_v11 = vand.u32 4294901760, %v18004_v23  ;;  %v21321_v6 = vand.u32 4294901760, %v18009_v47  ;;  %14303 = vmatpush1.bf16.msra.mxu1 %v18016_v17 }
  0x4c   :  { %21314 = vst [vmem:[#allocation65_spill] sm:$0xff] %v18027_v3  ;;  %21316 = vst [vmem:[#allocation66_spill] sm:$0xff] %v18036_v10  ;;  %v217_v60 = vsub.f32 %v17987_v52, %v21318_v8  ;;  %v21322_v4 = vand.u32 4294901760, %v18027_v3  ;;  %v21323_v8 = vand.u32 4294901760, %v18036_v10 }
  0x4d   :  { %v229_v13 = vsub.f32 %v18004_v23, %v21320_v11  ;;  %v1059_v61 = vsub.f32 %v18009_v47, %v21321_v6  ;;  %v1071_v14 = vsub.f32 %v18022_v2, %v20903_v1  ;;  %v20914_v11 = vand.u32 4294901760, %v18052_v9 }
  0x4e   :  { %v218_v44 = vand.u32 4294901760, %v217_v60  ;;  %v223_v54 = vsub.f32 %v18027_v3, %v21322_v4  ;;  %v235_v60 = vsub.f32 %v18036_v10, %v21323_v8  ;;  %v21324_v59 = vand.u32 4294901760, %v18041_v40 }
  0x4f   :  { %v230_v6 = vand.u32 4294901760, %v229_v13  ;;  %v1060_v46 = vand.u32 4294901760, %v1059_v61  ;;  %v1072_v2 = vand.u32 4294901760, %v1071_v14  ;;  %v1077_v37 = vsub.f32 %v18052_v9, %v20914_v11 }
  0x50   :  { %v1065_v1 = vsub.f32 %v18041_v40, %v21324_v59  ;;  %v224_v4 = vand.u32 4294901760, %v223_v54  ;;  %v18085_v61 = vsub.f32 %v17618_v15, %v21325_v38  ;;  %v236_v8 = vand.u32 4294901760, %v235_v60 }
  0x51   :  { %v18087_v13 = vpack.c.bf16 %v230_v6, %v218_v44  ;;  %v21327_v3 = vand.u32 4294901760, %v17628_v19  ;;  %v18095_v54 = vpack.c.bf16 %v1072_v2, %v1060_v46  ;;  %v1078_v14 = vand.u32 4294901760, %v1077_v37 }
  0x52   :  { %v1066_v10 = vand.u32 4294901760, %v1065_v1  ;;  %v20919_v11 = vand.u32 4294901760, %v18085_v61  ;;  %v18101_v15 = vsub.f32 %v17631_v21, %v21329_v45  ;;  %v18105_v38 = vpack.c.bf16 %v236_v8, %v224_v4 }
  0x53   :  { %21326 = vst [vmem:[#allocation67_spill] sm:$0xff] %v18087_v13  ;;  %v18092_v59 = vsub.f32 %v17628_v19, %v21327_v3  ;;  %21328 = vst [vmem:[#allocation68_spill] sm:$0xff] %v18095_v54  ;;  %14113 = vmatprep.subr.bf16.mxu0 %v18087_v13  ;;  %v21331_v3 = vand.u32 4294901760, %v17633_v22  ;;  %v21333_v37 = vand.u32 4294901760, %v17649_v27  ;;  %14305 = vmatprep.subr.bf16.mxu1 %v18095_v54  ;;  %v21336_v44 = vand.u32 4294901760, %v17651_v28 }
  0x54   :  { %21330 = vst [vmem:[#allocation69_spill] sm:$0xff] %v18105_v38  ;;  %v18119_v21 = vpack.c.bf16 %v1078_v14, %v1066_v10  ;;  %v241_v45 = vsub.f32 %v18085_v61, %v20919_v11  ;;  %v20917_v1 = vand.u32 4294901760, %v18101_v15  ;;  %v21338_v6 = vmov 0.0  }
  0x55   :  { %v20918_v19 = vand.u32 4294901760, %v18092_v59  ;;  %v18111_v46 = vsub.f32 %v17633_v22, %v21331_v3  ;;  %v18116_v2 = vsub.f32 %v17649_v27, %v21333_v37  ;;  %v18128_v22 = vsub.f32 %v17651_v28, %v21336_v44  ;;  %208 = vmatmul.mubr.f32.vlgmr.msra.gmra.mrb[0].mxu0 %v21338_v6  ;;  %1050 = vmatmul.mubr.f32.vlgmr.msra.gmra.mrb[0].mxu1 %v21338_v6 }
  0x56   :  { %21335 = vst [vmem:[#allocation72_spill] sm:$0xff] %v18119_v21  ;;  %v21339_v4 = vand.u32 4294901760, %v17653_v29  ;;  %14115 = vmatpush1.bf16.msra.mxu0 %v18105_v38  ;;  %v242_v28 = vand.u32 4294901760, %v241_v45  ;;  %v1083_v14 = vsub.f32 %v18101_v15, %v20917_v1  ;;  %v21341_v37 = vand.u32 4294901760, %v17665_v34  ;;  %14307 = vmatpush1.bf16.msra.mxu1 %v18119_v21 }
  0x57   :  { %21332 = vst [vmem:[#allocation70_spill] sm:$0xff] %v18111_v46  ;;  %21334 = vst [vmem:[#allocation71_spill] sm:$0xff] %v18116_v2  ;;  %v253_v27 = vsub.f32 %v18092_v59, %v20918_v19  ;;  %v20920_v10 = vand.u32 4294901760, %v18111_v46  ;;  %v20921_v60 = vand.u32 4294901760, %v18116_v2  ;;  %v20926_v3 = vand.u32 4294901760, %v18128_v22  ;;  %438 = vmatprep.mubr.f32.mxu0 %v21338_v6  ;;  %1280 = vmatprep.mubr.f32.mxu1 %v21338_v6 }
  0x58   :  { %21337 = vst [vmem:[#allocation73_spill] sm:$0xff] %v18128_v22  ;;  %v18139_v8 = vsub.f32 %v17653_v29, %v21339_v4  ;;  %v18150_v44 = vsub.f32 %v17665_v34, %v21341_v37  ;;  %v1084_v19 = vand.u32 4294901760, %v1083_v14  ;;  %v21378_v13 = vand.u32 4294901760, %v17773_v26 }
  0x59   :  { %v254_v29 = vand.u32 4294901760, %v253_v27  ;;  %v1095_v4 = vsub.f32 %v18111_v46, %v20920_v10  ;;  %v247_v45 = vsub.f32 %v18116_v2, %v20921_v60  ;;  %v259_v34 = vsub.f32 %v18128_v22, %v20926_v3 }
  0x5a   :  { %21340 = vst [vmem:[#allocation74_spill] sm:$0xff] %v18139_v8  ;;  %21342 = vst [vmem:[#allocation75_spill] sm:$0xff] %v18150_v44  ;;  %v20929_v37 = vand.u32 4294901760, %v18150_v44  ;;  %v21343_v27 = vand.u32 4294901760, %v17667_v35  ;;  %v21345_v21 = vand.u32 4294901760, %v18139_v8 }
  0x5b   :  { %v18171_v10 = vpack.c.bf16 %v254_v29, %v242_v28  ;;  %v1096_v60 = vand.u32 4294901760, %v1095_v4  ;;  %v248_v1 = vand.u32 4294901760, %v247_v45  ;;  %v260_v38 = vand.u32 4294901760, %v259_v34 }
  0x5c   :  { %v18168_v11 = vsub.f32 %v17667_v35, %v21343_v27  ;;  %v1089_v14 = vsub.f32 %v18139_v8, %v21345_v21  ;;  %v1101_v3 = vsub.f32 %v18150_v44, %v20929_v37  ;;  %v21346_v35 = vand.u32 4294901760, %v17669_v36 }
  0x5d   :  { %21344 = vst [vmem:[#allocation76_spill] sm:$0xff] %v18171_v10  ;;  %14117 = vmatprep.subr.bf16.mxu0 %v18171_v10  ;;  %v18186_v28 = vpack.c.bf16 %v1096_v60, %v1084_v19  ;;  %v21348_v4 = vand.u32 4294901760, %v17682_v41  ;;  %v21349_v45 = vand.u32 4294901760, %v17684_v42  ;;  %v18198_v37 = vpack.c.bf16 %v260_v38, %v248_v1 }
  0x5e   :  { %v18183_v27 = vsub.f32 %v17669_v36, %v21346_v35  ;;  %v1090_v29 = vand.u32 4294901760, %v1089_v14  ;;  %v1102_v54 = vand.u32 4294901760, %v1101_v3  ;;  %v21351_v36 = vand.u32 4294901760, %v18168_v11 }
  0x5f   :  { %21347 = vst [vmem:[#allocation77_spill] sm:$0xff] %v18186_v28  ;;  %v18191_v21 = vsub.f32 %v17682_v41, %v21348_v4  ;;  %v18196_v34 = vsub.f32 %v17684_v42, %v21349_v45  ;;  %21350 = vst [vmem:[#allocation78_spill] sm:$0xff] %v18198_v37  ;;  %14309 = vmatprep.subr.bf16.mxu1 %v18186_v28  ;;  %v21352_v14 = vand.u32 4294901760, %v17686_v43  ;;  %v21353_v38 = vand.u32 4294901760, %v17703_v48 }
  0x60   :  { %v265_v35 = vsub.f32 %v18168_v11, %v21351_v36  ;;  %v20931_v19 = vand.u32 4294901760, %v18183_v27  ;;  %14119 = vmatpush1.bf16.msra.mxu0 %v18198_v37  ;;  %v18218_v3 = vpack.c.bf16 %v1102_v54, %v1090_v29  ;;  %v21355_v36 = vand.u32 4294901760, %v17705_v49 }
  0x61   :  { %v20930_v60 = vand.u32 4294901760, %v18191_v21  ;;  %v18210_v42 = vsub.f32 %v17686_v43, %v21352_v14  ;;  %v18215_v1 = vsub.f32 %v17703_v48, %v21353_v38  ;;  %v21356_v48 = vand.u32 4294901760, %v18196_v34 }
  0x62   :  { %21354 = vst [vmem:[#allocation79_spill] sm:$0xff] %v18218_v3  ;;  %v266_v4 = vand.u32 4294901760, %v265_v35  ;;  %v277_v45 = vsub.f32 %v18183_v27, %v20931_v19  ;;  %v18226_v41 = vsub.f32 %v17705_v49, %v21355_v36  ;;  %14311 = vmatpush1.bf16.msra.mxu1 %v18218_v3  ;;  %v21357_v49 = vand.u32 4294901760, %v17707_v50 }
  0x63   :  { %v1107_v43 = vsub.f32 %v18191_v21, %v20930_v60  ;;  %v1119_v14 = vsub.f32 %v18196_v34, %v21356_v48  ;;  %v20938_v54 = vand.u32 4294901760, %v18210_v42  ;;  %v21358_v60 = vand.u32 4294901760, %v17719_v55 }
  0x64   :  { %v278_v35 = vand.u32 4294901760, %v277_v45  ;;  %v18241_v36 = vsub.f32 %v17707_v50, %v21357_v49  ;;  %v21359_v45 = vand.u32 4294901760, %v18215_v1  ;;  %v21361_v50 = vand.u32 4294901760, %v18226_v41 }
  0x65   :  { %v18246_v19 = vsub.f32 %v17719_v55, %v21358_v60  ;;  %v1108_v48 = vand.u32 4294901760, %v1107_v43  ;;  %v1120_v37 = vand.u32 4294901760, %v1119_v14  ;;  %v271_v29 = vsub.f32 %v18210_v42, %v20938_v54 }
  0x66   :  { %v283_v38 = vsub.f32 %v18215_v1, %v21359_v45  ;;  %v18254_v3 = vpack.c.bf16 %v278_v35, %v266_v4  ;;  %v1113_v49 = vsub.f32 %v18226_v41, %v21361_v50  ;;  %v20942_v28 = vand.u32 4294901760, %v18241_v36 }
  0x67   :  { %v20941_v55 = vand.u32 4294901760, %v18246_v19  ;;  %v18261_v60 = vpack.c.bf16 %v1120_v37, %v1108_v48  ;;  %v272_v43 = vand.u32 4294901760, %v271_v29  ;;  %v21363_v54 = vand.u32 4294901760, %v17721_v56 }
  0x68   :  { %21360 = vst [vmem:[#allocation80_spill] sm:$0xff] %v18254_v3  ;;  %v284_v14 = vand.u32 4294901760, %v283_v38  ;;  %14121 = vmatprep.subr.bf16.mxu0 %v18254_v3  ;;  %v1114_v4 = vand.u32 4294901760, %v1113_v49  ;;  %v1125_v35 = vsub.f32 %v18241_v36, %v20942_v28  ;;  %v21364_v37 = vand.u32 4294901760, %v17723_v57 }
  0x69   :  { %21362 = vst [vmem:[#allocation81_spill] sm:$0xff] %v18261_v60  ;;  %v18266_v10 = vsub.f32 %v17721_v56, %v21363_v54  ;;  %v289_v45 = vsub.f32 %v18246_v19, %v20941_v55  ;;  %14313 = vmatprep.subr.bf16.mxu1 %v18261_v60  ;;  %v21366_v38 = vand.u32 4294901760, %v17735_v62  ;;  %v21367_v50 = vand.u32 4294901760, %v17737_v63 }
  0x6a   :  { %v18278_v29 = vsub.f32 %v17723_v57, %v21364_v37  ;;  %v18281_v56 = vpack.c.bf16 %v284_v14, %v272_v43  ;;  %v1126_v55 = vand.u32 4294901760, %v1125_v35  ;;  %v21368_v37 = vand.u32 4294901760, %v17739_v39 }
  0x6b   :  { %v20943_v54 = vand.u32 4294901760, %v18266_v10  ;;  %v18287_v48 = vsub.f32 %v17735_v62, %v21366_v38  ;;  %v18292_v49 = vsub.f32 %v17737_v63, %v21367_v50  ;;  %v290_v28 = vand.u32 4294901760, %v289_v45 }
  0x6c   :  { %21365 = vst [vmem:[#allocation82_spill] sm:$0xff] %v18281_v56  ;;  %v20946_v57 = vand.u32 4294901760, %v18278_v29  ;;  %v18298_v43 = vsub.f32 %v17739_v39, %v21368_v37  ;;  %14123 = vmatpush1.bf16.msra.mxu0 %v18281_v56  ;;  %v21369_v35 = vand.u32 4294901760, %v17756_v33  ;;  %v18311_v38 = vpack.c.bf16 %v1126_v55, %v1114_v4 }
  0x6d   :  { %v301_v62 = vsub.f32 %v18266_v10, %v20943_v54  ;;  %v21372_v37 = vand.u32 4294901760, %v17758_v32  ;;  %v21374_v63 = vand.u32 4294901760, %v18287_v48 }
  0x6e   :  { %v18309_v45 = vsub.f32 %v17756_v33, %v21369_v35  ;;  %21371 = vst [vmem:[#allocation84_spill] sm:$0xff] %v18311_v38  ;;  %v1131_v39 = vsub.f32 %v18278_v29, %v20946_v57  ;;  %v20951_v50 = vand.u32 4294901760, %v18298_v43  ;;  %v21375_v33 = vand.u32 4294901760, %v18292_v49  ;;  %14315 = vmatpush1.bf16.msra.mxu1 %v18311_v38 }
  0x6f   :  { %v18320_v54 = vsub.f32 %v17758_v32, %v21372_v37  ;;  %v302_v14 = vand.u32 4294901760, %v301_v62  ;;  %v1143_v56 = vsub.f32 %v18287_v48, %v21374_v63  ;;  %v21376_v62 = vand.u32 4294901760, %v17760_v31 }
  0x70   :  { %21370 = vst [vmem:[#allocation83_spill] sm:$0xff] %v18309_v45  ;;  %v295_v55 = vsub.f32 %v18292_v49, %v21375_v33  ;;  %v20956_v4 = vand.u32 4294901760, %v18309_v45  ;;  %v1132_v35 = vand.u32 4294901760, %v1131_v39  ;;  %v307_v57 = vsub.f32 %v18298_v43, %v20951_v50 }
  0x71   :  { %21373 = vst [vmem:[#allocation85_spill] sm:$0xff] %v18320_v54  ;;  %v20957_v32 = vand.u32 4294901760, %v18320_v54  ;;  %v18337_v37 = vsub.f32 %v17760_v31, %v21376_v62  ;;  %v18339_v63 = vpack.c.bf16 %v302_v14, %v290_v28  ;;  %v1144_v60 = vand.u32 4294901760, %v1143_v56  ;;  %v21380_v14 = vld [vmem:[#allocation26_spill] sm:$0xff]  ;;  %v21383_v62 = vld [vmem:[#allocation27_spill] sm:$0xff] }
  0x72   :  { %v296_v33 = vand.u32 4294901760, %v295_v55  ;;  %v1137_v38 = vsub.f32 %v18309_v45, %v20956_v4  ;;  %v308_v39 = vand.u32 4294901760, %v307_v57  ;;  %v18351_v31 = vsub.f32 %v17773_v26, %v21378_v13  ;;  %v21409_v45 = vld [vmem:[#allocation36_spill] sm:$0xff] }
  0x73   :  { %21377 = vst [vmem:[#allocation86_spill] sm:$0xff] %v18339_v63  ;;  %v1149_v50 = vsub.f32 %v18320_v54, %v20957_v32  ;;  %14125 = vmatprep.subr.bf16.mxu0 %v18339_v63  ;;  %v18354_v28 = vpack.c.bf16 %v1144_v60, %v1132_v35  ;;  %v21381_v55 = vand.u32 4294901760, %v21380_v14  ;;  %v21384_v4 = vand.u32 4294901760, %v21383_v62  ;;  %v21394_v35 = vld [vmem:[#allocation31_spill] sm:$0xff] }
  0x74   :  { %v1138_v56 = vand.u32 4294901760, %v1137_v38  ;;  %v18366_v3 = vpack.c.bf16 %v308_v39, %v296_v33  ;;  %v21387_v26 = vand.u32 4294901760, %v18337_v37  ;;  %v20964_v60 = vand.u32 4294901760, %v18351_v31  ;;  %v21391_v33 = vld [vmem:[#allocation30_spill] sm:$0xff] }
  0x75   :  { %21379 = vst [vmem:[#allocation87_spill] sm:$0xff] %v18354_v28  ;;  %v18359_v57 = vsub.f32 %v21380_v14, %v21381_v55  ;;  %v18364_v32 = vsub.f32 %v21383_v62, %v21384_v4  ;;  %v1150_v17 = vand.u32 4294901760, %v1149_v50  ;;  %14317 = vmatprep.subr.bf16.mxu1 %v18354_v28  ;;  %v21388_v14 = vld [vmem:[#allocation29_spill] sm:$0xff]  ;;  %v21392_v39 = vand.u32 4294901760, %v21391_v33 }
  0x76   :  { %21386 = vst [vmem:[#allocation88_spill] sm:$0xff] %v18366_v3  ;;  %v313_v13 = vsub.f32 %v18337_v37, %v21387_v26  ;;  %v21389_v55 = vand.u32 4294901760, %v21388_v14  ;;  %14127 = vmatpush1.bf16.msra.mxu0 %v18366_v3  ;;  %v325_v38 = vsub.f32 %v18351_v31, %v20964_v60  ;;  %v21395_v28 = vand.u32 4294901760, %v21394_v35  ;;  %v21399_v3 = vld [vmem:[#allocation34_spill] sm:$0xff] }
  0x77   :  { %21382 = vst [vmem:[#allocation26_spill] sm:$0xff] %v18359_v57  ;;  %21385 = vst [vmem:[#allocation27_spill] sm:$0xff] %v18364_v32  ;;  %v18383_v50 = vsub.f32 %v21391_v33, %v21392_v39  ;;  %v18386_v62 = vpack.c.bf16 %v1150_v17, %v1138_v56  ;;  %v21398_v33 = vand.u32 4294901760, %v18364_v32 }
  0x78   :  { %v18378_v4 = vsub.f32 %v21388_v14, %v21389_v55  ;;  %v314_v26 = vand.u32 4294901760, %v313_v13  ;;  %v18394_v63 = vsub.f32 %v21394_v35, %v21395_v28  ;;  %v21397_v14 = vand.u32 4294901760, %v18359_v57 }
  0x79   :  { %21393 = vst [vmem:[#allocation30_spill] sm:$0xff] %v18386_v62  ;;  %v1167_v39 = vsub.f32 %v18364_v32, %v21398_v33  ;;  %14319 = vmatpush1.bf16.msra.mxu1 %v18386_v62  ;;  %v326_v13 = vand.u32 4294901760, %v325_v38  ;;  %v21400_v28 = vand.u32 4294901760, %v21399_v3  ;;  %v21405_v38 = vand.u32 4294901760, %v18383_v50 }
  0x7a   :  { %21390 = vst [vmem:[#allocation29_spill] sm:$0xff] %v18378_v4  ;;  %21396 = vst [vmem:[#allocation31_spill] sm:$0xff] %v18394_v63  ;;  %v1155_v55 = vsub.f32 %v18359_v57, %v21397_v14  ;;  %v20979_v17 = vand.u32 4294901760, %v18378_v4  ;;  %v21403_v14 = vand.u32 4294901760, %v21402_v5 }
  0x7b   :  { %v18409_v35 = vsub.f32 %v21399_v3, %v21400_v28  ;;  %v1168_v32 = vand.u32 4294901760, %v1167_v39  ;;  %v331_v60 = vsub.f32 %v18383_v50, %v21405_v38  ;;  %v18422_v62 = vpack.c.bf16 %v326_v13, %v314_v26 }
  0x7c   :  { %v18414_v57 = vsub.f32 %v21402_v5, %v21403_v14  ;;  %v1156_v33 = vand.u32 4294901760, %v1155_v55  ;;  %v319_v56 = vsub.f32 %v18378_v4, %v20979_v17  ;;  %v21407_v3 = vand.u32 4294901760, %v18394_v63 }
  0x7d   :  { %21401 = vst [vmem:[#allocation34_spill] sm:$0xff] %v18409_v35  ;;  %21406 = vst [vmem:[#allocation89_spill] sm:$0xff] %v18422_v62  ;;  %v20982_v54 = vand.u32 4294901760, %v18409_v35  ;;  %v332_v14 = vand.u32 4294901760, %v331_v60  ;;  %v21410_v17 = vand.u32 4294901760, %v21409_v45  ;;  %14129 = vmatprep.subr.bf16.mxu0 %v18422_v62 }
  0x7e   :  { %21404 = vst [vmem:[#allocation35_spill] sm:$0xff] %v18414_v57  ;;  %v1161_v28 = vsub.f32 %v18394_v63, %v21407_v3  ;;  %v20985_v5 = vand.u32 4294901760, %v18414_v57  ;;  %v18429_v55 = vpack.c.bf16 %v1168_v32, %v1156_v33  ;;  %v320_v39 = vand.u32 4294901760, %v319_v56  ;;  %v21412_v32 = vld [vmem:[#allocation38_spill] sm:$0xff]  ;;  %v21416_v56 = vld [vmem:[#allocation39_spill] sm:$0xff] }
  0x7f   :  { %v18434_v4 = vsub.f32 %v21409_v45, %v21410_v17  ;;  %v1173_v13 = vsub.f32 %v18409_v35, %v20982_v54  ;;  %v21413_v33 = vand.u32 4294901760, %v21412_v32  ;;  %v21417_v3 = vand.u32 4294901760, %v21416_v56  ;;  %v21419_v54 = vld [vmem:[#allocation40_spill] sm:$0xff] }
  0x80   :  { %21408 = vst [vmem:[#allocation90_spill] sm:$0xff] %v18429_v55  ;;  %v1162_v26 = vand.u32 4294901760, %v1161_v28  ;;  %v337_v38 = vsub.f32 %v18414_v57, %v20985_v5  ;;  %14321 = vmatprep.subr.bf16.mxu1 %v18429_v55  ;;  %v18449_v45 = vpack.c.bf16 %v332_v14, %v320_v39  ;;  %v21420_v62 = vand.u32 4294901760, %v21419_v54 }
  0x81   :  { %21411 = vst [vmem:[#allocation36_spill] sm:$0xff] %v18434_v4  ;;  %v18446_v60 = vsub.f32 %v21412_v32, %v21413_v33  ;;  %v20996_v17 = vand.u32 4294901760, %v18434_v4  ;;  %v18455_v28 = vsub.f32 %v21416_v56, %v21417_v3  ;;  %v1174_v57 = vand.u32 4294901760, %v1173_v13  ;;  %v21422_v33 = vld [vmem:[#allocation42_spill] sm:$0xff] }
  0x82   :  { %21415 = vst [vmem:[#allocation91_spill] sm:$0xff] %v18449_v45  ;;  %v18460_v5 = vsub.f32 %v21419_v54, %v21420_v62  ;;  %v338_v35 = vand.u32 4294901760, %v337_v38  ;;  %v21423_v55 = vand.u32 4294901760, %v21422_v33  ;;  %14131 = vmatpush1.bf16.msra.mxu0 %v18449_v45  ;;  %v21425_v62 = vld [vmem:[#allocation43_spill] sm:$0xff]  ;;  %v21428_v45 = vld [vmem:[#allocation44_spill] sm:$0xff] }
  0x83   :  { %21414 = vst [vmem:[#allocation38_spill] sm:$0xff] %v18446_v60  ;;  %21418 = vst [vmem:[#allocation39_spill] sm:$0xff] %v18455_v28  ;;  %v20999_v32 = vand.u32 4294901760, %v18446_v60  ;;  %v349_v14 = vsub.f32 %v18434_v4, %v20996_v17  ;;  %v21426_v13 = vand.u32 4294901760, %v21425_v62  ;;  %v18479_v3 = vpack.c.bf16 %v1174_v57, %v1162_v26 }
  0x84   :  { %21421 = vst [vmem:[#allocation40_spill] sm:$0xff] %v18460_v5  ;;  %v18466_v39 = vsub.f32 %v21422_v33, %v21423_v55  ;;  %v21429_v63 = vand.u32 4294901760, %v21428_v45  ;;  %v21430_v54 = vand.u32 4294901760, %v18455_v28 }
  0x85   :  { %v18477_v38 = vsub.f32 %v21425_v62, %v21426_v13  ;;  %21427 = vst [vmem:[#allocation43_spill] sm:$0xff] %v18479_v3  ;;  %v1179_v55 = vsub.f32 %v18446_v60, %v20999_v32  ;;  %v350_v56 = vand.u32 4294901760, %v349_v14  ;;  %v21431_v62 = vand.u32 4294901760, %v18460_v5  ;;  %14323 = vmatpush1.bf16.msra.mxu1 %v18479_v3 }
  0x86   :  { %21424 = vst [vmem:[#allocation42_spill] sm:$0xff] %v18466_v39  ;;  %v21006_v33 = vand.u32 4294901760, %v18466_v39  ;;  %v18488_v17 = vsub.f32 %v21428_v45, %v21429_v63  ;;  %v1191_v4 = vsub.f32 %v18455_v28, %v21430_v54  ;;  %v21432_v45 = vld [vmem:[#allocation47_spill] sm:$0xff] }
  0x87   :  { %v343_v57 = vsub.f32 %v18460_v5, %v21431_v62  ;;  %v21012_v26 = vand.u32 4294901760, %v18477_v38  ;;  %v1180_v13 = vand.u32 4294901760, %v1179_v55  ;;  %v21433_v14 = vand.u32 4294901760, %v21432_v45 }
  0x88   :  { %v355_v32 = vsub.f32 %v18466_v39, %v21006_v33  ;;  %v21011_v63 = vand.u32 4294901760, %v18488_v17  ;;  %v18507_v54 = vpack.c.bf16 %v350_v56, %v338_v35  ;;  %v1192_v28 = vand.u32 4294901760, %v1191_v4 }
  0x89   :  { %v18505_v60 = vsub.f32 %v21432_v45, %v21433_v14  ;;  %v344_v62 = vand.u32 4294901760, %v343_v57  ;;  %v1185_v3 = vsub.f32 %v18477_v38, %v21012_v26  ;;  %v21435_v5 = vand.u32 4294901760, %v17865_v24  ;;  %v21438_v57 = vld [vmem:[#allocation49_spill] sm:$0xff] }
  0x8a   :  { %21434 = vst [vmem:[#allocation44_spill] sm:$0xff] %v18507_v54  ;;  %v356_v55 = vand.u32 4294901760, %v355_v32  ;;  %v1197_v33 = vsub.f32 %v18488_v17, %v21011_v63  ;;  %14133 = vmatprep.subr.bf16.mxu0 %v18507_v54  ;;  %v18522_v4 = vpack.c.bf16 %v1192_v28, %v1180_v13  ;;  %v21437_v56 = vand.u32 4294901760, %v17867_v7 }
  0x8b   :  { %v18519_v45 = vsub.f32 %v17865_v24, %v21435_v5  ;;  %v1186_v35 = vand.u32 4294901760, %v1185_v3  ;;  %v21439_v14 = vand.u32 4294901760, %v21438_v57  ;;  %v21441_v24 = vand.u32 4294901760, %v18505_v60 }
  0x8c   :  { %21436 = vst [vmem:[#allocation47_spill] sm:$0xff] %v18522_v4  ;;  %v18527_v32 = vsub.f32 %v17867_v7, %v21437_v56  ;;  %v18534_v26 = vpack.c.bf16 %v356_v55, %v344_v62  ;;  %v1198_v39 = vand.u32 4294901760, %v1197_v33  ;;  %14325 = vmatprep.subr.bf16.mxu1 %v18522_v4  ;;  %v21442_v13 = vand.u32 4294901760, %v17880_v30  ;;  %v21444_v62 = vld [vmem:[#allocation50_spill] sm:$0xff] }
  0x8d   :  { %v18532_v63 = vsub.f32 %v21438_v57, %v21439_v14  ;;  %v361_v5 = vsub.f32 %v18505_v60, %v21441_v24  ;;  %v21013_v28 = vand.u32 4294901760, %v18519_v45  ;;  %v21445_v55 = vand.u32 4294901760, %v21444_v62 }
  0x8e   :  { %21440 = vst [vmem:[#allocation49_spill] sm:$0xff] %v18534_v26  ;;  %v18546_v56 = vsub.f32 %v17880_v30, %v21442_v13  ;;  %14135 = vmatpush1.bf16.msra.mxu0 %v18534_v26  ;;  %v18554_v57 = vpack.c.bf16 %v1198_v39, %v1186_v35  ;;  %v21447_v7 = vand.u32 4294901760, %v17894_v16  ;;  %v21448_v30 = vand.u32 4294901760, %v18527_v32 }
  0x8f   :  { %v18551_v33 = vsub.f32 %v21444_v62, %v21445_v55  ;;  %v362_v14 = vand.u32 4294901760, %v361_v5  ;;  %v373_v24 = vsub.f32 %v18519_v45, %v21013_v28  ;;  %v21449_v62 = vand.u32 4294901760, %v18532_v63 }
  0x90   :  { %21443 = vst [vmem:[#allocation92_spill] sm:$0xff] %v18546_v56  ;;  %21446 = vst [vmem:[#allocation50_spill] sm:$0xff] %v18554_v57  ;;  %v18562_v3 = vsub.f32 %v17894_v16, %v21447_v7  ;;  %v1203_v13 = vsub.f32 %v18527_v32, %v21448_v30  ;;  %v21022_v39 = vand.u32 4294901760, %v18546_v56  ;;  %14327 = vmatpush1.bf16.msra.mxu1 %v18554_v57  ;;  %v21450_v16 = vand.u32 4294901760, %v17896_v12 }
  0x91   :  { %v1215_v55 = vsub.f32 %v18532_v63, %v21449_v62  ;;  %v374_v5 = vand.u32 4294901760, %v373_v24  ;;  %v21451_v30 = vand.u32 4294901760, %v17898_v20  ;;  %v21452_v24 = vand.u32 4294901760, %v18551_v33 }
  0x92   :  { %v18577_v7 = vsub.f32 %v17896_v12, %v21450_v16  ;;  %v1204_v62 = vand.u32 4294901760, %v1203_v13  ;;  %v367_v35 = vsub.f32 %v18546_v56, %v21022_v39  ;;  %v21454_v12 = vand.u32 4294901760, %v18562_v3 }
  0x93   :  { %v18582_v26 = vsub.f32 %v17898_v20, %v21451_v30  ;;  %v1216_v4 = vand.u32 4294901760, %v1215_v55  ;;  %v379_v28 = vsub.f32 %v18551_v33, %v21452_v24  ;;  %v18590_v57 = vpack.c.bf16 %v374_v5, %v362_v14 }
  0x94   :  { %v1209_v16 = vsub.f32 %v18562_v3, %v21454_v12  ;;  %v21026_v54 = vand.u32 4294901760, %v18577_v7  ;;  %v368_v55 = vand.u32 4294901760, %v367_v35  ;;  %v21456_v39 = vand.u32 4294901760, %v17916_v25  ;;  %v21460_v12 = vld [vmem:[#allocation55_spill] sm:$0xff] }
  0x95   :  { %21453 = vst [vmem:[#allocation93_spill] sm:$0xff] %v18590_v57  ;;  %v21025_v20 = vand.u32 4294901760, %v18582_v26  ;;  %v18597_v13 = vpack.c.bf16 %v1216_v4, %v1204_v62  ;;  %v380_v30 = vand.u32 4294901760, %v379_v28  ;;  %14137 = vmatprep.subr.bf16.mxu0 %v18590_v57  ;;  %v21457_v4 = vand.u32 4294901760, %v17918_v0 }
  0x96   :  { %v18602_v56 = vsub.f32 %v17916_v25, %v21456_v39  ;;  %v1210_v14 = vand.u32 4294901760, %v1209_v16  ;;  %v1221_v5 = vsub.f32 %v18577_v7, %v21026_v54  ;;  %v21459_v35 = vand.u32 4294901760, %v17930_v18 }
  0x97   :  { %21455 = vst [vmem:[#allocation94_spill] sm:$0xff] %v18597_v13  ;;  %v385_v24 = vsub.f32 %v18582_v26, %v21025_v20  ;;  %v18614_v28 = vsub.f32 %v17918_v0, %v21457_v4  ;;  %14329 = vmatprep.subr.bf16.mxu1 %v18597_v13  ;;  %v18617_v25 = vpack.c.bf16 %v380_v30, %v368_v55  ;;  %v21461_v16 = vand.u32 4294901760, %v21460_v12 }
  0x98   :  { %v21029_v39 = vand.u32 4294901760, %v18602_v56  ;;  %v18623_v62 = vsub.f32 %v17930_v18, %v21459_v35  ;;  %v1222_v54 = vand.u32 4294901760, %v1221_v5  ;;  %v21462_v4 = vand.u32 4294901760, %v17934_v51 }
  0x99   :  { %21458 = vst [vmem:[#allocation95_spill] sm:$0xff] %v18617_v25  ;;  %v18628_v20 = vsub.f32 %v21460_v12, %v21461_v16  ;;  %v386_v57 = vand.u32 4294901760, %v385_v24  ;;  %v21032_v0 = vand.u32 4294901760, %v18614_v28  ;;  %14139 = vmatpush1.bf16.msra.mxu0 %v18617_v25  ;;  %v21463_v5 = vand.u32 4294901760, %v17945_v58 }
  0x9a   :  { %v18634_v55 = vsub.f32 %v17934_v51, %v21462_v4  ;;  %v397_v18 = vsub.f32 %v18602_v56, %v21029_v39  ;;  %v18647_v12 = vpack.c.bf16 %v1222_v54, %v1210_v14  ;;  %v21465_v4 = vand.u32 4294901760, %v17947_v53 }
  0x9b   :  { %v18645_v24 = vsub.f32 %v17945_v58, %v21463_v5  ;;  %v1227_v51 = vsub.f32 %v18614_v28, %v21032_v0  ;;  %v21466_v35 = vand.u32 4294901760, %v18623_v62  ;;  %v21467_v58 = vand.u32 4294901760, %v18628_v20 }
  0x9c   :  { %21464 = vst [vmem:[#allocation55_spill] sm:$0xff] %v18647_v12  ;;  %v21037_v16 = vand.u32 4294901760, %v18634_v55  ;;  %v18656_v39 = vsub.f32 %v17947_v53, %v21465_v4  ;;  %v398_v30 = vand.u32 4294901760, %v397_v18  ;;  %14331 = vmatpush1.bf16.msra.mxu1 %v18647_v12 }
  0x9d   :  { %v1239_v25 = vsub.f32 %v18623_v62, %v21466_v35  ;;  %v391_v54 = vsub.f32 %v18628_v20, %v21467_v58  ;;  %v21039_v14 = vand.u32 4294901760, %v18645_v24  ;;  %v1228_v5 = vand.u32 4294901760, %v1227_v51 }
  0x9e   :  { %v403_v0 = vsub.f32 %v18634_v55, %v21037_v16  ;;  %v21038_v53 = vand.u32 4294901760, %v18656_v39  ;;  %v18670_v18 = vpack.c.bf16 %v398_v30, %v386_v57  ;;  %v18680_v51 = vpack.c.bf16 %v18004_v23, %v17987_v52 }
  0x9f   :  { %v1240_v4 = vand.u32 4294901760, %v1239_v25  ;;  %v392_v13 = vand.u32 4294901760, %v391_v54  ;;  %v1233_v35 = vsub.f32 %v18645_v24, %v21039_v14  ;;  %v21471_v25 = vld [vmem:[#allocation64_spill] sm:$0xff]  ;;  %v18697_v14 = vpack.c.bf16 %v18111_v46, %v18101_v15 }
  0xa0   :  { %21468 = vst [vmem:[#allocation96_spill] sm:$0xff] %v18670_v18  ;;  %v404_v58 = vand.u32 4294901760, %v403_v0  ;;  %v1245_v12 = vsub.f32 %v18656_v39, %v21038_v53  ;;  %21469 = vst [vmem:[#allocation97_spill] sm:$0xff] %v18680_v51  ;;  %14141 = vmatprep.subr.bf16.mxu0 %v18670_v18  ;;  %v18687_v30 = vpack.c.bf16 %v21471_v25, %v18009_v47  ;;  %v21483_v18 = vld [vmem:[#allocation66_spill] sm:$0xff] }
  0xa1   :  { %v18683_v16 = vpack.c.bf16 %v1240_v4, %v1228_v5  ;;  %v1234_v57 = vand.u32 4294901760, %v1233_v35  ;;  %v18691_v0 = vpack.c.bf16 %v18092_v59, %v18085_v61  ;;  %21475 = vst [vmem:[#allocation101_spill] sm:$0xff] %v18697_v14  ;;  %v18701_v5 = vpack.c.bf16 %v18128_v22, %v18116_v2 }
  0xa2   :  { %21472 = vst [vmem:[#allocation64_spill] sm:$0xff] %v18687_v30  ;;  %v18693_v54 = vpack.c.bf16 %v404_v58, %v392_v13  ;;  %v1246_v53 = vand.u32 4294901760, %v1245_v12  ;;  %v18706_v4 = vpack.c.bf16 %v18150_v44, %v18139_v8  ;;  %v18710_v35 = vpack.c.bf16 %v18183_v27, %v18168_v11 }
  0xa3   :  { %21470 = vst [vmem:[#allocation98_spill] sm:$0xff] %v18683_v16  ;;  %21473 = vst [vmem:[#allocation99_spill] sm:$0xff] %v18691_v0  ;;  %14333 = vmatprep.subr.bf16.mxu1 %v18683_v16  ;;  %v18714_v13 = vpack.c.bf16 %v18196_v34, %v18191_v21  ;;  %v18718_v12 = vpack.c.bf16 %v18215_v1, %v18210_v42  ;;  %v21482_v16 = vld [vmem:[#allocation65_spill] sm:$0xff]  ;;  %v18731_v8 = vpack.c.bf16 %v18052_v9, %v18041_v40 }
  0xa4   :  { %21474 = vst [vmem:[#allocation100_spill] sm:$0xff] %v18693_v54  ;;  %21476 = vst [vmem:[#allocation102_spill] sm:$0xff] %v18701_v5  ;;  %14143 = vmatpush1.bf16.msra.mxu0 %v18693_v54  ;;  %v18721_v58 = vpack.c.bf16 %v1246_v53, %v1234_v57  ;;  %v18725_v44 = vpack.c.bf16 %v21483_v18, %v21482_v16  ;;  %v18743_v53 = vpack.c.bf16 %v18241_v36, %v18226_v41 }
  0xa5   :  { %21477 = vst [vmem:[#allocation103_spill] sm:$0xff] %v18706_v4  ;;  %21478 = vst [vmem:[#allocation104_spill] sm:$0xff] %v18710_v35  ;;  %14145 = vmatprep.subr.bf16.mxu0 %v18680_v51  ;;  %v18747_v57 = vpack.c.bf16 %v18266_v10, %v18246_v19  ;;  %v21495_v54 = vand.u32 4294901760, %v18196_v34  ;;  %v21498_v2 = vand.u32 4294901760, %v18215_v1  ;;  %v21504_v34 = vand.u32 4294901760, %v18266_v10 }
  0xa6   :  { %21479 = vst [vmem:[#allocation105_spill] sm:$0xff] %v18714_v13  ;;  %21480 = vst [vmem:[#allocation106_spill] sm:$0xff] %v18718_v12  ;;  %14335 = vmatpush1.bf16.msra.mxu1 %v18721_v58 }
  0xa7   :  { %21481 = vst [vmem:[#allocation107_spill] sm:$0xff] %v18721_v58  ;;  %21484 = vst [vmem:[#allocation65_spill] sm:$0xff] %v18725_v44  ;;  %14337 = vmatprep.subr.bf16.mxu1 %v18687_v30  ;;  %439 = vmatmul.mubr.f32.vlgmr.msra.gmra.mrb[0].mxu0 %v21338_v6  ;;  %v21492_v30 = vand.u32 4294901760, %v18183_v27  ;;  %v21494_v58 = vand.u32 4294901760, %v18191_v21  ;;  %v21501_v27 = vand.u32 4294901760, %v18241_v36  ;;  %v21503_v21 = vand.u32 4294901760, %v18246_v19 }
  0xa8   :  { %21485 = vst [vmem:[#allocation66_spill] sm:$0xff] %v18731_v8  ;;  %14147 = vmatpush1.bf16.msra.mxu0 %v18725_v44  ;;  %573 = vmatprep.mubr.f32.mxu0 %v21338_v6  ;;  %21486 = vst [vmem:[#allocation108_spill] sm:$0xff] %v18743_v53  ;;  %v18751_v44 = vpack.c.bf16 %v18287_v48, %v18278_v29  ;;  %v21512_v36 = vld [vmem:[#allocation83_spill] sm:$0xff] }
  0xa9   :  { %1281 = vmatmul.mubr.f32.vlgmr.msra.gmra.mrb[0].mxu1 %v21338_v6  ;;  %14149 = vmatprep.subr.bf16.mxu0 %v18691_v0  ;;  %21487 = vst [vmem:[#allocation109_spill] sm:$0xff] %v18747_v57  ;;  %v18757_v0 = vpack.c.bf16 %v18298_v43, %v18292_v49  ;;  %v18773_v22 = vpack.c.bf16 %v21495_v54, %v21494_v58  ;;  %v21506_v54 = vand.u32 4294901760, %v18278_v29  ;;  %v21513_v19 = vand.u32 4294901760, %v21512_v36 }
  0xaa   :  { %14339 = vmatpush1.bf16.msra.mxu1 %v18731_v8  ;;  %21488 = vst [vmem:[#allocation110_spill] sm:$0xff] %v18751_v44  ;;  %1415 = vmatprep.mubr.f32.mxu1 %v21338_v6  ;;  %v21491_v8 = vand.u32 4294901760, %v18168_v11  ;;  %v21500_v11 = vand.u32 4294901760, %v18226_v41  ;;  %v21510_v41 = vand.u32 4294901760, %v18298_v43  ;;  %v21517_v29 = vand.u32 4294901760, %v18337_v37  ;;  %v21525_v43 = vld [vmem:[#allocation29_spill] sm:$0xff] }
  0xab   :  { %14341 = vmatprep.subr.bf16.mxu1 %v18697_v14  ;;  %21489 = vst [vmem:[#allocation111_spill] sm:$0xff] %v18757_v0  ;;  %v18761_v14 = vpack.c.bf16 %v18351_v31, %v18337_v37  ;;  %21496 = vst [vmem:[#allocation114_spill] sm:$0xff] %v18773_v22 }
  0xac   :  { %14151 = vmatpush1.bf16.msra.mxu0 %v18701_v5  ;;  %v18767_v51 = vpack.c.bf16 %v21492_v30, %v21491_v8  ;;  %v21497_v5 = vand.u32 4294901760, %v18210_v42  ;;  %v18786_v8 = vpack.c.bf16 %v21501_v27, %v21500_v11  ;;  %v18792_v30 = vpack.c.bf16 %v21504_v34, %v21503_v21  ;;  %v21520_v21 = vld [vmem:[#allocation26_spill] sm:$0xff] }
  0xad   :  { %21490 = vst [vmem:[#allocation112_spill] sm:$0xff] %v18761_v14  ;;  %14153 = vmatprep.subr.bf16.mxu0 %v18710_v35  ;;  %v21507_v42 = vand.u32 4294901760, %v18287_v48  ;;  %v21518_v48 = vand.u32 4294901760, %v18351_v31  ;;  %v21521_v34 = vand.u32 4294901760, %v21520_v21  ;;  %v21531_v35 = vld [vmem:[#allocation34_spill] sm:$0xff] }
  0xae   :  { %21493 = vst [vmem:[#allocation113_spill] sm:$0xff] %v18767_v51  ;;  %v18780_v46 = vpack.c.bf16 %v21498_v2, %v21497_v5  ;;  %21502 = vst [vmem:[#allocation116_spill] sm:$0xff] %v18786_v8  ;;  %14343 = vmatpush1.bf16.msra.mxu1 %v18706_v4  ;;  %v21509_v2 = vand.u32 4294901760, %v18292_v49  ;;  %v21514_v5 = vld [vmem:[#allocation85_spill] sm:$0xff]  ;;  %v21532_v31 = vand.u32 4294901760, %v21531_v35 }
  0xaf   :  { %21505 = vst [vmem:[#allocation117_spill] sm:$0xff] %v18792_v30  ;;  %v18798_v58 = vpack.c.bf16 %v21507_v42, %v21506_v54  ;;  %v21515_v10 = vand.u32 4294901760, %v21514_v5  ;;  %v18817_v27 = vpack.c.bf16 %v21518_v48, %v21517_v29  ;;  %v21522_v54 = vld [vmem:[#allocation27_spill] sm:$0xff]  ;;  %14345 = vmatprep.subr.bf16.mxu1 %v18714_v13 }
  0xb0   :  { %21499 = vst [vmem:[#allocation115_spill] sm:$0xff] %v18780_v46  ;;  %v18805_v1 = vpack.c.bf16 %v21510_v41, %v21509_v2  ;;  %v21523_v49 = vand.u32 4294901760, %v21522_v54  ;;  %v21526_v2 = vand.u32 4294901760, %v21525_v43  ;;  %v21527_v41 = vand.u32 4294901760, %v18383_v50  ;;  %v21534_v48 = vld [vmem:[#allocation35_spill] sm:$0xff]  ;;  %14155 = vmatpush1.bf16.msra.mxu0 %v18718_v12 }
  0xb1   :  { %21508 = vst [vmem:[#allocation118_spill] sm:$0xff] %v18798_v58  ;;  %v18811_v11 = vpack.c.bf16 %v21515_v10, %v21513_v19  ;;  %21519 = vst [vmem:[#allocation85_spill] sm:$0xff] %v18817_v27  ;;  %v21529_v10 = vld [vmem:[#allocation31_spill] sm:$0xff]  ;;  %v21535_v4 = vand.u32 4294901760, %v21534_v48  ;;  %v21556_v12 = vand.u32 4294901760, %v18532_v63  ;;  %14157 = vmatprep.subr.bf16.mxu0 %v18747_v57  ;;  %v21569_v57 = vand.u32 4294901760, %v18623_v62 }
  0xb2   :  { %21511 = vst [vmem:[#allocation119_spill] sm:$0xff] %v18805_v1  ;;  %v18823_v42 = vpack.c.bf16 %v21523_v49, %v21521_v34  ;;  %v18830_v19 = vpack.c.bf16 %v21527_v41, %v21526_v2  ;;  %v21530_v37 = vand.u32 4294901760, %v21529_v10  ;;  %v21539_v49 = vld [vmem:[#allocation38_spill] sm:$0xff]  ;;  %v21544_v2 = vld [vmem:[#allocation40_spill] sm:$0xff]  ;;  %14347 = vmatpush1.bf16.msra.mxu1 %v18743_v53 }
  0xb3   :  { %21516 = vst [vmem:[#allocation83_spill] sm:$0xff] %v18811_v11  ;;  %v21536_v11 = vld [vmem:[#allocation36_spill] sm:$0xff]  ;;  %v21540_v13 = vand.u32 4294901760, %v21539_v49  ;;  %v21545_v41 = vand.u32 4294901760, %v21544_v2  ;;  %14349 = vmatprep.subr.bf16.mxu1 %v18751_v44 }
  0xb4   :  { %21524 = vst [vmem:[#allocation26_spill] sm:$0xff] %v18823_v42  ;;  %21528 = vst [vmem:[#allocation27_spill] sm:$0xff] %v18830_v19  ;;  %v18836_v29 = vpack.c.bf16 %v21532_v31, %v21530_v37  ;;  %v21537_v27 = vand.u32 4294901760, %v21536_v11  ;;  %v21541_v42 = vld [vmem:[#allocation39_spill] sm:$0xff]  ;;  %v21546_v19 = vld [vmem:[#allocation42_spill] sm:$0xff]  ;;  %v21549_v31 = vand.u32 4294901760, %v18477_v38  ;;  %14159 = vmatpush1.bf16.msra.mxu0 %v18757_v0 }
  0xb5   :  { %v21542_v1 = vand.u32 4294901760, %v21541_v42  ;;  %v21547_v8 = vand.u32 4294901760, %v21546_v19  ;;  %14161 = vmatprep.subr.bf16.mxu0 %v18761_v14 }
  0xb6   :  { %21533 = vst [vmem:[#allocation29_spill] sm:$0xff] %v18836_v29  ;;  %v18842_v34 = vpack.c.bf16 %v21537_v27, %v21535_v4  ;;  %v21550_v29 = vand.u32 4294901760, %v18488_v17  ;;  %v21552_v27 = vand.u32 4294901760, %v18505_v60 }
  0xb7   :  { %v18848_v58 = vpack.c.bf16 %v21542_v1, %v21540_v13  ;;  %v18855_v37 = vpack.c.bf16 %v21547_v8, %v21545_v41  ;;  %v21555_v1 = vand.u32 4294901760, %v18527_v32  ;;  %v21558_v8 = vld [vmem:[#allocation92_spill] sm:$0xff] }
  0xb8   :  { %21538 = vst [vmem:[#allocation31_spill] sm:$0xff] %v18842_v34  ;;  %v18861_v4 = vpack.c.bf16 %v21550_v29, %v21549_v31  ;;  %v21553_v34 = vand.u32 4294901760, %v18519_v45  ;;  %v21559_v41 = vand.u32 4294901760, %v21558_v8  ;;  %v21562_v31 = vand.u32 4294901760, %v18562_v3 }
  0xb9   :  { %21543 = vst [vmem:[#allocation34_spill] sm:$0xff] %v18848_v58  ;;  %21548 = vst [vmem:[#allocation35_spill] sm:$0xff] %v18855_v37  ;;  %v18873_v58 = vpack.c.bf16 %v21556_v12, %v21555_v1  ;;  %v21560_v37 = vand.u32 4294901760, %v18551_v33  ;;  %v21568_v1 = vand.u32 4294901760, %v18614_v28 }
  0xba   :  { %21551 = vst [vmem:[#allocation36_spill] sm:$0xff] %v18861_v4  ;;  %v18867_v13 = vpack.c.bf16 %v21553_v34, %v21552_v27  ;;  %v21563_v4 = vand.u32 4294901760, %v18577_v7  ;;  %v21565_v27 = vand.u32 4294901760, %v18582_v26 }
  0xbb   :  { %21557 = vst [vmem:[#allocation39_spill] sm:$0xff] %v18873_v58  ;;  %v18880_v29 = vpack.c.bf16 %v21560_v37, %v21559_v41  ;;  %v18898_v58 = vpack.c.bf16 %v21569_v57, %v21568_v1  ;;  %v18903_v37 = vpack.c.bf16 %v21514_v5, %v21512_v36  ;;  %v21573_v41 = vand.u32 4294901760, %v18634_v55 }
  0xbc   :  { %21554 = vst [vmem:[#allocation38_spill] sm:$0xff] %v18867_v13  ;;  %v18886_v34 = vpack.c.bf16 %v21563_v4, %v21562_v31  ;;  %v21566_v13 = vand.u32 4294901760, %v18602_v56  ;;  %v21572_v4 = vand.u32 4294901760, %v18628_v20  ;;  %v18920_v57 = vpack.c.bf16 %v21522_v54, %v21520_v21 }
  0xbd   :  { %21561 = vst [vmem:[#allocation40_spill] sm:$0xff] %v18880_v29  ;;  %21570 = vst [vmem:[#allocation120_spill] sm:$0xff] %v18898_v58  ;;  %v18925_v36 = vpack.c.bf16 %v18383_v50, %v21525_v43  ;;  %v18930_v5 = vpack.c.bf16 %v21536_v11, %v21534_v48  ;;  %14351 = vmatpush1.bf16.msra.mxu1 %v18903_v37  ;;  %v18935_v1 = vpack.c.bf16 %v21531_v35, %v21529_v10  ;;  %v21605_v43 = vld [vmem:[#allocation25_spill] sm:$0xff] }
  0xbe   :  { %21564 = vst [vmem:[#allocation42_spill] sm:$0xff] %v18886_v34  ;;  %v18892_v12 = vpack.c.bf16 %v21566_v13, %v21565_v27  ;;  %21571 = vst [vmem:[#allocation121_spill] sm:$0xff] %v18903_v37  ;;  %v18909_v31 = vpack.c.bf16 %v21573_v41, %v21572_v4  ;;  %v21575_v13 = vand.u32 4294901760, %v18645_v24  ;;  %v21576_v27 = vand.u32 4294901760, %v18656_v39  ;;  %14353 = vmatprep.subr.bf16.mxu1 %v18920_v57  ;;  %v21607_v10 = vld [vmem:[#allocation33_spill] sm:$0xff]  ;;  %v21612_v4 = vld [vmem:[#allocation51_spill] sm:$0xff] }
  0xbf   :  { %21578 = vst [vmem:[#allocation124_spill] sm:$0xff] %v18920_v57  ;;  %21579 = vst [vmem:[#allocation125_spill] sm:$0xff] %v18925_v36  ;;  %v18940_v21 = vpack.c.bf16 %v21541_v42, %v21539_v49  ;;  %14163 = vmatpush1.bf16.msra.mxu0 %v18925_v36  ;;  %v18945_v50 = vpack.c.bf16 %v21546_v19, %v21544_v2  ;;  %v18950_v11 = vpack.c.bf16 %v18519_v45, %v18505_v60  ;;  %v21593_v45 = vld [vmem:[#allocation14_spill] sm:$0xff]  ;;  %v21606_v19 = vld [vmem:[#allocation32_spill] sm:$0xff] }
  0xc0   :  { %21567 = vst [vmem:[#allocation92_spill] sm:$0xff] %v18892_v12  ;;  %21574 = vst [vmem:[#allocation122_spill] sm:$0xff] %v18909_v31  ;;  %v18915_v34 = vpack.c.bf16 %v21576_v27, %v21575_v13  ;;  %14165 = vmatprep.subr.bf16.mxu0 %v18930_v5  ;;  %v18955_v35 = vpack.c.bf16 %v18488_v17, %v18477_v38  ;;  %v18960_v54 = vpack.c.bf16 %v18532_v63, %v18527_v32  ;;  %v21594_v32 = vld [vmem:[#allocation15_spill] sm:$0xff]  ;;  %v21608_v48 = vld [vmem:[#allocation41_spill] sm:$0xff] }
  0xc1   :  { %21580 = vst [vmem:[#allocation126_spill] sm:$0xff] %v18930_v5  ;;  %21581 = vst [vmem:[#allocation127_spill] sm:$0xff] %v18935_v1  ;;  %14355 = vmatpush1.bf16.msra.mxu1 %v18935_v1  ;;  %v18965_v42 = vpack.c.bf16 %v18551_v33, %v21558_v8  ;;  %v18970_v60 = vpack.c.bf16 %v18602_v56, %v18582_v26  ;;  %v18975_v17 = vpack.c.bf16 %v18577_v7, %v18562_v3  ;;  %v21595_v3 = vld [vmem:[#allocation16_spill] sm:$0xff]  ;;  %v21596_v56 = vld [vmem:[#allocation18_spill] sm:$0xff] }
  0xc2   :  { %21577 = vst [vmem:[#allocation123_spill] sm:$0xff] %v18915_v34  ;;  %21582 = vst [vmem:[#allocation128_spill] sm:$0xff] %v18940_v21  ;;  %14357 = vmatprep.subr.bf16.mxu1 %v18940_v21  ;;  %v18980_v38 = vpack.c.bf16 %v18623_v62, %v18614_v28  ;;  %v18985_v63 = vpack.c.bf16 %v18634_v55, %v18628_v20  ;;  %v18991_v26 = vpack.c.bf16 %v18656_v39, %v18645_v24  ;;  %v21597_v33 = vld [vmem:[#allocation17_spill] sm:$0xff]  ;;  %v21598_v7 = vld [vmem:[#allocation19_spill] sm:$0xff] }
  0xc3   :  { %21583 = vst [vmem:[#allocation129_spill] sm:$0xff] %v18945_v50  ;;  %21584 = vst [vmem:[#allocation130_spill] sm:$0xff] %v18950_v11  ;;  %14167 = vmatpush1.bf16.msra.mxu0 %v18945_v50  ;;  %v21599_v20 = vld [vmem:[#allocation20_spill] sm:$0xff]  ;;  %v21600_v28 = vld [vmem:[#allocation22_spill] sm:$0xff]  ;;  %v21626_v21 = vand.u32 4294901760, %v18009_v47  ;;  %v21627_v5 = vand.u32 4294901760, %v21471_v25 }
  0xc4   :  { %21585 = vst [vmem:[#allocation131_spill] sm:$0xff] %v18955_v35  ;;  %21586 = vst [vmem:[#allocation132_spill] sm:$0xff] %v18960_v54  ;;  %14169 = vmatprep.subr.bf16.mxu0 %v18950_v11  ;;  %v21601_v39 = vld [vmem:[#allocation21_spill] sm:$0xff]  ;;  %v21602_v62 = vld [vmem:[#allocation23_spill] sm:$0xff]  ;;  %v21630_v57 = vand.u32 4294901760, %v21482_v16  ;;  %v21637_v25 = vand.u32 4294901760, %v18041_v40 }
  0xc5   :  { %21587 = vst [vmem:[#allocation133_spill] sm:$0xff] %v18965_v42  ;;  %21588 = vst [vmem:[#allocation134_spill] sm:$0xff] %v18970_v60  ;;  %14359 = vmatpush1.bf16.msra.mxu1 %v18955_v35  ;;  %v21603_v55 = vld [vmem:[#allocation24_spill] sm:$0xff]  ;;  %v21609_v49 = vld [vmem:[#allocation37_spill] sm:$0xff]  ;;  %v19040_v1 = vpack.c.bf16 %v21627_v5, %v21626_v21  ;;  %v21638_v5 = vand.u32 4294901760, %v18052_v9  ;;  %v21640_v16 = vand.u32 4294901760, %v18101_v15 }
  0xc6   :  { %21589 = vst [vmem:[#allocation135_spill] sm:$0xff] %v18975_v17  ;;  %14361 = vmatprep.subr.bf16.mxu1 %v18960_v54  ;;  %21590 = vst [vmem:[#allocation136_spill] sm:$0xff] %v18980_v38  ;;  %v21604_v24 = vld [vmem:[#allocation28_spill] sm:$0xff]  ;;  %v21610_v2 = vld [vmem:[#allocation45_spill] sm:$0xff]  ;;  %v21622_v54 = vand.u32 4294901760, %v18004_v23  ;;  %v21633_v23 = vand.u32 4294901760, %v18085_v61 }
  0xc7   :  { %14171 = vmatpush1.bf16.msra.mxu0 %v18965_v42  ;;  %21591 = vst [vmem:[#allocation137_spill] sm:$0xff] %v18985_v63  ;;  %21592 = vst [vmem:[#allocation138_spill] sm:$0xff] %v18991_v26  ;;  %v21611_v8 = vld [vmem:[#allocation46_spill] sm:$0xff]  ;;  %v21613_v41 = vld [vmem:[#allocation48_spill] sm:$0xff]  ;;  %v21621_v42 = vand.u32 4294901760, %v17987_v52  ;;  %v21631_v52 = vand.u32 4294901760, %v21483_v18  ;;  %v19061_v21 = vpack.c.bf16 %v21638_v5, %v21637_v25 }
  0xc8   :  { %14173 = vmatprep.subr.bf16.mxu0 %v18970_v60  ;;  %v21614_v13 = vld [vmem:[#allocation52_spill] sm:$0xff]  ;;  %v21615_v27 = vld [vmem:[#allocation53_spill] sm:$0xff]  ;;  %v21619_v60 = vld [vmem:[#allocation58_spill] sm:$0xff]  ;;  %21628 = vst [vmem:[#allocation15_spill] sm:$0xff] %v19040_v1 }
  0xc9   :  { %14363 = vmatpush1.bf16.msra.mxu1 %v18975_v17  ;;  %v21620_v17 = vld [vmem:[#allocation60_spill] sm:$0xff]  ;;  %v19032_v11 = vpack.c.bf16 %v21622_v54, %v21621_v42  ;;  %v21624_v35 = vld [vmem:[#allocation59_spill] sm:$0xff]  ;;  %v21625_v50 = vld [vmem:[#allocation61_spill] sm:$0xff]  ;;  %v19047_v14 = vpack.c.bf16 %v21631_v52, %v21630_v57  ;;  %v21634_v54 = vand.u32 4294901760, %v18092_v59  ;;  %21639 = vst [vmem:[#allocation17_spill] sm:$0xff] %v19061_v21 }
  0xca   :  { %14365 = vmatprep.subr.bf16.mxu1 %v18980_v38  ;;  %v21618_v38 = vld [vmem:[#allocation57_spill] sm:$0xff]  ;;  %v21629_v36 = vld [vmem:[#allocation62_spill] sm:$0xff]  ;;  %v21636_v47 = vld [vmem:[#allocation63_spill] sm:$0xff] }
  0xcb   :  { %14175 = vmatpush1.bf16.msra.mxu0 %v18985_v63  ;;  %v21617_v63 = vld [vmem:[#allocation54_spill] sm:$0xff]  ;;  %21623 = vst [vmem:[#allocation14_spill] sm:$0xff] %v19032_v11  ;;  %21632 = vst [vmem:[#allocation16_spill] sm:$0xff] %v19047_v14  ;;  %v19054_v42 = vpack.c.bf16 %v21634_v54, %v21633_v23  ;;  %v21644_v59 = vld [vmem:[#allocation71_spill] sm:$0xff] }
  0xcc   :  { %14177 = vmatprep.subr.bf16.mxu0 %v21593_v45  ;;  %v21641_v18 = vld [vmem:[#allocation70_spill] sm:$0xff]  ;;  %v21645_v52 = vand.u32 4294901760, %v21644_v59  ;;  %v21646_v23 = vld [vmem:[#allocation73_spill] sm:$0xff]  ;;  %v21651_v25 = vld [vmem:[#allocation75_spill] sm:$0xff] }
  0xcd   :  { %14367 = vmatpush1.bf16.msra.mxu1 %v18991_v26  ;;  %v21616_v26 = vld [vmem:[#allocation56_spill] sm:$0xff]  ;;  %21635 = vst [vmem:[#allocation18_spill] sm:$0xff] %v19054_v42  ;;  %v21642_v61 = vand.u32 4294901760, %v21641_v18  ;;  %v21647_v40 = vand.u32 4294901760, %v21646_v23  ;;  %v21649_v9 = vld [vmem:[#allocation74_spill] sm:$0xff]  ;;  %v21652_v5 = vand.u32 4294901760, %v21651_v25 }
  0xce   :  { %14369 = vmatprep.subr.bf16.mxu1 %v21594_v32  ;;  %574 = vmatmul.mubr.f32.vlgmr.msra.gmra.mrb[0].mxu0 %v21338_v6  ;;  %v21650_v15 = vand.u32 4294901760, %v21649_v9  ;;  %v21654_v18 = vld [vmem:[#allocation116_spill] sm:$0xff]  ;;  %v21656_v59 = vld [vmem:[#allocation119_spill] sm:$0xff]  ;;  %v21662_v25 = vld [vmem:[#allocation29_spill] sm:$0xff] }
  0xcf   :  { %14179 = vmatpush1.bf16.msra.mxu0 %v21595_v3  ;;  %676 = vmatprep.mubr.f32.mxu0 %v21338_v6  ;;  %v19069_v57 = vpack.c.bf16 %v21642_v61, %v21640_v16  ;;  %v19076_v54 = vpack.c.bf16 %v21647_v40, %v21645_v52  ;;  %v21655_v61 = vld [vmem:[#allocation118_spill] sm:$0xff]  ;;  %v21657_v52 = vld [vmem:[#allocation85_spill] sm:$0xff]  ;;  %v21658_v23 = vld [vmem:[#allocation83_spill] sm:$0xff] }
  0xd0   :  { %1416 = vmatmul.mubr.f32.vlgmr.msra.gmra.mrb[0].mxu1 %v21338_v6  ;;  %14181 = vmatprep.subr.bf16.mxu0 %v21596_v56  ;;  %v19086_v16 = vpack.c.bf16 %v21652_v5, %v21650_v15  ;;  %v21659_v40 = vld [vmem:[#allocation26_spill] sm:$0xff]  ;;  %v21660_v9 = vld [vmem:[#allocation27_spill] sm:$0xff] }
  0xd1   :  { %14371 = vmatpush1.bf16.msra.mxu1 %v21597_v33  ;;  %1518 = vmatprep.mubr.f32.mxu1 %v21338_v6  ;;  %21643 = vst [vmem:[#allocation19_spill] sm:$0xff] %v19069_v57  ;;  %21648 = vst [vmem:[#allocation20_spill] sm:$0xff] %v19076_v54  ;;  %v21661_v15 = vld [vmem:[#allocation31_spill] sm:$0xff]  ;;  %v21663_v5 = vld [vmem:[#allocation34_spill] sm:$0xff] }
  0xd2   :  { %14373 = vmatprep.subr.bf16.mxu1 %v21598_v7  ;;  %21653 = vst [vmem:[#allocation22_spill] sm:$0xff] %v19086_v16 }
  0xd3   :  { %14183 = vmatpush1.bf16.msra.mxu0 %v21599_v20 }
  0xd4   :  { %14185 = vmatprep.subr.bf16.mxu0 %v21600_v28 }
  0xd5   :  { %14375 = vmatpush1.bf16.msra.mxu1 %v21601_v39 }
  0xd6   :  { %14377 = vmatprep.subr.bf16.mxu1 %v21602_v62 }
  0xd7   :  { %14187 = vmatpush1.bf16.msra.mxu0 %v21603_v55 }
  0xd8   :  { %14189 = vmatprep.subr.bf16.mxu0 %v21604_v24 }
  0xd9   :  { %14379 = vmatpush1.bf16.msra.mxu1 %v21605_v43 }
  0xda   :  { %14381 = vmatprep.subr.bf16.mxu1 %v21606_v19 }
  0xdb   :  { %14191 = vmatpush1.bf16.msra.mxu0 %v21607_v10 }
  0xdc   :  { %14193 = vmatprep.subr.bf16.mxu0 %v21608_v48 }
  0xdd   :  { %14383 = vmatpush1.bf16.msra.mxu1 %v21609_v49 }
  0xde   :  { %14385 = vmatprep.subr.bf16.mxu1 %v21610_v2 }
  0xdf   :  { %14195 = vmatpush1.bf16.msra.mxu0 %v21611_v8 }
  0xe0   :  { %14197 = vmatprep.subr.bf16.mxu0 %v21612_v4 }
  0xe1   :  { %14387 = vmatpush1.bf16.msra.mxu1 %v21613_v41 }
  0xe2   :  { %14389 = vmatprep.subr.bf16.mxu1 %v21614_v13 }
  0xe3   :  { %14199 = vmatpush1.bf16.msra.mxu0 %v21615_v27 }
  0xe4   :  { %14201 = vmatprep.subr.bf16.mxu0 %v21616_v26 }
  0xe5   :  { %14391 = vmatpush1.bf16.msra.mxu1 %v21617_v63 }
  0xe6   :  { %14393 = vmatprep.subr.bf16.mxu1 %v21618_v38 }
  0xe7   :  { %14203 = vmatpush1.bf16.msra.mxu0 %v21619_v60 }
  0xe8   :  { %14205 = vmatprep.subr.bf16.mxu0 %v21620_v17 }
  0xe9   :  { %14395 = vmatpush1.bf16.msra.mxu1 %v21624_v35 }
  0xea   :  { %14397 = vmatprep.subr.bf16.mxu1 %v21625_v50 }
  0xeb   :  { %14207 = vmatpush1.bf16.msra.mxu0 %v21629_v36 }
  0xec   :  { %14209 = vmatprep.subr.bf16.mxu0 %v19032_v11 }
  0xed   :  { %14399 = vmatpush1.bf16.msra.mxu1 %v21636_v47 }
  0xee   :  { %14401 = vmatprep.subr.bf16.mxu1 %v19040_v1  ;;  %677 = vmatmul.mubr.f32.vlgmr.msra.gmra.mrb[0].mxu0 %v21338_v6 }
  0xef   :  { %14211 = vmatpush1.bf16.msra.mxu0 %v19047_v14  ;;  %843 = vmatprep.mubr.f32.mxu0 %v21338_v6 }
  0xf0   :  { %1519 = vmatmul.mubr.f32.vlgmr.msra.gmra.mrb[0].mxu1 %v21338_v6  ;;  %14213 = vmatprep.subr.bf16.mxu0 %v19054_v42 }
  0xf1   :  { %14403 = vmatpush1.bf16.msra.mxu1 %v19061_v21  ;;  %1685 = vmatprep.mubr.f32.mxu1 %v21338_v6 }
  0xf2   :  { %14405 = vmatprep.subr.bf16.mxu1 %v19069_v57 }
  0xf3   :  { %14215 = vmatpush1.bf16.msra.mxu0 %v19076_v54 }
  0xf4   :  { %14217 = vmatprep.subr.bf16.mxu0 %v18767_v51 }
  0xf5   :  { %14407 = vmatpush1.bf16.msra.mxu1 %v19086_v16 }
  0xf6   :  { %14409 = vmatprep.subr.bf16.mxu1 %v18773_v22 }
  0xf7   :  { %14219 = vmatpush1.bf16.msra.mxu0 %v18780_v46 }
  0xf8   :  { %14221 = vmatprep.subr.bf16.mxu0 %v18792_v30  ;;  %v21664_v30 = vld [vmem:[#allocation35_spill] sm:$0xff] }
  0xf9   :  { %14411 = vmatpush1.bf16.msra.mxu1 %v21654_v18  ;;  %v21665_v18 = vld [vmem:[#allocation38_spill] sm:$0xff] }
  0xfa   :  { %14413 = vmatprep.subr.bf16.mxu1 %v21655_v61  ;;  %v21666_v61 = vld [vmem:[#allocation36_spill] sm:$0xff] }
  0xfb   :  { %14223 = vmatpush1.bf16.msra.mxu0 %v21656_v59  ;;  %v21667_v59 = vld [vmem:[#allocation39_spill] sm:$0xff] }
  0xfc   :  { %14225 = vmatprep.subr.bf16.mxu0 %v21657_v52 }
  0xfd   :  { %14415 = vmatpush1.bf16.msra.mxu1 %v21658_v23 }
  0xfe   :  { %14417 = vmatprep.subr.bf16.mxu1 %v21659_v40  ;;  %v21668_v40 = vld [vmem:[#allocation42_spill] sm:$0xff] }
  0xff   :  { %14227 = vmatpush1.bf16.msra.mxu0 %v21660_v9  ;;  %v109_v9 = vld [vmem:[#allocation2 + $0x10] sm:$0xff] }
 0x100   :  { %14229 = vmatprep.subr.bf16.mxu0 %v21661_v15 }
 0x101   :  { %14419 = vmatpush1.bf16.msra.mxu1 %v21662_v25  ;;  %v110_v25 = vld [vmem:[#allocation2 + $0x18] sm:$0xff] }
 0x102   :  { %14421 = vmatprep.subr.bf16.mxu1 %v21663_v5 }
 0x103   :  { %14231 = vmatpush1.bf16.msra.mxu0 %v21664_v30 }
 0x104   :  { %14233 = vmatprep.subr.bf16.mxu0 %v21665_v18 }
 0x105   :  { %14423 = vmatpush1.bf16.msra.mxu1 %v21666_v61 }
 0x106   :  { %14425 = vmatprep.subr.bf16.mxu1 %v21667_v59 }
 0x107   :  { %14235 = vmatpush1.bf16.msra.mxu0 %v18880_v29 }
 0x108   :  { %14237 = vmatprep.subr.bf16.mxu0 %v18892_v12  ;;  %v108_v12 = vld [vmem:[#allocation2 + $0x8] sm:$0xff] }
 0x109   :  { %14427 = vmatpush1.bf16.msra.mxu1 %v21668_v40 }
 0x10a   :  { %14429 = vmatprep.subr.bf16.mxu1 %v18898_v58  ;;  %v107_v58 = vld [vmem:[#allocation2] sm:$0xff] }
 0x10b   :  { %14239 = vmatpush1.bf16.msra.mxu0 %v18909_v31  ;;  %v21670_v31 = vld [vmem:[#allocation68_spill] sm:$0xff] }
 0x10c   :  { %14241 = vmatprep.subr.bf16.mxu0 %v21593_v45 }
 0x10d   :  { %14431 = vmatpush1.bf16.msra.mxu1 %v18915_v34  ;;  %v21669_v34 = vld [vmem:[#allocation67_spill] sm:$0xff] }
 0x10e   :  { %14433 = vmatprep.subr.bf16.mxu1 %v21594_v32  ;;  %844 = vmatmul.mubr.f32.vlgmr.msra.gmra.mrb[0].mxu0 %v21338_v6 }
 0x10f   :  { %14243 = vmatpush1.bf16.msra.mxu0 %v21595_v3  ;;  %946 = vmatprep.mubr.f32.mxu0 %v21338_v6 }
 0x110   :  { %1686 = vmatmul.mubr.f32.vlgmr.msra.gmra.mrb[0].mxu1 %v21338_v6  ;;  %14245 = vmatprep.subr.bf16.mxu0 %v21596_v56 }
 0x111   :  { %14435 = vmatpush1.bf16.msra.mxu1 %v21597_v33  ;;  %1788 = vmatprep.mubr.f32.mxu1 %v21338_v6 }
 0x112   :  { %14437 = vmatprep.subr.bf16.mxu1 %v21598_v7 }
 0x113   :  { %14247 = vmatpush1.bf16.msra.mxu0 %v21599_v20 }
 0x114   :  { %14249 = vmatprep.subr.bf16.mxu0 %v21600_v28 }
 0x115   :  { %14439 = vmatpush1.bf16.msra.mxu1 %v21601_v39 }
 0x116   :  { %14441 = vmatprep.subr.bf16.mxu1 %v21602_v62 }
 0x117   :  { %14251 = vmatpush1.bf16.msra.mxu0 %v21603_v55 }
 0x118   :  { %14253 = vmatprep.subr.bf16.mxu0 %v21604_v24 }
 0x119   :  { %14443 = vmatpush1.bf16.msra.mxu1 %v21605_v43 }
 0x11a   :  { %14445 = vmatprep.subr.bf16.mxu1 %v21606_v19 }
 0x11b   :  { %14255 = vmatpush1.bf16.msra.mxu0 %v21607_v10 }
 0x11c   :  { %14257 = vmatprep.subr.bf16.mxu0 %v21608_v48 }
 0x11d   :  { %14447 = vmatpush1.bf16.msra.mxu1 %v21609_v49 }
 0x11e   :  { %14449 = vmatprep.subr.bf16.mxu1 %v21610_v2 }
 0x11f   :  { %14259 = vmatpush1.bf16.msra.mxu0 %v21611_v8 }
 0x120   :  { %14261 = vmatprep.subr.bf16.mxu0 %v21612_v4 }
 0x121   :  { %14451 = vmatpush1.bf16.msra.mxu1 %v21613_v41 }
 0x122   :  { %14453 = vmatprep.subr.bf16.mxu1 %v21614_v13 }
 0x123   :  { %14263 = vmatpush1.bf16.msra.mxu0 %v21615_v27 }
 0x124   :  { %14265 = vmatprep.subr.bf16.mxu0 %v21616_v26 }
 0x125   :  { %14455 = vmatpush1.bf16.msra.mxu1 %v21617_v63 }
 0x126   :  { %14457 = vmatprep.subr.bf16.mxu1 %v21618_v38 }
 0x127   :  { %14267 = vmatpush1.bf16.msra.mxu0 %v21619_v60 }
 0x128   :  { %14269 = vmatprep.subr.bf16.mxu0 %v21620_v17 }
 0x129   :  { %14459 = vmatpush1.bf16.msra.mxu1 %v21624_v35 }
 0x12a   :  { %14461 = vmatprep.subr.bf16.mxu1 %v21625_v50 }
 0x12b   :  { %14271 = vmatpush1.bf16.msra.mxu0 %v21629_v36 }
 0x12c   :  { %14465 = vmatprep.subr.bf16.mxu0 %v21593_v45 }
 0x12d   :  { %14463 = vmatpush1.bf16.msra.mxu1 %v21636_v47 }
 0x12e   :  { %947 = vmatmul.mubr.f32.vlgmr.msra.gmra.mrb[0].mxu0 %v21338_v6  ;;  %14657 = vmatprep.subr.bf16.mxu1 %v21594_v32 }
 0x12f   :  { %14467 = vmatpush1.bf16.msra.mxu0 %v21595_v3  ;;  %1924 = vmatprep.mubr.f32.mxu0 %v21338_v6 }
 0x130   :  { %1789 = vmatmul.mubr.f32.vlgmr.msra.gmra.mrb[0].mxu1 %v21338_v6  ;;  %14469 = vmatprep.subr.bf16.mxu0 %v21596_v56 }
 0x131   :  { %14659 = vmatpush1.bf16.msra.mxu1 %v21597_v33  ;;  %2779 = vmatprep.mubr.f32.mxu1 %v21338_v6 }
 0x132   :  { %14661 = vmatprep.subr.bf16.mxu1 %v21598_v7 }
 0x133   :  { %14471 = vmatpush1.bf16.msra.mxu0 %v21599_v20 }
 0x134   :  { %14473 = vmatprep.subr.bf16.mxu0 %v21600_v28 }
 0x135   :  { %14663 = vmatpush1.bf16.msra.mxu1 %v21601_v39 }
 0x136   :  { %14665 = vmatprep.subr.bf16.mxu1 %v21602_v62 }
 0x137   :  { %14475 = vmatpush1.bf16.msra.mxu0 %v21603_v55 }
 0x138   :  { %14477 = vmatprep.subr.bf16.mxu0 %v21604_v24 }
 0x139   :  { %14667 = vmatpush1.bf16.msra.mxu1 %v21605_v43 }
 0x13a   :  { %14669 = vmatprep.subr.bf16.mxu1 %v21606_v19 }
 0x13b   :  { %14479 = vmatpush1.bf16.msra.mxu0 %v21607_v10 }
 0x13c   :  { %14481 = vmatprep.subr.bf16.mxu0 %v21608_v48 }
 0x13d   :  { %14671 = vmatpush1.bf16.msra.mxu1 %v21609_v49 }
 0x13e   :  { %14673 = vmatprep.subr.bf16.mxu1 %v21610_v2 }
 0x13f   :  { %14483 = vmatpush1.bf16.msra.mxu0 %v21611_v8 }
 0x140   :  { %14485 = vmatprep.subr.bf16.mxu0 %v21612_v4 }
 0x141   :  { %14675 = vmatpush1.bf16.msra.mxu1 %v21613_v41 }
 0x142   :  { %14677 = vmatprep.subr.bf16.mxu1 %v21614_v13 }
 0x143   :  { %14487 = vmatpush1.bf16.msra.mxu0 %v21615_v27 }
 0x144   :  { %14489 = vmatprep.subr.bf16.mxu0 %v21616_v26 }
 0x145   :  { %14679 = vmatpush1.bf16.msra.mxu1 %v21617_v63 }
 0x146   :  { %14681 = vmatprep.subr.bf16.mxu1 %v21618_v38 }
 0x147   :  { %14491 = vmatpush1.bf16.msra.mxu0 %v21619_v60 }
 0x148   :  { %14493 = vmatprep.subr.bf16.mxu0 %v21620_v17 }
 0x149   :  { %14683 = vmatpush1.bf16.msra.mxu1 %v21624_v35 }
 0x14a   :  { %14685 = vmatprep.subr.bf16.mxu1 %v21625_v50 }
 0x14b   :  { %14495 = vmatpush1.bf16.msra.mxu0 %v21629_v36 }
 0x14c   :  { %14497 = vmatprep.subr.bf16.mxu0 %v21669_v34 }
 0x14d   :  { %14687 = vmatpush1.bf16.msra.mxu1 %v21636_v47 }
 0x14e   :  { %14689 = vmatprep.subr.bf16.mxu1 %v21670_v31 }
 0x201   :  { %v948_v40 = vpop.f32.mrb[0].mxu0 }
 0x202   :  { %v1795_v29 = vadd.f32 %v948_v40, %v107_v58  ;;  %v950_v59 = vpop.f32.mrb[1].mxu0 }
 0x203   :  { %v1790_v18 = vpop.f32.mrb[0].mxu1  ;;  %v1796_v61 = vadd.f32 %v950_v59, %v108_v12 }
 0x204   :  { %v14056_v30 = vmul.f32 -1.442695, %v1795_v29  ;;  %v1792_v5 = vpop.f32.mrb[1].mxu1  ;;  %v1797_v34 = vadd.f32 %v1790_v18, %v109_v9 }
 0x205   :  { %v14057_v15 = vmul.f32 -1.442695, %v1796_v61  ;;  %v1798_v52 = vadd.f32 %v1792_v5, %v110_v25  ;;  %v21672_v25 = vld [vmem:[#allocation72_spill] sm:$0xff] }
 0x206   :  { %17319 = vpow2.f32 %v14056_v30  ;;  %v21673_v5 = vld [vmem:[#allocation76_spill] sm:$0xff] }
 0x207   :  { %17321 = vpow2.f32 %v14057_v15  ;;  %v14058_v23 = vmul.f32 -1.442695, %v1798_v52 }
 0x208   :  { %17323 = vtanh.f32 %v1797_v34 }
 0x209   :  { %17325 = vpow2.f32 %v14058_v23 }
 0x210   :  { %v17320_v46 = vpop.eup %17319 }
 0x211   :  { %v1802_v22 = vadd.f32 1.0, %v17320_v46  ;;  %v17322_v31 = vpop.eup %17321 }
 0x212   :  { %v1808_v58 = vadd.f32 1.0, %v17322_v31  ;;  %v17324_v40 = vpop.eup %17323 }
 0x213   :  { %17327 = vrcp.f32 %v1802_v22  ;;  %v17326_v12 = vpop.eup %17325 }
 0x214   :  { %17329 = vrcp.f32 %v1808_v58  ;;  %v1815_v30 = vadd.f32 1.0, %v17326_v12  ;;  %v21674_v58 = vld [vmem:[#allocation77_spill] sm:$0xff]  ;;  %v21676_v12 = vld [vmem:[#allocation79_spill] sm:$0xff] }
 0x216   :  { %17331 = vrcp.f32 %v1815_v30  ;;  %v21680_v30 = vld [vmem:[#allocation84_spill] sm:$0xff] }
 0x21d   :  { %v17328_v29 = vpop.eup %17327 }
 0x21e   :  { %v1819_v59 = vmul.f32 %v17328_v29, %v17324_v40  ;;  %v17330_v61 = vpop.eup %17329  ;;  %v21675_v40 = vld [vmem:[#allocation78_spill] sm:$0xff]  ;;  %v21677_v29 = vld [vmem:[#allocation80_spill] sm:$0xff] }
 0x21f   :  { %v1818_v51 = vmul.f32 0.0, %v17330_v61  ;;  %v21679_v61 = vld [vmem:[#allocation82_spill] sm:$0xff] }
 0x220   :  { %v17332_v18 = vpop.eup %17331 }
 0x221   :  { %v19190_v15 = vadd.f32 %v1819_v59, %v1818_v51  ;;  %v21671_v51 = vld [vmem:[#allocation69_spill] sm:$0xff] }
 0x222   :  { %v21678_v59 = vld [vmem:[#allocation81_spill] sm:$0xff] }
 0x223   :  { %17333 = vtanh.f32 %v19190_v15 }
 0x22d   :  { %v17334_v46 = vpop.eup %17333 }
 0x22e   :  { %v1822_v34 = vmul.f32 %v17334_v46, %v17332_v18  ;;  %v21681_v18 = vld [vmem:[#allocation86_spill] sm:$0xff]  ;;  %v21682_v46 = vld [vmem:[#allocation87_spill] sm:$0xff] }
 0x230   :  { %v19193_v52 = vand.u32 4294901760, %v1822_v34 }
 0x232   :  { %v19196_v22 = vsub.f32 %v1822_v34, %v19193_v52  ;;  %v21683_v34 = vld [vmem:[#allocation88_spill] sm:$0xff] }
 0x234   :  { %v19199_v31 = vand.u32 4294901760, %v19196_v22 }
 0x236   :  { %v1928_v23 = vsub.f32 %v19196_v22, %v19199_v31 }
 0x238   :  { %v1929_v9 = vand.u32 4294901760, %v1928_v23  ;;  %v21684_v23 = vld [vmem:[#allocation30_spill] sm:$0xff] }
 0x23a   :  { %1930 = vmatmul.mubr.f32.vlgmr.msra.gmra.mrb[2].mxu0 %v1929_v9  ;;  %2785 = vmatmul.mubr.f32.vlgmr.msra.gmra.mrb[2].mxu1 %v1929_v9  ;;  %v21685_v9 = vld [vmem:[#allocation89_spill] sm:$0xff] }
 0x23b   :  { %14499 = vmatpush1.bf16.msra.mxu0 %v21671_v51  ;;  %14691 = vmatpush1.bf16.msra.mxu1 %v21672_v25 }
 0x23c   :  { %14501 = vmatprep.subr.bf16.mxu0 %v21673_v5  ;;  %14693 = vmatprep.subr.bf16.mxu1 %v21674_v58 }
 0x23d   :  { %2160 = vmatprep.mubr.f32.mxu0 %v21338_v6  ;;  %3015 = vmatprep.mubr.f32.mxu1 %v21338_v6 }
 0x23f   :  { %14503 = vmatpush1.bf16.msra.mxu0 %v21675_v40  ;;  %14695 = vmatpush1.bf16.msra.mxu1 %v21676_v12  ;;  %v21686_v40 = vld [vmem:[#allocation90_spill] sm:$0xff]  ;;  %v21687_v12 = vld [vmem:[#allocation91_spill] sm:$0xff] }
 0x240   :  { %14505 = vmatprep.subr.bf16.mxu0 %v21677_v29  ;;  %14697 = vmatprep.subr.bf16.mxu1 %v21678_v59  ;;  %v21688_v29 = vld [vmem:[#allocation43_spill] sm:$0xff]  ;;  %v21689_v59 = vld [vmem:[#allocation44_spill] sm:$0xff] }
 0x243   :  { %14507 = vmatpush1.bf16.msra.mxu0 %v21679_v61  ;;  %14699 = vmatpush1.bf16.msra.mxu1 %v21680_v30  ;;  %v21690_v61 = vld [vmem:[#allocation47_spill] sm:$0xff]  ;;  %v21691_v30 = vld [vmem:[#allocation49_spill] sm:$0xff] }
 0x244   :  { %14509 = vmatprep.subr.bf16.mxu0 %v21681_v18  ;;  %14701 = vmatprep.subr.bf16.mxu1 %v21682_v46  ;;  %v21692_v18 = vld [vmem:[#allocation50_spill] sm:$0xff]  ;;  %v21693_v46 = vld [vmem:[#allocation93_spill] sm:$0xff] }
 0x247   :  { %14511 = vmatpush1.bf16.msra.mxu0 %v21683_v34  ;;  %14703 = vmatpush1.bf16.msra.mxu1 %v21684_v23  ;;  %v21694_v34 = vld [vmem:[#allocation94_spill] sm:$0xff]  ;;  %v21695_v23 = vld [vmem:[#allocation95_spill] sm:$0xff] }
 0x248   :  { %14513 = vmatprep.subr.bf16.mxu0 %v21685_v9  ;;  %14705 = vmatprep.subr.bf16.mxu1 %v21686_v40  ;;  %v21696_v9 = vld [vmem:[#allocation55_spill] sm:$0xff]  ;;  %v21697_v40 = vld [vmem:[#allocation96_spill] sm:$0xff] }
 0x24b   :  { %14515 = vmatpush1.bf16.msra.mxu0 %v21687_v12  ;;  %14707 = vmatpush1.bf16.msra.mxu1 %v21688_v29  ;;  %v21698_v12 = vld [vmem:[#allocation98_spill] sm:$0xff]  ;;  %v21699_v29 = vld [vmem:[#allocation100_spill] sm:$0xff] }
 0x24c   :  { %14517 = vmatprep.subr.bf16.mxu0 %v21689_v59  ;;  %14709 = vmatprep.subr.bf16.mxu1 %v21690_v61  ;;  %v21700_v59 = vld [vmem:[#allocation107_spill] sm:$0xff]  ;;  %v21701_v61 = vld [vmem:[#allocation97_spill] sm:$0xff] }
 0x24f   :  { %14519 = vmatpush1.bf16.msra.mxu0 %v21691_v30  ;;  %14711 = vmatpush1.bf16.msra.mxu1 %v21692_v18  ;;  %v21702_v30 = vld [vmem:[#allocation64_spill] sm:$0xff] }
 0x250   :  { %14521 = vmatprep.subr.bf16.mxu0 %v21693_v46  ;;  %14713 = vmatprep.subr.bf16.mxu1 %v21694_v34  ;;  %v21703_v34 = vld [vmem:[#allocation65_spill] sm:$0xff] }
 0x253   :  { %14523 = vmatpush1.bf16.msra.mxu0 %v21695_v23  ;;  %14715 = vmatpush1.bf16.msra.mxu1 %v21696_v9  ;;  %v21704_v23 = vld [vmem:[#allocation66_spill] sm:$0xff]  ;;  %v21705_v9 = vld [vmem:[#allocation99_spill] sm:$0xff] }
 0x254   :  { %14525 = vmatprep.subr.bf16.mxu0 %v21697_v40  ;;  %14717 = vmatprep.subr.bf16.mxu1 %v21698_v12  ;;  %v21706_v40 = vld [vmem:[#allocation101_spill] sm:$0xff]  ;;  %v21711_v12 = vld [vmem:[#allocation106_spill] sm:$0xff] }
 0x257   :  { %14527 = vmatpush1.bf16.msra.mxu0 %v21699_v29  ;;  %14719 = vmatpush1.bf16.msra.mxu1 %v21700_v59  ;;  %v21707_v59 = vld [vmem:[#allocation102_spill] sm:$0xff]  ;;  %v21710_v29 = vld [vmem:[#allocation105_spill] sm:$0xff] }
 0x258   :  { %14529 = vmatprep.subr.bf16.mxu0 %v21701_v61  ;;  %14721 = vmatprep.subr.bf16.mxu1 %v21702_v30  ;;  %v21708_v61 = vld [vmem:[#allocation103_spill] sm:$0xff]  ;;  %v21709_v30 = vld [vmem:[#allocation104_spill] sm:$0xff] }
 0x25a   :  { %2162 = vmatmul.mubr.f32.vlgmr.msra.gmra.mrb[2].mxu0 %v19193_v52  ;;  %3017 = vmatmul.mubr.f32.vlgmr.msra.gmra.mrb[2].mxu1 %v19193_v52 }
 0x25b   :  { %14531 = vmatpush1.bf16.msra.mxu0 %v21703_v34  ;;  %14723 = vmatpush1.bf16.msra.mxu1 %v21704_v23  ;;  %v21712_v23 = vld [vmem:[#allocation109_spill] sm:$0xff] }
 0x25c   :  { %14533 = vmatprep.subr.bf16.mxu0 %v21705_v9  ;;  %14725 = vmatprep.subr.bf16.mxu1 %v21706_v40  ;;  %v21713_v40 = vld [vmem:[#allocation112_spill] sm:$0xff] }
 0x25d   :  { %2296 = vmatprep.mubr.f32.mxu0 %v21338_v6  ;;  %3151 = vmatprep.mubr.f32.mxu1 %v21338_v6 }
 0x25f   :  { %14535 = vmatpush1.bf16.msra.mxu0 %v21707_v59  ;;  %14727 = vmatpush1.bf16.msra.mxu1 %v21708_v61  ;;  %v21714_v59 = vld [vmem:[#allocation124_spill] sm:$0xff]  ;;  %v21715_v61 = vld [vmem:[#allocation125_spill] sm:$0xff] }
 0x260   :  { %14537 = vmatprep.subr.bf16.mxu0 %v21709_v30  ;;  %14729 = vmatprep.subr.bf16.mxu1 %v21710_v29  ;;  %v21716_v30 = vld [vmem:[#allocation127_spill] sm:$0xff]  ;;  %v21717_v29 = vld [vmem:[#allocation126_spill] sm:$0xff] }
 0x263   :  { %14539 = vmatpush1.bf16.msra.mxu0 %v21711_v12  ;;  %14731 = vmatpush1.bf16.msra.mxu1 %v18743_v53  ;;  %v21718_v12 = vld [vmem:[#allocation128_spill] sm:$0xff]  ;;  %v21719_v53 = vld [vmem:[#allocation129_spill] sm:$0xff] }
 0x264   :  { %14541 = vmatprep.subr.bf16.mxu0 %v21712_v23  ;;  %14733 = vmatprep.subr.bf16.mxu1 %v18751_v44  ;;  %v21720_v23 = vld [vmem:[#allocation131_spill] sm:$0xff]  ;;  %v21721_v44 = vld [vmem:[#allocation130_spill] sm:$0xff] }
 0x267   :  { %14543 = vmatpush1.bf16.msra.mxu0 %v18757_v0  ;;  %14735 = vmatpush1.bf16.msra.mxu1 %v18903_v37  ;;  %v21722_v0 = vld [vmem:[#allocation132_spill] sm:$0xff]  ;;  %v21723_v37 = vld [vmem:[#allocation133_spill] sm:$0xff] }
 0x268   :  { %14545 = vmatprep.subr.bf16.mxu0 %v21713_v40  ;;  %14737 = vmatprep.subr.bf16.mxu1 %v21714_v59  ;;  %v21724_v40 = vld [vmem:[#allocation135_spill] sm:$0xff]  ;;  %v21725_v59 = vld [vmem:[#allocation134_spill] sm:$0xff] }
 0x26b   :  { %14547 = vmatpush1.bf16.msra.mxu0 %v21715_v61  ;;  %14739 = vmatpush1.bf16.msra.mxu1 %v21716_v30  ;;  %v21726_v61 = vld [vmem:[#allocation136_spill] sm:$0xff]  ;;  %v21727_v30 = vld [vmem:[#allocation137_spill] sm:$0xff] }
 0x26c   :  { %14549 = vmatprep.subr.bf16.mxu0 %v21717_v29  ;;  %14741 = vmatprep.subr.bf16.mxu1 %v21718_v12  ;;  %v21728_v29 = vld [vmem:[#allocation138_spill] sm:$0xff] }
 0x26f   :  { %14551 = vmatpush1.bf16.msra.mxu0 %v21719_v53  ;;  %14743 = vmatpush1.bf16.msra.mxu1 %v21720_v23 }
 0x270   :  { %14553 = vmatprep.subr.bf16.mxu0 %v21721_v44  ;;  %14745 = vmatprep.subr.bf16.mxu1 %v21722_v0 }
 0x273   :  { %14555 = vmatpush1.bf16.msra.mxu0 %v21723_v37  ;;  %14747 = vmatpush1.bf16.msra.mxu1 %v21724_v40 }
 0x274   :  { %14557 = vmatprep.subr.bf16.mxu0 %v21725_v59  ;;  %14749 = vmatprep.subr.bf16.mxu1 %v21726_v61 }
 0x277   :  { %14559 = vmatpush1.bf16.msra.mxu0 %v21727_v30  ;;  %14751 = vmatpush1.bf16.msra.mxu1 %v21728_v29  ;;  %v21737_v29 = vld [vmem:[#allocation85_spill] sm:$0xff] }
 0x278   :  { %14561 = vmatprep.subr.bf16.mxu0 %v21593_v45  ;;  %14753 = vmatprep.subr.bf16.mxu1 %v21594_v32 }
 0x27a   :  { %2299 = vmatmul.mubr.f32.vlgmr.msra.gmra.mrb[2].mxu0 %v19196_v22  ;;  %3154 = vmatmul.mubr.f32.vlgmr.msra.gmra.mrb[2].mxu1 %v19196_v22  ;;  %v21729_v22 = vld [vmem:[#allocation113_spill] sm:$0xff] }
 0x27b   :  { %14563 = vmatpush1.bf16.msra.mxu0 %v21595_v3  ;;  %14755 = vmatpush1.bf16.msra.mxu1 %v21597_v33 }
 0x27c   :  { %14565 = vmatprep.subr.bf16.mxu0 %v21596_v56  ;;  %14757 = vmatprep.subr.bf16.mxu1 %v21598_v7 }
 0x27d   :  { %2401 = vmatprep.mubr.f32.mxu0 %v21338_v6  ;;  %3256 = vmatprep.mubr.f32.mxu1 %v21338_v6 }
 0x27f   :  { %14567 = vmatpush1.bf16.msra.mxu0 %v21599_v20  ;;  %14759 = vmatpush1.bf16.msra.mxu1 %v21601_v39 }
 0x280   :  { %14569 = vmatprep.subr.bf16.mxu0 %v21600_v28  ;;  %14761 = vmatprep.subr.bf16.mxu1 %v21602_v62 }
 0x283   :  { %14571 = vmatpush1.bf16.msra.mxu0 %v21603_v55  ;;  %14763 = vmatpush1.bf16.msra.mxu1 %v21605_v43 }
 0x284   :  { %14573 = vmatprep.subr.bf16.mxu0 %v21604_v24  ;;  %14765 = vmatprep.subr.bf16.mxu1 %v21606_v19 }
 0x287   :  { %14575 = vmatpush1.bf16.msra.mxu0 %v21607_v10  ;;  %14767 = vmatpush1.bf16.msra.mxu1 %v21609_v49 }
 0x288   :  { %14577 = vmatprep.subr.bf16.mxu0 %v21608_v48  ;;  %14769 = vmatprep.subr.bf16.mxu1 %v21610_v2 }
 0x28b   :  { %14579 = vmatpush1.bf16.msra.mxu0 %v21611_v8  ;;  %14771 = vmatpush1.bf16.msra.mxu1 %v21613_v41 }
 0x28c   :  { %14581 = vmatprep.subr.bf16.mxu0 %v21612_v4  ;;  %14773 = vmatprep.subr.bf16.mxu1 %v21614_v13 }
 0x28f   :  { %14583 = vmatpush1.bf16.msra.mxu0 %v21615_v27  ;;  %14775 = vmatpush1.bf16.msra.mxu1 %v21617_v63 }
 0x290   :  { %14585 = vmatprep.subr.bf16.mxu0 %v21616_v26  ;;  %14777 = vmatprep.subr.bf16.mxu1 %v21618_v38 }
 0x293   :  { %14587 = vmatpush1.bf16.msra.mxu0 %v21619_v60  ;;  %14779 = vmatpush1.bf16.msra.mxu1 %v21624_v35 }
 0x294   :  { %14589 = vmatprep.subr.bf16.mxu0 %v21620_v17  ;;  %14781 = vmatprep.subr.bf16.mxu1 %v21625_v50 }
 0x297   :  { %14591 = vmatpush1.bf16.msra.mxu0 %v21629_v36  ;;  %14783 = vmatpush1.bf16.msra.mxu1 %v21636_v47 }
 0x298   :  { %14593 = vmatprep.subr.bf16.mxu0 %v19032_v11  ;;  %14785 = vmatprep.subr.bf16.mxu1 %v19040_v1  ;;  %v21730_v1 = vld [vmem:[#allocation114_spill] sm:$0xff]  ;;  %v21736_v11 = vld [vmem:[#allocation83_spill] sm:$0xff] }
 0x29a   :  { %2405 = vmatmul.mubr.f32.vlgmr.msra.gmra.mrb[2].mxu0 %v19199_v31  ;;  %3260 = vmatmul.mubr.f32.vlgmr.msra.gmra.mrb[2].mxu1 %v19199_v31  ;;  %v21731_v31 = vld [vmem:[#allocation115_spill] sm:$0xff] }
 0x29b   :  { %14595 = vmatpush1.bf16.msra.mxu0 %v19047_v14  ;;  %14787 = vmatpush1.bf16.msra.mxu1 %v19061_v21  ;;  %v21732_v14 = vld [vmem:[#allocation116_spill] sm:$0xff]  ;;  %v21733_v21 = vld [vmem:[#allocation117_spill] sm:$0xff] }
 0x29c   :  { %14597 = vmatprep.subr.bf16.mxu0 %v19054_v42  ;;  %14789 = vmatprep.subr.bf16.mxu1 %v19069_v57  ;;  %v21734_v42 = vld [vmem:[#allocation118_spill] sm:$0xff]  ;;  %v21735_v57 = vld [vmem:[#allocation119_spill] sm:$0xff] }
 0x29d   :  { %2571 = vmatprep.mubr.f32.mxu0 %v21338_v6  ;;  %3426 = vmatprep.mubr.f32.mxu1 %v21338_v6 }
 0x29f   :  { %14599 = vmatpush1.bf16.msra.mxu0 %v19076_v54  ;;  %14791 = vmatpush1.bf16.msra.mxu1 %v19086_v16  ;;  %v21738_v54 = vld [vmem:[#allocation26_spill] sm:$0xff]  ;;  %v21739_v16 = vld [vmem:[#allocation27_spill] sm:$0xff] }
 0x2a0   :  { %14601 = vmatprep.subr.bf16.mxu0 %v21729_v22  ;;  %14793 = vmatprep.subr.bf16.mxu1 %v21730_v1  ;;  %v21740_v22 = vld [vmem:[#allocation29_spill] sm:$0xff]  ;;  %v21741_v1 = vld [vmem:[#allocation31_spill] sm:$0xff] }
 0x2a3   :  { %14603 = vmatpush1.bf16.msra.mxu0 %v21731_v31  ;;  %14795 = vmatpush1.bf16.msra.mxu1 %v21732_v14  ;;  %v21742_v31 = vld [vmem:[#allocation34_spill] sm:$0xff]  ;;  %v21743_v14 = vld [vmem:[#allocation35_spill] sm:$0xff] }
 0x2a4   :  { %14605 = vmatprep.subr.bf16.mxu0 %v21733_v21  ;;  %14797 = vmatprep.subr.bf16.mxu1 %v21734_v42  ;;  %v21744_v21 = vld [vmem:[#allocation36_spill] sm:$0xff]  ;;  %v21745_v42 = vld [vmem:[#allocation38_spill] sm:$0xff] }
 0x2a7   :  { %14607 = vmatpush1.bf16.msra.mxu0 %v21735_v57  ;;  %14799 = vmatpush1.bf16.msra.mxu1 %v21736_v11  ;;  %v21746_v57 = vld [vmem:[#allocation39_spill] sm:$0xff]  ;;  %v21747_v11 = vld [vmem:[#allocation40_spill] sm:$0xff] }
 0x2a8   :  { %14609 = vmatprep.subr.bf16.mxu0 %v21737_v29  ;;  %14801 = vmatprep.subr.bf16.mxu1 %v21738_v54  ;;  %v21748_v29 = vld [vmem:[#allocation42_spill] sm:$0xff]  ;;  %v21749_v54 = vld [vmem:[#allocation92_spill] sm:$0xff] }
 0x2ab   :  { %14611 = vmatpush1.bf16.msra.mxu0 %v21739_v16  ;;  %14803 = vmatpush1.bf16.msra.mxu1 %v21740_v22  ;;  %v21750_v16 = vld [vmem:[#allocation120_spill] sm:$0xff]  ;;  %v21751_v22 = vld [vmem:[#allocation122_spill] sm:$0xff] }
 0x2ac   :  { %14613 = vmatprep.subr.bf16.mxu0 %v21741_v1  ;;  %14805 = vmatprep.subr.bf16.mxu1 %v21742_v31  ;;  %v21752_v1 = vld [vmem:[#allocation123_spill] sm:$0xff] }
 0x2af   :  { %14615 = vmatpush1.bf16.msra.mxu0 %v21743_v14  ;;  %14807 = vmatpush1.bf16.msra.mxu1 %v21744_v21 }
 0x2b0   :  { %14617 = vmatprep.subr.bf16.mxu0 %v21745_v42  ;;  %14809 = vmatprep.subr.bf16.mxu1 %v21746_v57 }
 0x2b3   :  { %14619 = vmatpush1.bf16.msra.mxu0 %v21747_v11  ;;  %14811 = vmatpush1.bf16.msra.mxu1 %v21748_v29 }
 0x2b4   :  { %14621 = vmatprep.subr.bf16.mxu0 %v21749_v54  ;;  %14813 = vmatprep.subr.bf16.mxu1 %v21750_v16  ;;  %v1825_v16 = vld [vmem:[#allocation2 + $0x28] sm:$0xff] }
 0x2b7   :  { %14623 = vmatpush1.bf16.msra.mxu0 %v21751_v22  ;;  %14815 = vmatpush1.bf16.msra.mxu1 %v21752_v1  ;;  %v21754_v1 = vld [vmem:[#allocation68_spill] sm:$0xff] }
 0x2b8   :  { %14625 = vmatprep.subr.bf16.mxu0 %v21593_v45  ;;  %14817 = vmatprep.subr.bf16.mxu1 %v21594_v32  ;;  %v1824_v22 = vld [vmem:[#allocation2 + $0x20] sm:$0xff] }
 0x2ba   :  { %2573 = vmatmul.mubr.f32.vlgmr.msra.gmra.mrb[2].mxu0 %v19193_v52  ;;  %3428 = vmatmul.mubr.f32.vlgmr.msra.gmra.mrb[2].mxu1 %v19193_v52 }
 0x2bb   :  { %14627 = vmatpush1.bf16.msra.mxu0 %v21595_v3  ;;  %14819 = vmatpush1.bf16.msra.mxu1 %v21597_v33 }
 0x2bc   :  { %14629 = vmatprep.subr.bf16.mxu0 %v21596_v56  ;;  %14821 = vmatprep.subr.bf16.mxu1 %v21598_v7 }
 0x2bd   :  { %2675 = vmatprep.mubr.f32.mxu0 %v21338_v6  ;;  %3530 = vmatprep.mubr.f32.mxu1 %v21338_v6 }
 0x2bf   :  { %14631 = vmatpush1.bf16.msra.mxu0 %v21599_v20  ;;  %14823 = vmatpush1.bf16.msra.mxu1 %v21601_v39 }
 0x2c0   :  { %14633 = vmatprep.subr.bf16.mxu0 %v21600_v28  ;;  %14825 = vmatprep.subr.bf16.mxu1 %v21602_v62 }
 0x2c3   :  { %14635 = vmatpush1.bf16.msra.mxu0 %v21603_v55  ;;  %14827 = vmatpush1.bf16.msra.mxu1 %v21605_v43 }
 0x2c4   :  { %14637 = vmatprep.subr.bf16.mxu0 %v21604_v24  ;;  %14829 = vmatprep.subr.bf16.mxu1 %v21606_v19 }
 0x2c7   :  { %14639 = vmatpush1.bf16.msra.mxu0 %v21607_v10  ;;  %14831 = vmatpush1.bf16.msra.mxu1 %v21609_v49 }
 0x2c8   :  { %14641 = vmatprep.subr.bf16.mxu0 %v21608_v48  ;;  %14833 = vmatprep.subr.bf16.mxu1 %v21610_v2 }
 0x2cb   :  { %14643 = vmatpush1.bf16.msra.mxu0 %v21611_v8  ;;  %14835 = vmatpush1.bf16.msra.mxu1 %v21613_v41 }
 0x2cc   :  { %14645 = vmatprep.subr.bf16.mxu0 %v21612_v4  ;;  %14837 = vmatprep.subr.bf16.mxu1 %v21614_v13 }
 0x2cf   :  { %14647 = vmatpush1.bf16.msra.mxu0 %v21615_v27  ;;  %14839 = vmatpush1.bf16.msra.mxu1 %v21617_v63 }
 0x2d0   :  { %14649 = vmatprep.subr.bf16.mxu0 %v21616_v26  ;;  %14841 = vmatprep.subr.bf16.mxu1 %v21618_v38 }
 0x2d3   :  { %14651 = vmatpush1.bf16.msra.mxu0 %v21619_v60  ;;  %14843 = vmatpush1.bf16.msra.mxu1 %v21624_v35 }
 0x2d4   :  { %14653 = vmatprep.subr.bf16.mxu0 %v21620_v17  ;;  %14845 = vmatprep.subr.bf16.mxu1 %v21625_v50 }
 0x2d7   :  { %14655 = vmatpush1.bf16.msra.mxu0 %v21629_v36  ;;  %14847 = vmatpush1.bf16.msra.mxu1 %v21636_v47 }
 0x2d8   :  { %14849 = vmatprep.subr.bf16.mxu0 %v21593_v45  ;;  %15041 = vmatprep.subr.bf16.mxu1 %v21594_v32 }
 0x2da   :  { %2677 = vmatmul.mubr.f32.vlgmr.msra.gmra.mrb[2].mxu0 %v19193_v52  ;;  %3532 = vmatmul.mubr.f32.vlgmr.msra.gmra.mrb[2].mxu1 %v19193_v52  ;;  %v21753_v52 = vld [vmem:[#allocation67_spill] sm:$0xff] }
 0x2db   :  { %14851 = vmatpush1.bf16.msra.mxu0 %v21595_v3  ;;  %15043 = vmatpush1.bf16.msra.mxu1 %v21597_v33 }
 0x2dc   :  { %14853 = vmatprep.subr.bf16.mxu0 %v21596_v56  ;;  %15045 = vmatprep.subr.bf16.mxu1 %v21598_v7 }
 0x2dd   :  { %3667 = vmatprep.mubr.f32.mxu0 %v21338_v6  ;;  %4522 = vmatprep.mubr.f32.mxu1 %v21338_v6 }
 0x2df   :  { %14855 = vmatpush1.bf16.msra.mxu0 %v21599_v20  ;;  %15047 = vmatpush1.bf16.msra.mxu1 %v21601_v39 }
 0x2e0   :  { %14857 = vmatprep.subr.bf16.mxu0 %v21600_v28  ;;  %15049 = vmatprep.subr.bf16.mxu1 %v21602_v62 }
 0x2e3   :  { %14859 = vmatpush1.bf16.msra.mxu0 %v21603_v55  ;;  %15051 = vmatpush1.bf16.msra.mxu1 %v21605_v43 }
 0x2e4   :  { %14861 = vmatprep.subr.bf16.mxu0 %v21604_v24  ;;  %15053 = vmatprep.subr.bf16.mxu1 %v21606_v19 }
 0x2e7   :  { %14863 = vmatpush1.bf16.msra.mxu0 %v21607_v10  ;;  %15055 = vmatpush1.bf16.msra.mxu1 %v21609_v49 }
 0x2e8   :  { %14865 = vmatprep.subr.bf16.mxu0 %v21608_v48  ;;  %15057 = vmatprep.subr.bf16.mxu1 %v21610_v2 }
 0x2eb   :  { %14867 = vmatpush1.bf16.msra.mxu0 %v21611_v8  ;;  %15059 = vmatpush1.bf16.msra.mxu1 %v21613_v41 }
 0x2ec   :  { %14869 = vmatprep.subr.bf16.mxu0 %v21612_v4  ;;  %15061 = vmatprep.subr.bf16.mxu1 %v21614_v13 }
 0x2ef   :  { %14871 = vmatpush1.bf16.msra.mxu0 %v21615_v27  ;;  %15063 = vmatpush1.bf16.msra.mxu1 %v21617_v63 }
 0x2f0   :  { %14873 = vmatprep.subr.bf16.mxu0 %v21616_v26  ;;  %15065 = vmatprep.subr.bf16.mxu1 %v21618_v38 }
 0x2f3   :  { %14875 = vmatpush1.bf16.msra.mxu0 %v21619_v60  ;;  %15067 = vmatpush1.bf16.msra.mxu1 %v21624_v35 }
 0x2f4   :  { %14877 = vmatprep.subr.bf16.mxu0 %v21620_v17  ;;  %15069 = vmatprep.subr.bf16.mxu1 %v21625_v50  ;;  %v1827_v50 = vld [vmem:[#allocation2 + $0x38] sm:$0xff]  ;;  %v1826_v17 = vld [vmem:[#allocation2 + $0x30] sm:$0xff] }
 0x2f7   :  { %14879 = vmatpush1.bf16.msra.mxu0 %v21629_v36  ;;  %15071 = vmatpush1.bf16.msra.mxu1 %v21636_v47 }
 0x2f8   :  { %14881 = vmatprep.subr.bf16.mxu0 %v21753_v52  ;;  %15073 = vmatprep.subr.bf16.mxu1 %v21754_v1 }
 0x3ad   :  { %v2678_v54 = vpop.f32.mrb[2].mxu0  ;;  %v3533_v29 = vpop.f32.mrb[2].mxu1 }
 0x3ae   :  { %v3538_v11 = vadd.f32 %v2678_v54, %v1824_v22  ;;  %v2680_v57 = vpop.f32.mrb[3].mxu0  ;;  %v3535_v42 = vpop.f32.mrb[3].mxu1  ;;  %v3540_v35 = vadd.f32 %v3533_v29, %v1826_v17  ;;  %v21756_v29 = vld [vmem:[#allocation79_spill] sm:$0xff] }
 0x3af   :  { %v3539_v21 = vadd.f32 %v2680_v57, %v1825_v16  ;;  %v3541_v36 = vadd.f32 %v3535_v42, %v1827_v50 }
 0x3b0   :  { %v14059_v14 = vmul.f32 -1.442695, %v3538_v11 }
 0x3b1   :  { %v14060_v31 = vmul.f32 -1.442695, %v3539_v21  ;;  %v14061_v47 = vmul.f32 -1.442695, %v3541_v36 }
 0x3b2   :  { %17335 = vpow2.f32 %v14059_v14 }
 0x3b3   :  { %17337 = vpow2.f32 %v14060_v31  ;;  %v21757_v31 = vld [vmem:[#allocation80_spill] sm:$0xff] }
 0x3b4   :  { %17339 = vpow2.f32 %v14061_v47 }
 0x3b5   :  { %17341 = vtanh.f32 %v3540_v35 }
 0x3bc   :  { %v17336_v52 = vpop.eup %17335 }
 0x3bd   :  { %v17338_v60 = vpop.eup %17337  ;;  %v3545_v1 = vadd.f32 1.0, %v17336_v52  ;;  %v21758_v52 = vld [vmem:[#allocation81_spill] sm:$0xff] }
 0x3be   :  { %v3551_v38 = vadd.f32 1.0, %v17338_v60  ;;  %v17340_v54 = vpop.eup %17339 }
 0x3bf   :  { %17343 = vrcp.f32 %v3545_v1  ;;  %v17342_v22 = vpop.eup %17341  ;;  %v3558_v14 = vadd.f32 1.0, %v17340_v54  ;;  %v21759_v54 = vld [vmem:[#allocation82_spill] sm:$0xff] }
 0x3c0   :  { %17345 = vrcp.f32 %v3551_v38 }
 0x3c1   :  { %17347 = vrcp.f32 %v3558_v14  ;;  %v21764_v14 = vld [vmem:[#allocation30_spill] sm:$0xff] }
 0x3c9   :  { %v17344_v57 = vpop.eup %17343 }
 0x3ca   :  { %v17346_v11 = vpop.eup %17345  ;;  %v3562_v21 = vmul.f32 %v17344_v57, %v17342_v22  ;;  %v21760_v22 = vld [vmem:[#allocation84_spill] sm:$0xff]  ;;  %v21761_v57 = vld [vmem:[#allocation86_spill] sm:$0xff] }
 0x3cb   :  { %v3561_v16 = vmul.f32 %v17346_v11, %v19190_v15  ;;  %v17348_v36 = vpop.eup %17347  ;;  %v21755_v15 = vld [vmem:[#allocation78_spill] sm:$0xff]  ;;  %v21762_v11 = vld [vmem:[#allocation87_spill] sm:$0xff] }
 0x3cd   :  { %v19418_v50 = vadd.f32 %v3562_v21, %v3561_v16  ;;  %v21763_v21 = vld [vmem:[#allocation88_spill] sm:$0xff]  ;;  %v21765_v16 = vld [vmem:[#allocation89_spill] sm:$0xff] }
 0x3cf   :  { %17349 = vtanh.f32 %v19418_v50 }
 0x3d9   :  { %v17350_v17 = vpop.eup %17349 }
 0x3da   :  { %v3565_v42 = vmul.f32 %v17350_v17, %v17348_v36  ;;  %v21766_v36 = vld [vmem:[#allocation90_spill] sm:$0xff]  ;;  %v21767_v17 = vld [vmem:[#allocation91_spill] sm:$0xff] }
 0x3dc   :  { %v19421_v35 = vand.u32 4294901760, %v3565_v42 }
 0x3de   :  { %v19424_v1 = vsub.f32 %v3565_v42, %v19421_v35  ;;  %v21768_v42 = vld [vmem:[#allocation43_spill] sm:$0xff] }
 0x3e0   :  { %v19427_v60 = vand.u32 4294901760, %v19424_v1 }
 0x3e2   :  { %v3671_v38 = vsub.f32 %v19424_v1, %v19427_v60 }
 0x3e4   :  { %v3672_v47 = vand.u32 4294901760, %v3671_v38  ;;  %v21769_v38 = vld [vmem:[#allocation44_spill] sm:$0xff] }
 0x3e6   :  { %3673 = vmatmul.mubr.f32.vlgmr.msra.gmra.mrb[4].mxu0 %v3672_v47  ;;  %4528 = vmatmul.mubr.f32.vlgmr.msra.gmra.mrb[4].mxu1 %v3672_v47  ;;  %v21770_v47 = vld [vmem:[#allocation47_spill] sm:$0xff] }
 0x3e7   :  { %14883 = vmatpush1.bf16.msra.mxu0 %v21671_v51  ;;  %15075 = vmatpush1.bf16.msra.mxu1 %v21672_v25 }
 0x3e8   :  { %14885 = vmatprep.subr.bf16.mxu0 %v21673_v5  ;;  %15077 = vmatprep.subr.bf16.mxu1 %v21674_v58 }
 0x3e9   :  { %3903 = vmatprep.mubr.f32.mxu0 %v21338_v6  ;;  %4758 = vmatprep.mubr.f32.mxu1 %v21338_v6 }
 0x3eb   :  { %14887 = vmatpush1.bf16.msra.mxu0 %v21755_v15  ;;  %15079 = vmatpush1.bf16.msra.mxu1 %v21756_v29 }
 0x3ec   :  { %14889 = vmatprep.subr.bf16.mxu0 %v21757_v31  ;;  %15081 = vmatprep.subr.bf16.mxu1 %v21758_v52 }
 0x3ef   :  { %14891 = vmatpush1.bf16.msra.mxu0 %v21759_v54  ;;  %15083 = vmatpush1.bf16.msra.mxu1 %v21760_v22  ;;  %v21771_v22 = vld [vmem:[#allocation49_spill] sm:$0xff] }
 0x3f0   :  { %14893 = vmatprep.subr.bf16.mxu0 %v21761_v57  ;;  %15085 = vmatprep.subr.bf16.mxu1 %v21762_v11 }
 0x3f3   :  { %14895 = vmatpush1.bf16.msra.mxu0 %v21763_v21  ;;  %15087 = vmatpush1.bf16.msra.mxu1 %v21764_v14  ;;  %v21772_v21 = vld [vmem:[#allocation94_spill] sm:$0xff]  ;;  %v21773_v14 = vld [vmem:[#allocation95_spill] sm:$0xff] }
 0x3f4   :  { %14897 = vmatprep.subr.bf16.mxu0 %v21765_v16  ;;  %15089 = vmatprep.subr.bf16.mxu1 %v21766_v36  ;;  %v21774_v16 = vld [vmem:[#allocation55_spill] sm:$0xff]  ;;  %v21775_v36 = vld [vmem:[#allocation96_spill] sm:$0xff] }
 0x3f7   :  { %14899 = vmatpush1.bf16.msra.mxu0 %v21767_v17  ;;  %15091 = vmatpush1.bf16.msra.mxu1 %v21768_v42  ;;  %v21776_v17 = vld [vmem:[#allocation98_spill] sm:$0xff]  ;;  %v21777_v42 = vld [vmem:[#allocation100_spill] sm:$0xff] }
 0x3f8   :  { %14901 = vmatprep.subr.bf16.mxu0 %v21769_v38  ;;  %15093 = vmatprep.subr.bf16.mxu1 %v21770_v47  ;;  %v21778_v38 = vld [vmem:[#allocation107_spill] sm:$0xff]  ;;  %v21779_v47 = vld [vmem:[#allocation97_spill] sm:$0xff] }
 0x3fb   :  { %14903 = vmatpush1.bf16.msra.mxu0 %v21771_v22  ;;  %15095 = vmatpush1.bf16.msra.mxu1 %v21692_v18  ;;  %v21780_v22 = vld [vmem:[#allocation64_spill] sm:$0xff] }
 0x3fc   :  { %14905 = vmatprep.subr.bf16.mxu0 %v21693_v46  ;;  %15097 = vmatprep.subr.bf16.mxu1 %v21772_v21  ;;  %v21793_v21 = vld [vmem:[#allocation112_spill] sm:$0xff] }
 0x3ff   :  { %14907 = vmatpush1.bf16.msra.mxu0 %v21773_v14  ;;  %15099 = vmatpush1.bf16.msra.mxu1 %v21774_v16  ;;  %v21781_v14 = vld [vmem:[#allocation66_spill] sm:$0xff]  ;;  %v21792_v16 = vld [vmem:[#allocation121_spill] sm:$0xff] }
 0x400   :  { %14909 = vmatprep.subr.bf16.mxu0 %v21775_v36  ;;  %15101 = vmatprep.subr.bf16.mxu1 %v21776_v17  ;;  %v21782_v36 = vld [vmem:[#allocation101_spill] sm:$0xff]  ;;  %v21787_v17 = vld [vmem:[#allocation106_spill] sm:$0xff] }
 0x403   :  { %14911 = vmatpush1.bf16.msra.mxu0 %v21777_v42  ;;  %15103 = vmatpush1.bf16.msra.mxu1 %v21778_v38  ;;  %v21783_v38 = vld [vmem:[#allocation102_spill] sm:$0xff]  ;;  %v21786_v42 = vld [vmem:[#allocation105_spill] sm:$0xff] }
 0x404   :  { %14913 = vmatprep.subr.bf16.mxu0 %v21779_v47  ;;  %15105 = vmatprep.subr.bf16.mxu1 %v21780_v22  ;;  %v21784_v47 = vld [vmem:[#allocation103_spill] sm:$0xff]  ;;  %v21785_v22 = vld [vmem:[#allocation104_spill] sm:$0xff] }
 0x406   :  { %3905 = vmatmul.mubr.f32.vlgmr.msra.gmra.mrb[4].mxu0 %v19421_v35  ;;  %4760 = vmatmul.mubr.f32.vlgmr.msra.gmra.mrb[4].mxu1 %v19421_v35 }
 0x407   :  { %14915 = vmatpush1.bf16.msra.mxu0 %v21703_v34  ;;  %15107 = vmatpush1.bf16.msra.mxu1 %v21781_v14  ;;  %v21788_v34 = vld [vmem:[#allocation108_spill] sm:$0xff]  ;;  %v21789_v14 = vld [vmem:[#allocation109_spill] sm:$0xff] }
 0x408   :  { %14917 = vmatprep.subr.bf16.mxu0 %v21705_v9  ;;  %15109 = vmatprep.subr.bf16.mxu1 %v21782_v36  ;;  %v21790_v9 = vld [vmem:[#allocation110_spill] sm:$0xff]  ;;  %v21791_v36 = vld [vmem:[#allocation111_spill] sm:$0xff] }
 0x409   :  { %4039 = vmatprep.mubr.f32.mxu0 %v21338_v6  ;;  %4894 = vmatprep.mubr.f32.mxu1 %v21338_v6 }
 0x40b   :  { %14919 = vmatpush1.bf16.msra.mxu0 %v21783_v38  ;;  %15111 = vmatpush1.bf16.msra.mxu1 %v21784_v47  ;;  %v21794_v38 = vld [vmem:[#allocation124_spill] sm:$0xff]  ;;  %v21795_v47 = vld [vmem:[#allocation125_spill] sm:$0xff] }
 0x40c   :  { %14921 = vmatprep.subr.bf16.mxu0 %v21785_v22  ;;  %15113 = vmatprep.subr.bf16.mxu1 %v21786_v42  ;;  %v21796_v22 = vld [vmem:[#allocation127_spill] sm:$0xff]  ;;  %v21797_v42 = vld [vmem:[#allocation126_spill] sm:$0xff] }
 0x40f   :  { %14923 = vmatpush1.bf16.msra.mxu0 %v21787_v17  ;;  %15115 = vmatpush1.bf16.msra.mxu1 %v21788_v34 }
 0x410   :  { %14925 = vmatprep.subr.bf16.mxu0 %v21789_v14  ;;  %15117 = vmatprep.subr.bf16.mxu1 %v21790_v9 }
 0x413   :  { %14927 = vmatpush1.bf16.msra.mxu0 %v21791_v36  ;;  %15119 = vmatpush1.bf16.msra.mxu1 %v21792_v16  ;;  %v21822_v16 = vld [vmem:[#allocation85_spill] sm:$0xff] }
 0x414   :  { %14929 = vmatprep.subr.bf16.mxu0 %v21793_v21  ;;  %15121 = vmatprep.subr.bf16.mxu1 %v21794_v38  ;;  %v21815_v38 = vld [vmem:[#allocation114_spill] sm:$0xff]  ;;  %v21821_v21 = vld [vmem:[#allocation83_spill] sm:$0xff] }
 0x417   :  { %14931 = vmatpush1.bf16.msra.mxu0 %v21795_v47  ;;  %15123 = vmatpush1.bf16.msra.mxu1 %v21796_v22  ;;  %v21811_v22 = vld [vmem:[#allocation19_spill] sm:$0xff]  ;;  %v21812_v47 = vld [vmem:[#allocation20_spill] sm:$0xff] }
 0x418   :  { %14933 = vmatprep.subr.bf16.mxu0 %v21797_v42  ;;  %15125 = vmatprep.subr.bf16.mxu1 %v21718_v12  ;;  %v21798_v42 = vld [vmem:[#allocation138_spill] sm:$0xff] }
 0x419   :  { %v21810_v12 = vld [vmem:[#allocation18_spill] sm:$0xff] }
 0x41b   :  { %14935 = vmatpush1.bf16.msra.mxu0 %v21719_v53  ;;  %15127 = vmatpush1.bf16.msra.mxu1 %v21720_v23  ;;  %v21808_v23 = vld [vmem:[#allocation16_spill] sm:$0xff]  ;;  %v21809_v53 = vld [vmem:[#allocation17_spill] sm:$0xff] }
 0x41c   :  { %14937 = vmatprep.subr.bf16.mxu0 %v21721_v44  ;;  %15129 = vmatprep.subr.bf16.mxu1 %v21722_v0  ;;  %v21806_v0 = vld [vmem:[#allocation14_spill] sm:$0xff]  ;;  %v21807_v44 = vld [vmem:[#allocation15_spill] sm:$0xff] }
 0x41f   :  { %14939 = vmatpush1.bf16.msra.mxu0 %v21723_v37  ;;  %15131 = vmatpush1.bf16.msra.mxu1 %v21724_v40  ;;  %v21804_v40 = vld [vmem:[#allocation62_spill] sm:$0xff]  ;;  %v21805_v37 = vld [vmem:[#allocation63_spill] sm:$0xff] }
 0x420   :  { %14941 = vmatprep.subr.bf16.mxu0 %v21725_v59  ;;  %15133 = vmatprep.subr.bf16.mxu1 %v21726_v61  ;;  %v21802_v61 = vld [vmem:[#allocation60_spill] sm:$0xff]  ;;  %v21803_v59 = vld [vmem:[#allocation61_spill] sm:$0xff] }
 0x423   :  { %14943 = vmatpush1.bf16.msra.mxu0 %v21727_v30  ;;  %15135 = vmatpush1.bf16.msra.mxu1 %v21798_v42  ;;  %v21800_v42 = vld [vmem:[#allocation58_spill] sm:$0xff]  ;;  %v21801_v30 = vld [vmem:[#allocation59_spill] sm:$0xff] }
 0x424   :  { %14945 = vmatprep.subr.bf16.mxu0 %v21593_v45  ;;  %15137 = vmatprep.subr.bf16.mxu1 %v21594_v32 }
 0x426   :  { %4042 = vmatmul.mubr.f32.vlgmr.msra.gmra.mrb[4].mxu0 %v19424_v1  ;;  %4897 = vmatmul.mubr.f32.vlgmr.msra.gmra.mrb[4].mxu1 %v19424_v1  ;;  %v21799_v1 = vld [vmem:[#allocation57_spill] sm:$0xff] }
 0x427   :  { %14947 = vmatpush1.bf16.msra.mxu0 %v21595_v3  ;;  %15139 = vmatpush1.bf16.msra.mxu1 %v21597_v33 }
 0x428   :  { %14949 = vmatprep.subr.bf16.mxu0 %v21596_v56  ;;  %15141 = vmatprep.subr.bf16.mxu1 %v21598_v7 }
 0x429   :  { %4144 = vmatprep.mubr.f32.mxu0 %v21338_v6  ;;  %4999 = vmatprep.mubr.f32.mxu1 %v21338_v6 }
 0x42b   :  { %14951 = vmatpush1.bf16.msra.mxu0 %v21599_v20  ;;  %15143 = vmatpush1.bf16.msra.mxu1 %v21601_v39 }
 0x42c   :  { %14953 = vmatprep.subr.bf16.mxu0 %v21600_v28  ;;  %15145 = vmatprep.subr.bf16.mxu1 %v21602_v62 }
 0x42f   :  { %14955 = vmatpush1.bf16.msra.mxu0 %v21603_v55  ;;  %15147 = vmatpush1.bf16.msra.mxu1 %v21605_v43 }
 0x430   :  { %14957 = vmatprep.subr.bf16.mxu0 %v21604_v24  ;;  %15149 = vmatprep.subr.bf16.mxu1 %v21606_v19 }
 0x433   :  { %14959 = vmatpush1.bf16.msra.mxu0 %v21607_v10  ;;  %15151 = vmatpush1.bf16.msra.mxu1 %v21609_v49 }
 0x434   :  { %14961 = vmatprep.subr.bf16.mxu0 %v21608_v48  ;;  %15153 = vmatprep.subr.bf16.mxu1 %v21610_v2 }
 0x437   :  { %14963 = vmatpush1.bf16.msra.mxu0 %v21611_v8  ;;  %15155 = vmatpush1.bf16.msra.mxu1 %v21613_v41 }
 0x438   :  { %14965 = vmatprep.subr.bf16.mxu0 %v21612_v4  ;;  %15157 = vmatprep.subr.bf16.mxu1 %v21614_v13 }
 0x43b   :  { %14967 = vmatpush1.bf16.msra.mxu0 %v21615_v27  ;;  %15159 = vmatpush1.bf16.msra.mxu1 %v21617_v63 }
 0x43c   :  { %14969 = vmatprep.subr.bf16.mxu0 %v21616_v26  ;;  %15161 = vmatprep.subr.bf16.mxu1 %v21799_v1 }
 0x43f   :  { %14971 = vmatpush1.bf16.msra.mxu0 %v21800_v42  ;;  %15163 = vmatpush1.bf16.msra.mxu1 %v21801_v30 }
 0x440   :  { %14973 = vmatprep.subr.bf16.mxu0 %v21802_v61  ;;  %15165 = vmatprep.subr.bf16.mxu1 %v21803_v59 }
 0x443   :  { %14975 = vmatpush1.bf16.msra.mxu0 %v21804_v40  ;;  %15167 = vmatpush1.bf16.msra.mxu1 %v21805_v37 }
 0x444   :  { %14977 = vmatprep.subr.bf16.mxu0 %v21806_v0  ;;  %15169 = vmatprep.subr.bf16.mxu1 %v21807_v44  ;;  %v21813_v0 = vld [vmem:[#allocation22_spill] sm:$0xff]  ;;  %v21814_v44 = vld [vmem:[#allocation113_spill] sm:$0xff] }
 0x446   :  { %4148 = vmatmul.mubr.f32.vlgmr.msra.gmra.mrb[4].mxu0 %v19427_v60  ;;  %5003 = vmatmul.mubr.f32.vlgmr.msra.gmra.mrb[4].mxu1 %v19427_v60  ;;  %v21816_v60 = vld [vmem:[#allocation115_spill] sm:$0xff] }
 0x447   :  { %14979 = vmatpush1.bf16.msra.mxu0 %v21808_v23  ;;  %15171 = vmatpush1.bf16.msra.mxu1 %v21809_v53  ;;  %v21817_v23 = vld [vmem:[#allocation116_spill] sm:$0xff]  ;;  %v21818_v53 = vld [vmem:[#allocation117_spill] sm:$0xff] }
 0x448   :  { %14981 = vmatprep.subr.bf16.mxu0 %v21810_v12  ;;  %15173 = vmatprep.subr.bf16.mxu1 %v21811_v22  ;;  %v21819_v12 = vld [vmem:[#allocation118_spill] sm:$0xff]  ;;  %v21820_v22 = vld [vmem:[#allocation119_spill] sm:$0xff] }
 0x449   :  { %4314 = vmatprep.mubr.f32.mxu0 %v21338_v6  ;;  %5169 = vmatprep.mubr.f32.mxu1 %v21338_v6 }
 0x44b   :  { %14983 = vmatpush1.bf16.msra.mxu0 %v21812_v47  ;;  %15175 = vmatpush1.bf16.msra.mxu1 %v21813_v0  ;;  %v21823_v47 = vld [vmem:[#allocation26_spill] sm:$0xff]  ;;  %v21824_v0 = vld [vmem:[#allocation27_spill] sm:$0xff] }
 0x44c   :  { %14985 = vmatprep.subr.bf16.mxu0 %v21814_v44  ;;  %15177 = vmatprep.subr.bf16.mxu1 %v21815_v38  ;;  %v21825_v44 = vld [vmem:[#allocation29_spill] sm:$0xff]  ;;  %v21826_v38 = vld [vmem:[#allocation31_spill] sm:$0xff] }
 0x44f   :  { %14987 = vmatpush1.bf16.msra.mxu0 %v21816_v60  ;;  %15179 = vmatpush1.bf16.msra.mxu1 %v21817_v23  ;;  %v21827_v60 = vld [vmem:[#allocation34_spill] sm:$0xff]  ;;  %v21828_v23 = vld [vmem:[#allocation35_spill] sm:$0xff] }
 0x450   :  { %14989 = vmatprep.subr.bf16.mxu0 %v21818_v53  ;;  %15181 = vmatprep.subr.bf16.mxu1 %v21819_v12  ;;  %v21829_v53 = vld [vmem:[#allocation36_spill] sm:$0xff]  ;;  %v21830_v12 = vld [vmem:[#allocation38_spill] sm:$0xff] }
 0x453   :  { %14991 = vmatpush1.bf16.msra.mxu0 %v21820_v22  ;;  %15183 = vmatpush1.bf16.msra.mxu1 %v21821_v21  ;;  %v21831_v22 = vld [vmem:[#allocation39_spill] sm:$0xff]  ;;  %v21832_v21 = vld [vmem:[#allocation40_spill] sm:$0xff] }
 0x454   :  { %14993 = vmatprep.subr.bf16.mxu0 %v21822_v16  ;;  %15185 = vmatprep.subr.bf16.mxu1 %v21823_v47  ;;  %v21833_v16 = vld [vmem:[#allocation42_spill] sm:$0xff]  ;;  %v21834_v47 = vld [vmem:[#allocation92_spill] sm:$0xff] }
 0x457   :  { %14995 = vmatpush1.bf16.msra.mxu0 %v21824_v0  ;;  %15187 = vmatpush1.bf16.msra.mxu1 %v21825_v44  ;;  %v21835_v0 = vld [vmem:[#allocation120_spill] sm:$0xff]  ;;  %v21836_v44 = vld [vmem:[#allocation122_spill] sm:$0xff] }
 0x458   :  { %14997 = vmatprep.subr.bf16.mxu0 %v21826_v38  ;;  %15189 = vmatprep.subr.bf16.mxu1 %v21827_v60  ;;  %v21837_v38 = vld [vmem:[#allocation123_spill] sm:$0xff] }
 0x45b   :  { %14999 = vmatpush1.bf16.msra.mxu0 %v21828_v23  ;;  %15191 = vmatpush1.bf16.msra.mxu1 %v21829_v53 }
 0x45c   :  { %15001 = vmatprep.subr.bf16.mxu0 %v21830_v12  ;;  %15193 = vmatprep.subr.bf16.mxu1 %v21831_v22 }
 0x45f   :  { %15003 = vmatpush1.bf16.msra.mxu0 %v21832_v21  ;;  %15195 = vmatpush1.bf16.msra.mxu1 %v21833_v16 }
 0x460   :  { %15005 = vmatprep.subr.bf16.mxu0 %v21834_v47  ;;  %15197 = vmatprep.subr.bf16.mxu1 %v21835_v0  ;;  %v3568_v0 = vld [vmem:[#allocation2 + $0x48] sm:$0xff] }
 0x463   :  { %15007 = vmatpush1.bf16.msra.mxu0 %v21836_v44  ;;  %15199 = vmatpush1.bf16.msra.mxu1 %v21837_v38  ;;  %v21839_v38 = vld [vmem:[#allocation68_spill] sm:$0xff] }
 0x464   :  { %15009 = vmatprep.subr.bf16.mxu0 %v21593_v45  ;;  %15201 = vmatprep.subr.bf16.mxu1 %v21594_v32  ;;  %v3567_v44 = vld [vmem:[#allocation2 + $0x40] sm:$0xff] }
 0x466   :  { %4316 = vmatmul.mubr.f32.vlgmr.msra.gmra.mrb[4].mxu0 %v19421_v35  ;;  %5171 = vmatmul.mubr.f32.vlgmr.msra.gmra.mrb[4].mxu1 %v19421_v35 }
 0x467   :  { %15011 = vmatpush1.bf16.msra.mxu0 %v21595_v3  ;;  %15203 = vmatpush1.bf16.msra.mxu1 %v21597_v33 }
 0x468   :  { %15013 = vmatprep.subr.bf16.mxu0 %v21596_v56  ;;  %15205 = vmatprep.subr.bf16.mxu1 %v21598_v7 }
 0x469   :  { %4418 = vmatprep.mubr.f32.mxu0 %v21338_v6  ;;  %5273 = vmatprep.mubr.f32.mxu1 %v21338_v6 }
 0x46b   :  { %15015 = vmatpush1.bf16.msra.mxu0 %v21599_v20  ;;  %15207 = vmatpush1.bf16.msra.mxu1 %v21601_v39 }
 0x46c   :  { %15017 = vmatprep.subr.bf16.mxu0 %v21600_v28  ;;  %15209 = vmatprep.subr.bf16.mxu1 %v21602_v62 }
 0x46f   :  { %15019 = vmatpush1.bf16.msra.mxu0 %v21603_v55  ;;  %15211 = vmatpush1.bf16.msra.mxu1 %v21605_v43 }
 0x470   :  { %15021 = vmatprep.subr.bf16.mxu0 %v21604_v24  ;;  %15213 = vmatprep.subr.bf16.mxu1 %v21606_v19 }
 0x473   :  { %15023 = vmatpush1.bf16.msra.mxu0 %v21607_v10  ;;  %15215 = vmatpush1.bf16.msra.mxu1 %v21609_v49 }
 0x474   :  { %15025 = vmatprep.subr.bf16.mxu0 %v21608_v48  ;;  %15217 = vmatprep.subr.bf16.mxu1 %v21610_v2 }
 0x477   :  { %15027 = vmatpush1.bf16.msra.mxu0 %v21611_v8  ;;  %15219 = vmatpush1.bf16.msra.mxu1 %v21613_v41 }
 0x478   :  { %15029 = vmatprep.subr.bf16.mxu0 %v21612_v4  ;;  %15221 = vmatprep.subr.bf16.mxu1 %v21614_v13 }
 0x47b   :  { %15031 = vmatpush1.bf16.msra.mxu0 %v21615_v27  ;;  %15223 = vmatpush1.bf16.msra.mxu1 %v21617_v63 }
 0x47c   :  { %15033 = vmatprep.subr.bf16.mxu0 %v21616_v26  ;;  %15225 = vmatprep.subr.bf16.mxu1 %v21799_v1 }
 0x47f   :  { %15035 = vmatpush1.bf16.msra.mxu0 %v21800_v42  ;;  %15227 = vmatpush1.bf16.msra.mxu1 %v21801_v30 }
 0x480   :  { %15037 = vmatprep.subr.bf16.mxu0 %v21802_v61  ;;  %15229 = vmatprep.subr.bf16.mxu1 %v21803_v59 }
 0x483   :  { %15039 = vmatpush1.bf16.msra.mxu0 %v21804_v40  ;;  %15231 = vmatpush1.bf16.msra.mxu1 %v21805_v37 }
 0x484   :  { %15233 = vmatprep.subr.bf16.mxu0 %v21593_v45  ;;  %15425 = vmatprep.subr.bf16.mxu1 %v21594_v32 }
 0x486   :  { %4420 = vmatmul.mubr.f32.vlgmr.msra.gmra.mrb[4].mxu0 %v19421_v35  ;;  %5275 = vmatmul.mubr.f32.vlgmr.msra.gmra.mrb[4].mxu1 %v19421_v35  ;;  %v21838_v35 = vld [vmem:[#allocation67_spill] sm:$0xff] }
 0x487   :  { %15235 = vmatpush1.bf16.msra.mxu0 %v21595_v3  ;;  %15427 = vmatpush1.bf16.msra.mxu1 %v21597_v33 }
 0x488   :  { %15237 = vmatprep.subr.bf16.mxu0 %v21596_v56  ;;  %15429 = vmatprep.subr.bf16.mxu1 %v21598_v7 }
 0x489   :  { %5410 = vmatprep.mubr.f32.mxu0 %v21338_v6  ;;  %6265 = vmatprep.mubr.f32.mxu1 %v21338_v6 }
 0x48b   :  { %15239 = vmatpush1.bf16.msra.mxu0 %v21599_v20  ;;  %15431 = vmatpush1.bf16.msra.mxu1 %v21601_v39 }
 0x48c   :  { %15241 = vmatprep.subr.bf16.mxu0 %v21600_v28  ;;  %15433 = vmatprep.subr.bf16.mxu1 %v21602_v62 }
 0x48f   :  { %15243 = vmatpush1.bf16.msra.mxu0 %v21603_v55  ;;  %15435 = vmatpush1.bf16.msra.mxu1 %v21605_v43 }
 0x490   :  { %15245 = vmatprep.subr.bf16.mxu0 %v21604_v24  ;;  %15437 = vmatprep.subr.bf16.mxu1 %v21606_v19 }
 0x493   :  { %15247 = vmatpush1.bf16.msra.mxu0 %v21607_v10  ;;  %15439 = vmatpush1.bf16.msra.mxu1 %v21609_v49 }
 0x494   :  { %15249 = vmatprep.subr.bf16.mxu0 %v21608_v48  ;;  %15441 = vmatprep.subr.bf16.mxu1 %v21610_v2 }
 0x497   :  { %15251 = vmatpush1.bf16.msra.mxu0 %v21611_v8  ;;  %15443 = vmatpush1.bf16.msra.mxu1 %v21613_v41 }
 0x498   :  { %15253 = vmatprep.subr.bf16.mxu0 %v21612_v4  ;;  %15445 = vmatprep.subr.bf16.mxu1 %v21614_v13 }
 0x49b   :  { %15255 = vmatpush1.bf16.msra.mxu0 %v21615_v27  ;;  %15447 = vmatpush1.bf16.msra.mxu1 %v21617_v63 }
 0x49c   :  { %15257 = vmatprep.subr.bf16.mxu0 %v21616_v26  ;;  %15449 = vmatprep.subr.bf16.mxu1 %v21799_v1 }
 0x49f   :  { %15259 = vmatpush1.bf16.msra.mxu0 %v21800_v42  ;;  %15451 = vmatpush1.bf16.msra.mxu1 %v21801_v30 }
 0x4a0   :  { %15261 = vmatprep.subr.bf16.mxu0 %v21802_v61  ;;  %15453 = vmatprep.subr.bf16.mxu1 %v21803_v59  ;;  %v3570_v59 = vld [vmem:[#allocation2 + $0x58] sm:$0xff]  ;;  %v3569_v61 = vld [vmem:[#allocation2 + $0x50] sm:$0xff] }
 0x4a3   :  { %15263 = vmatpush1.bf16.msra.mxu0 %v21804_v40  ;;  %15455 = vmatpush1.bf16.msra.mxu1 %v21805_v37 }
 0x4a4   :  { %15265 = vmatprep.subr.bf16.mxu0 %v21838_v35  ;;  %15457 = vmatprep.subr.bf16.mxu1 %v21839_v38 }
 0x559   :  { %v4421_v47 = vpop.f32.mrb[4].mxu0  ;;  %v5276_v16 = vpop.f32.mrb[4].mxu1 }
 0x55a   :  { %v5281_v21 = vadd.f32 %v4421_v47, %v3567_v44  ;;  %v4423_v22 = vpop.f32.mrb[5].mxu0  ;;  %v5278_v12 = vpop.f32.mrb[5].mxu1  ;;  %v5283_v30 = vadd.f32 %v5276_v16, %v3569_v61 }
 0x55b   :  { %v5282_v53 = vadd.f32 %v4423_v22, %v3568_v0  ;;  %v5284_v40 = vadd.f32 %v5278_v12, %v3570_v59 }
 0x55c   :  { %v14062_v23 = vmul.f32 -1.442695, %v5281_v21 }
 0x55d   :  { %v14063_v60 = vmul.f32 -1.442695, %v5282_v53  ;;  %v14064_v37 = vmul.f32 -1.442695, %v5284_v40 }
 0x55e   :  { %17351 = vpow2.f32 %v14062_v23 }
 0x55f   :  { %17353 = vpow2.f32 %v14063_v60  ;;  %v21842_v60 = vld [vmem:[#allocation30_spill] sm:$0xff] }
 0x560   :  { %17355 = vpow2.f32 %v14064_v37 }
 0x561   :  { %17357 = vtanh.f32 %v5283_v30 }
 0x568   :  { %v17352_v35 = vpop.eup %17351 }
 0x569   :  { %v17354_v42 = vpop.eup %17353  ;;  %v5288_v38 = vadd.f32 1.0, %v17352_v35  ;;  %v21843_v35 = vld [vmem:[#allocation89_spill] sm:$0xff] }
 0x56a   :  { %v5294_v1 = vadd.f32 1.0, %v17354_v42  ;;  %v17356_v44 = vpop.eup %17355 }
 0x56b   :  { %17359 = vrcp.f32 %v5288_v38  ;;  %v17358_v47 = vpop.eup %17357  ;;  %v5301_v23 = vadd.f32 1.0, %v17356_v44  ;;  %v21840_v38 = vld [vmem:[#allocation84_spill] sm:$0xff]  ;;  %v21844_v44 = vld [vmem:[#allocation90_spill] sm:$0xff] }
 0x56c   :  { %17361 = vrcp.f32 %v5294_v1  ;;  %v21841_v1 = vld [vmem:[#allocation88_spill] sm:$0xff] }
 0x56d   :  { %17363 = vrcp.f32 %v5301_v23  ;;  %v21849_v23 = vld [vmem:[#allocation49_spill] sm:$0xff] }
 0x575   :  { %v17360_v0 = vpop.eup %17359 }
 0x576   :  { %v17362_v22 = vpop.eup %17361  ;;  %v5305_v53 = vmul.f32 %v17360_v0, %v17358_v47  ;;  %v21845_v47 = vld [vmem:[#allocation91_spill] sm:$0xff] }
 0x577   :  { %v5304_v21 = vmul.f32 %v17362_v22, %v19418_v50  ;;  %v17364_v40 = vpop.eup %17363  ;;  %v21846_v0 = vld [vmem:[#allocation43_spill] sm:$0xff]  ;;  %v21847_v22 = vld [vmem:[#allocation44_spill] sm:$0xff] }
 0x579   :  { %v19646_v12 = vadd.f32 %v5305_v53, %v5304_v21  ;;  %v21848_v53 = vld [vmem:[#allocation47_spill] sm:$0xff]  ;;  %v21850_v21 = vld [vmem:[#allocation94_spill] sm:$0xff] }
 0x57b   :  { %17365 = vtanh.f32 %v19646_v12 }
 0x585   :  { %v17366_v59 = vpop.eup %17365 }
 0x586   :  { %v5308_v37 = vmul.f32 %v17366_v59, %v17364_v40  ;;  %v21851_v40 = vld [vmem:[#allocation95_spill] sm:$0xff] }
 0x587   :  { %v21852_v59 = vld [vmem:[#allocation55_spill] sm:$0xff] }
 0x588   :  { %v19649_v61 = vand.u32 4294901760, %v5308_v37 }
 0x58a   :  { %v19652_v30 = vsub.f32 %v5308_v37, %v19649_v61  ;;  %v21853_v37 = vld [vmem:[#allocation96_spill] sm:$0xff] }
 0x58c   :  { %v19655_v16 = vand.u32 4294901760, %v19652_v30 }
 0x58e   :  { %v5414_v42 = vsub.f32 %v19652_v30, %v19655_v16 }
 0x590   :  { %v5415_v50 = vand.u32 4294901760, %v5414_v42  ;;  %v21854_v42 = vld [vmem:[#allocation98_spill] sm:$0xff] }
 0x592   :  { %5416 = vmatmul.mubr.f32.vlgmr.msra.gmra.mrb[6].mxu0 %v5415_v50  ;;  %6271 = vmatmul.mubr.f32.vlgmr.msra.gmra.mrb[6].mxu1 %v5415_v50  ;;  %v21855_v50 = vld [vmem:[#allocation100_spill] sm:$0xff] }
 0x593   :  { %15267 = vmatpush1.bf16.msra.mxu0 %v21671_v51  ;;  %15459 = vmatpush1.bf16.msra.mxu1 %v21672_v25 }
 0x594   :  { %15269 = vmatprep.subr.bf16.mxu0 %v21673_v5  ;;  %15461 = vmatprep.subr.bf16.mxu1 %v21674_v58 }
 0x595   :  { %5646 = vmatprep.mubr.f32.mxu0 %v21338_v6  ;;  %6501 = vmatprep.mubr.f32.mxu1 %v21338_v6 }
 0x597   :  { %15271 = vmatpush1.bf16.msra.mxu0 %v21755_v15  ;;  %15463 = vmatpush1.bf16.msra.mxu1 %v21756_v29 }
 0x598   :  { %15273 = vmatprep.subr.bf16.mxu0 %v21757_v31  ;;  %15465 = vmatprep.subr.bf16.mxu1 %v21758_v52 }
 0x59b   :  { %15275 = vmatpush1.bf16.msra.mxu0 %v21759_v54  ;;  %15467 = vmatpush1.bf16.msra.mxu1 %v21840_v38 }
 0x59c   :  { %15277 = vmatprep.subr.bf16.mxu0 %v21761_v57  ;;  %15469 = vmatprep.subr.bf16.mxu1 %v21762_v11 }
 0x59f   :  { %15279 = vmatpush1.bf16.msra.mxu0 %v21841_v1  ;;  %15471 = vmatpush1.bf16.msra.mxu1 %v21842_v60 }
 0x5a0   :  { %15281 = vmatprep.subr.bf16.mxu0 %v21843_v35  ;;  %15473 = vmatprep.subr.bf16.mxu1 %v21844_v44 }
 0x5a3   :  { %15283 = vmatpush1.bf16.msra.mxu0 %v21845_v47  ;;  %15475 = vmatpush1.bf16.msra.mxu1 %v21846_v0 }
 0x5a4   :  { %15285 = vmatprep.subr.bf16.mxu0 %v21847_v22  ;;  %15477 = vmatprep.subr.bf16.mxu1 %v21848_v53  ;;  %v21856_v22 = vld [vmem:[#allocation107_spill] sm:$0xff]  ;;  %v21857_v53 = vld [vmem:[#allocation97_spill] sm:$0xff] }
 0x5a7   :  { %15287 = vmatpush1.bf16.msra.mxu0 %v21849_v23  ;;  %15479 = vmatpush1.bf16.msra.mxu1 %v21692_v18  ;;  %v21858_v23 = vld [vmem:[#allocation64_spill] sm:$0xff]  ;;  %v21907_v18 = vld [vmem:[#allocation85_spill] sm:$0xff] }
 0x5a8   :  { %15289 = vmatprep.subr.bf16.mxu0 %v21693_v46  ;;  %15481 = vmatprep.subr.bf16.mxu1 %v21850_v21  ;;  %v21859_v21 = vld [vmem:[#allocation65_spill] sm:$0xff]  ;;  %v21906_v46 = vld [vmem:[#allocation83_spill] sm:$0xff] }
 0x5ab   :  { %15291 = vmatpush1.bf16.msra.mxu0 %v21851_v40  ;;  %15483 = vmatpush1.bf16.msra.mxu1 %v21852_v59  ;;  %v21860_v40 = vld [vmem:[#allocation66_spill] sm:$0xff]  ;;  %v21861_v59 = vld [vmem:[#allocation99_spill] sm:$0xff] }
 0x5ac   :  { %15293 = vmatprep.subr.bf16.mxu0 %v21853_v37  ;;  %15485 = vmatprep.subr.bf16.mxu1 %v21854_v42  ;;  %v21862_v37 = vld [vmem:[#allocation101_spill] sm:$0xff]  ;;  %v21900_v42 = vld [vmem:[#allocation114_spill] sm:$0xff] }
 0x5af   :  { %15295 = vmatpush1.bf16.msra.mxu0 %v21855_v50  ;;  %15487 = vmatpush1.bf16.msra.mxu1 %v21856_v22  ;;  %v21863_v22 = vld [vmem:[#allocation102_spill] sm:$0xff]  ;;  %v21866_v50 = vld [vmem:[#allocation105_spill] sm:$0xff] }
 0x5b0   :  { %15297 = vmatprep.subr.bf16.mxu0 %v21857_v53  ;;  %15489 = vmatprep.subr.bf16.mxu1 %v21858_v23  ;;  %v21864_v53 = vld [vmem:[#allocation103_spill] sm:$0xff]  ;;  %v21865_v23 = vld [vmem:[#allocation104_spill] sm:$0xff] }
 0x5b2   :  { %5648 = vmatmul.mubr.f32.vlgmr.msra.gmra.mrb[6].mxu0 %v19649_v61  ;;  %6503 = vmatmul.mubr.f32.vlgmr.msra.gmra.mrb[6].mxu1 %v19649_v61 }
 0x5b3   :  { %15299 = vmatpush1.bf16.msra.mxu0 %v21859_v21  ;;  %15491 = vmatpush1.bf16.msra.mxu1 %v21860_v40  ;;  %v21896_v40 = vld [vmem:[#allocation19_spill] sm:$0xff]  ;;  %v21897_v21 = vld [vmem:[#allocation20_spill] sm:$0xff] }
 0x5b4   :  { %15301 = vmatprep.subr.bf16.mxu0 %v21861_v59  ;;  %15493 = vmatprep.subr.bf16.mxu1 %v21862_v37  ;;  %v21867_v37 = vld [vmem:[#allocation121_spill] sm:$0xff]  ;;  %v21868_v59 = vld [vmem:[#allocation112_spill] sm:$0xff] }
 0x5b5   :  { %5782 = vmatprep.mubr.f32.mxu0 %v21338_v6  ;;  %6637 = vmatprep.mubr.f32.mxu1 %v21338_v6 }
 0x5b7   :  { %15303 = vmatpush1.bf16.msra.mxu0 %v21863_v22  ;;  %15495 = vmatpush1.bf16.msra.mxu1 %v21864_v53  ;;  %v21869_v22 = vld [vmem:[#allocation124_spill] sm:$0xff]  ;;  %v21870_v53 = vld [vmem:[#allocation125_spill] sm:$0xff] }
 0x5b8   :  { %15305 = vmatprep.subr.bf16.mxu0 %v21865_v23  ;;  %15497 = vmatprep.subr.bf16.mxu1 %v21866_v50  ;;  %v21871_v23 = vld [vmem:[#allocation127_spill] sm:$0xff]  ;;  %v21872_v50 = vld [vmem:[#allocation126_spill] sm:$0xff] }
 0x5bb   :  { %15307 = vmatpush1.bf16.msra.mxu0 %v21787_v17  ;;  %15499 = vmatpush1.bf16.msra.mxu1 %v21788_v34  ;;  %v21873_v17 = vld [vmem:[#allocation128_spill] sm:$0xff]  ;;  %v21874_v34 = vld [vmem:[#allocation129_spill] sm:$0xff] }
 0x5bc   :  { %15309 = vmatprep.subr.bf16.mxu0 %v21789_v14  ;;  %15501 = vmatprep.subr.bf16.mxu1 %v21790_v9  ;;  %v21875_v14 = vld [vmem:[#allocation131_spill] sm:$0xff]  ;;  %v21876_v9 = vld [vmem:[#allocation130_spill] sm:$0xff] }
 0x5bf   :  { %15311 = vmatpush1.bf16.msra.mxu0 %v21791_v36  ;;  %15503 = vmatpush1.bf16.msra.mxu1 %v21867_v37  ;;  %v21877_v36 = vld [vmem:[#allocation132_spill] sm:$0xff]  ;;  %v21878_v37 = vld [vmem:[#allocation133_spill] sm:$0xff] }
 0x5c0   :  { %15313 = vmatprep.subr.bf16.mxu0 %v21868_v59  ;;  %15505 = vmatprep.subr.bf16.mxu1 %v21869_v22  ;;  %v21879_v59 = vld [vmem:[#allocation135_spill] sm:$0xff]  ;;  %v21880_v22 = vld [vmem:[#allocation134_spill] sm:$0xff] }
 0x5c3   :  { %15315 = vmatpush1.bf16.msra.mxu0 %v21870_v53  ;;  %15507 = vmatpush1.bf16.msra.mxu1 %v21871_v23  ;;  %v21881_v53 = vld [vmem:[#allocation136_spill] sm:$0xff]  ;;  %v21882_v23 = vld [vmem:[#allocation137_spill] sm:$0xff] }
 0x5c4   :  { %15317 = vmatprep.subr.bf16.mxu0 %v21872_v50  ;;  %15509 = vmatprep.subr.bf16.mxu1 %v21873_v17  ;;  %v21883_v50 = vld [vmem:[#allocation138_spill] sm:$0xff] }
 0x5c5   :  { %v21895_v17 = vld [vmem:[#allocation18_spill] sm:$0xff] }
 0x5c7   :  { %15319 = vmatpush1.bf16.msra.mxu0 %v21874_v34  ;;  %15511 = vmatpush1.bf16.msra.mxu1 %v21875_v14  ;;  %v21893_v14 = vld [vmem:[#allocation16_spill] sm:$0xff]  ;;  %v21894_v34 = vld [vmem:[#allocation17_spill] sm:$0xff] }
 0x5c8   :  { %15321 = vmatprep.subr.bf16.mxu0 %v21876_v9  ;;  %15513 = vmatprep.subr.bf16.mxu1 %v21877_v36  ;;  %v21891_v36 = vld [vmem:[#allocation14_spill] sm:$0xff]  ;;  %v21892_v9 = vld [vmem:[#allocation15_spill] sm:$0xff] }
 0x5cb   :  { %15323 = vmatpush1.bf16.msra.mxu0 %v21878_v37  ;;  %15515 = vmatpush1.bf16.msra.mxu1 %v21879_v59  ;;  %v21889_v59 = vld [vmem:[#allocation62_spill] sm:$0xff]  ;;  %v21890_v37 = vld [vmem:[#allocation63_spill] sm:$0xff] }
 0x5cc   :  { %15325 = vmatprep.subr.bf16.mxu0 %v21880_v22  ;;  %15517 = vmatprep.subr.bf16.mxu1 %v21881_v53  ;;  %v21887_v53 = vld [vmem:[#allocation60_spill] sm:$0xff]  ;;  %v21888_v22 = vld [vmem:[#allocation61_spill] sm:$0xff] }
 0x5cf   :  { %15327 = vmatpush1.bf16.msra.mxu0 %v21882_v23  ;;  %15519 = vmatpush1.bf16.msra.mxu1 %v21883_v50  ;;  %v21885_v50 = vld [vmem:[#allocation58_spill] sm:$0xff]  ;;  %v21886_v23 = vld [vmem:[#allocation59_spill] sm:$0xff] }
 0x5d0   :  { %15329 = vmatprep.subr.bf16.mxu0 %v21593_v45  ;;  %15521 = vmatprep.subr.bf16.mxu1 %v21594_v32 }
 0x5d2   :  { %5785 = vmatmul.mubr.f32.vlgmr.msra.gmra.mrb[6].mxu0 %v19652_v30  ;;  %6640 = vmatmul.mubr.f32.vlgmr.msra.gmra.mrb[6].mxu1 %v19652_v30  ;;  %v21884_v30 = vld [vmem:[#allocation57_spill] sm:$0xff] }
 0x5d3   :  { %15331 = vmatpush1.bf16.msra.mxu0 %v21595_v3  ;;  %15523 = vmatpush1.bf16.msra.mxu1 %v21597_v33 }
 0x5d4   :  { %15333 = vmatprep.subr.bf16.mxu0 %v21596_v56  ;;  %15525 = vmatprep.subr.bf16.mxu1 %v21598_v7 }
 0x5d5   :  { %5887 = vmatprep.mubr.f32.mxu0 %v21338_v6  ;;  %6742 = vmatprep.mubr.f32.mxu1 %v21338_v6 }
 0x5d7   :  { %15335 = vmatpush1.bf16.msra.mxu0 %v21599_v20  ;;  %15527 = vmatpush1.bf16.msra.mxu1 %v21601_v39 }
 0x5d8   :  { %15337 = vmatprep.subr.bf16.mxu0 %v21600_v28  ;;  %15529 = vmatprep.subr.bf16.mxu1 %v21602_v62 }
 0x5db   :  { %15339 = vmatpush1.bf16.msra.mxu0 %v21603_v55  ;;  %15531 = vmatpush1.bf16.msra.mxu1 %v21605_v43 }
 0x5dc   :  { %15341 = vmatprep.subr.bf16.mxu0 %v21604_v24  ;;  %15533 = vmatprep.subr.bf16.mxu1 %v21606_v19 }
 0x5df   :  { %15343 = vmatpush1.bf16.msra.mxu0 %v21607_v10  ;;  %15535 = vmatpush1.bf16.msra.mxu1 %v21609_v49 }
 0x5e0   :  { %15345 = vmatprep.subr.bf16.mxu0 %v21608_v48  ;;  %15537 = vmatprep.subr.bf16.mxu1 %v21610_v2 }
 0x5e3   :  { %15347 = vmatpush1.bf16.msra.mxu0 %v21611_v8  ;;  %15539 = vmatpush1.bf16.msra.mxu1 %v21613_v41 }
 0x5e4   :  { %15349 = vmatprep.subr.bf16.mxu0 %v21612_v4  ;;  %15541 = vmatprep.subr.bf16.mxu1 %v21614_v13 }
 0x5e7   :  { %15351 = vmatpush1.bf16.msra.mxu0 %v21615_v27  ;;  %15543 = vmatpush1.bf16.msra.mxu1 %v21617_v63 }
 0x5e8   :  { %15353 = vmatprep.subr.bf16.mxu0 %v21616_v26  ;;  %15545 = vmatprep.subr.bf16.mxu1 %v21884_v30 }
 0x5eb   :  { %15355 = vmatpush1.bf16.msra.mxu0 %v21885_v50  ;;  %15547 = vmatpush1.bf16.msra.mxu1 %v21886_v23 }
 0x5ec   :  { %15357 = vmatprep.subr.bf16.mxu0 %v21887_v53  ;;  %15549 = vmatprep.subr.bf16.mxu1 %v21888_v22 }
 0x5ef   :  { %15359 = vmatpush1.bf16.msra.mxu0 %v21889_v59  ;;  %15551 = vmatpush1.bf16.msra.mxu1 %v21890_v37 }
 0x5f0   :  { %15361 = vmatprep.subr.bf16.mxu0 %v21891_v36  ;;  %15553 = vmatprep.subr.bf16.mxu1 %v21892_v9  ;;  %v21898_v36 = vld [vmem:[#allocation22_spill] sm:$0xff]  ;;  %v21899_v9 = vld [vmem:[#allocation113_spill] sm:$0xff] }
 0x5f2   :  { %5891 = vmatmul.mubr.f32.vlgmr.msra.gmra.mrb[6].mxu0 %v19655_v16  ;;  %6746 = vmatmul.mubr.f32.vlgmr.msra.gmra.mrb[6].mxu1 %v19655_v16  ;;  %v21901_v16 = vld [vmem:[#allocation115_spill] sm:$0xff] }
 0x5f3   :  { %15363 = vmatpush1.bf16.msra.mxu0 %v21893_v14  ;;  %15555 = vmatpush1.bf16.msra.mxu1 %v21894_v34  ;;  %v21902_v14 = vld [vmem:[#allocation116_spill] sm:$0xff]  ;;  %v21903_v34 = vld [vmem:[#allocation117_spill] sm:$0xff] }
 0x5f4   :  { %15365 = vmatprep.subr.bf16.mxu0 %v21895_v17  ;;  %15557 = vmatprep.subr.bf16.mxu1 %v21896_v40  ;;  %v21904_v17 = vld [vmem:[#allocation118_spill] sm:$0xff]  ;;  %v21905_v40 = vld [vmem:[#allocation119_spill] sm:$0xff] }
 0x5f5   :  { %6057 = vmatprep.mubr.f32.mxu0 %v21338_v6  ;;  %6912 = vmatprep.mubr.f32.mxu1 %v21338_v6 }
 0x5f7   :  { %15367 = vmatpush1.bf16.msra.mxu0 %v21897_v21  ;;  %15559 = vmatpush1.bf16.msra.mxu1 %v21898_v36  ;;  %v21908_v21 = vld [vmem:[#allocation26_spill] sm:$0xff]  ;;  %v21909_v36 = vld [vmem:[#allocation27_spill] sm:$0xff] }
 0x5f8   :  { %15369 = vmatprep.subr.bf16.mxu0 %v21899_v9  ;;  %15561 = vmatprep.subr.bf16.mxu1 %v21900_v42  ;;  %v21910_v9 = vld [vmem:[#allocation29_spill] sm:$0xff]  ;;  %v21911_v42 = vld [vmem:[#allocation31_spill] sm:$0xff] }
 0x5fb   :  { %15371 = vmatpush1.bf16.msra.mxu0 %v21901_v16  ;;  %15563 = vmatpush1.bf16.msra.mxu1 %v21902_v14  ;;  %v21912_v16 = vld [vmem:[#allocation34_spill] sm:$0xff]  ;;  %v21913_v14 = vld [vmem:[#allocation35_spill] sm:$0xff] }
 0x5fc   :  { %15373 = vmatprep.subr.bf16.mxu0 %v21903_v34  ;;  %15565 = vmatprep.subr.bf16.mxu1 %v21904_v17  ;;  %v21914_v34 = vld [vmem:[#allocation36_spill] sm:$0xff]  ;;  %v21915_v17 = vld [vmem:[#allocation38_spill] sm:$0xff] }
 0x5ff   :  { %15375 = vmatpush1.bf16.msra.mxu0 %v21905_v40  ;;  %15567 = vmatpush1.bf16.msra.mxu1 %v21906_v46  ;;  %v21916_v40 = vld [vmem:[#allocation39_spill] sm:$0xff]  ;;  %v21917_v46 = vld [vmem:[#allocation40_spill] sm:$0xff] }
 0x600   :  { %15377 = vmatprep.subr.bf16.mxu0 %v21907_v18  ;;  %15569 = vmatprep.subr.bf16.mxu1 %v21908_v21  ;;  %v21918_v18 = vld [vmem:[#allocation42_spill] sm:$0xff]  ;;  %v21919_v21 = vld [vmem:[#allocation92_spill] sm:$0xff] }
 0x603   :  { %15379 = vmatpush1.bf16.msra.mxu0 %v21909_v36  ;;  %15571 = vmatpush1.bf16.msra.mxu1 %v21910_v9  ;;  %v21920_v36 = vld [vmem:[#allocation120_spill] sm:$0xff]  ;;  %v21921_v9 = vld [vmem:[#allocation122_spill] sm:$0xff] }
 0x604   :  { %15381 = vmatprep.subr.bf16.mxu0 %v21911_v42  ;;  %15573 = vmatprep.subr.bf16.mxu1 %v21912_v16  ;;  %v21922_v42 = vld [vmem:[#allocation123_spill] sm:$0xff] }
 0x607   :  { %15383 = vmatpush1.bf16.msra.mxu0 %v21913_v14  ;;  %15575 = vmatpush1.bf16.msra.mxu1 %v21914_v34 }
 0x608   :  { %15385 = vmatprep.subr.bf16.mxu0 %v21915_v17  ;;  %15577 = vmatprep.subr.bf16.mxu1 %v21916_v40 }
 0x60b   :  { %15387 = vmatpush1.bf16.msra.mxu0 %v21917_v46  ;;  %15579 = vmatpush1.bf16.msra.mxu1 %v21918_v18 }
 0x60c   :  { %15389 = vmatprep.subr.bf16.mxu0 %v21919_v21  ;;  %15581 = vmatprep.subr.bf16.mxu1 %v21920_v36  ;;  %v5311_v36 = vld [vmem:[#allocation2 + $0x68] sm:$0xff] }
 0x60f   :  { %15391 = vmatpush1.bf16.msra.mxu0 %v21921_v9  ;;  %15583 = vmatpush1.bf16.msra.mxu1 %v21922_v42  ;;  %v21924_v42 = vld [vmem:[#allocation68_spill] sm:$0xff] }
 0x610   :  { %15393 = vmatprep.subr.bf16.mxu0 %v21593_v45  ;;  %15585 = vmatprep.subr.bf16.mxu1 %v21594_v32  ;;  %v5310_v9 = vld [vmem:[#allocation2 + $0x60] sm:$0xff] }
 0x612   :  { %6059 = vmatmul.mubr.f32.vlgmr.msra.gmra.mrb[6].mxu0 %v19649_v61  ;;  %6914 = vmatmul.mubr.f32.vlgmr.msra.gmra.mrb[6].mxu1 %v19649_v61 }
 0x613   :  { %15395 = vmatpush1.bf16.msra.mxu0 %v21595_v3  ;;  %15587 = vmatpush1.bf16.msra.mxu1 %v21597_v33 }
 0x614   :  { %15397 = vmatprep.subr.bf16.mxu0 %v21596_v56  ;;  %15589 = vmatprep.subr.bf16.mxu1 %v21598_v7 }
 0x615   :  { %6161 = vmatprep.mubr.f32.mxu0 %v21338_v6  ;;  %7016 = vmatprep.mubr.f32.mxu1 %v21338_v6 }
 0x617   :  { %15399 = vmatpush1.bf16.msra.mxu0 %v21599_v20  ;;  %15591 = vmatpush1.bf16.msra.mxu1 %v21601_v39 }
 0x618   :  { %15401 = vmatprep.subr.bf16.mxu0 %v21600_v28  ;;  %15593 = vmatprep.subr.bf16.mxu1 %v21602_v62 }
 0x61b   :  { %15403 = vmatpush1.bf16.msra.mxu0 %v21603_v55  ;;  %15595 = vmatpush1.bf16.msra.mxu1 %v21605_v43 }
 0x61c   :  { %15405 = vmatprep.subr.bf16.mxu0 %v21604_v24  ;;  %15597 = vmatprep.subr.bf16.mxu1 %v21606_v19 }
 0x61f   :  { %15407 = vmatpush1.bf16.msra.mxu0 %v21607_v10  ;;  %15599 = vmatpush1.bf16.msra.mxu1 %v21609_v49 }
 0x620   :  { %15409 = vmatprep.subr.bf16.mxu0 %v21608_v48  ;;  %15601 = vmatprep.subr.bf16.mxu1 %v21610_v2 }
 0x623   :  { %15411 = vmatpush1.bf16.msra.mxu0 %v21611_v8  ;;  %15603 = vmatpush1.bf16.msra.mxu1 %v21613_v41 }
 0x624   :  { %15413 = vmatprep.subr.bf16.mxu0 %v21612_v4  ;;  %15605 = vmatprep.subr.bf16.mxu1 %v21614_v13 }
 0x627   :  { %15415 = vmatpush1.bf16.msra.mxu0 %v21615_v27  ;;  %15607 = vmatpush1.bf16.msra.mxu1 %v21617_v63 }
 0x628   :  { %15417 = vmatprep.subr.bf16.mxu0 %v21616_v26  ;;  %15609 = vmatprep.subr.bf16.mxu1 %v21884_v30 }
 0x62b   :  { %15419 = vmatpush1.bf16.msra.mxu0 %v21885_v50  ;;  %15611 = vmatpush1.bf16.msra.mxu1 %v21886_v23 }
 0x62c   :  { %15421 = vmatprep.subr.bf16.mxu0 %v21887_v53  ;;  %15613 = vmatprep.subr.bf16.mxu1 %v21888_v22 }
 0x62f   :  { %15423 = vmatpush1.bf16.msra.mxu0 %v21889_v59  ;;  %15615 = vmatpush1.bf16.msra.mxu1 %v21890_v37 }
 0x630   :  { %15617 = vmatprep.subr.bf16.mxu0 %v21593_v45  ;;  %15809 = vmatprep.subr.bf16.mxu1 %v21594_v32 }
 0x632   :  { %6163 = vmatmul.mubr.f32.vlgmr.msra.gmra.mrb[6].mxu0 %v19649_v61  ;;  %7018 = vmatmul.mubr.f32.vlgmr.msra.gmra.mrb[6].mxu1 %v19649_v61  ;;  %v21923_v61 = vld [vmem:[#allocation67_spill] sm:$0xff] }
 0x633   :  { %15619 = vmatpush1.bf16.msra.mxu0 %v21595_v3  ;;  %15811 = vmatpush1.bf16.msra.mxu1 %v21597_v33 }
 0x634   :  { %15621 = vmatprep.subr.bf16.mxu0 %v21596_v56  ;;  %15813 = vmatprep.subr.bf16.mxu1 %v21598_v7 }
 0x635   :  { %7153 = vmatprep.mubr.f32.mxu0 %v21338_v6  ;;  %8008 = vmatprep.mubr.f32.mxu1 %v21338_v6 }
 0x637   :  { %15623 = vmatpush1.bf16.msra.mxu0 %v21599_v20  ;;  %15815 = vmatpush1.bf16.msra.mxu1 %v21601_v39 }
 0x638   :  { %15625 = vmatprep.subr.bf16.mxu0 %v21600_v28  ;;  %15817 = vmatprep.subr.bf16.mxu1 %v21602_v62 }
 0x63b   :  { %15627 = vmatpush1.bf16.msra.mxu0 %v21603_v55  ;;  %15819 = vmatpush1.bf16.msra.mxu1 %v21605_v43 }
 0x63c   :  { %15629 = vmatprep.subr.bf16.mxu0 %v21604_v24  ;;  %15821 = vmatprep.subr.bf16.mxu1 %v21606_v19 }
 0x63f   :  { %15631 = vmatpush1.bf16.msra.mxu0 %v21607_v10  ;;  %15823 = vmatpush1.bf16.msra.mxu1 %v21609_v49 }
 0x640   :  { %15633 = vmatprep.subr.bf16.mxu0 %v21608_v48  ;;  %15825 = vmatprep.subr.bf16.mxu1 %v21610_v2 }
 0x643   :  { %15635 = vmatpush1.bf16.msra.mxu0 %v21611_v8  ;;  %15827 = vmatpush1.bf16.msra.mxu1 %v21613_v41 }
 0x644   :  { %15637 = vmatprep.subr.bf16.mxu0 %v21612_v4  ;;  %15829 = vmatprep.subr.bf16.mxu1 %v21614_v13 }
 0x647   :  { %15639 = vmatpush1.bf16.msra.mxu0 %v21615_v27  ;;  %15831 = vmatpush1.bf16.msra.mxu1 %v21617_v63 }
 0x648   :  { %15641 = vmatprep.subr.bf16.mxu0 %v21616_v26  ;;  %15833 = vmatprep.subr.bf16.mxu1 %v21884_v30 }
 0x64b   :  { %15643 = vmatpush1.bf16.msra.mxu0 %v21885_v50  ;;  %15835 = vmatpush1.bf16.msra.mxu1 %v21886_v23 }
 0x64c   :  { %15645 = vmatprep.subr.bf16.mxu0 %v21887_v53  ;;  %15837 = vmatprep.subr.bf16.mxu1 %v21888_v22  ;;  %v5313_v22 = vld [vmem:[#allocation2 + $0x78] sm:$0xff]  ;;  %v5312_v53 = vld [vmem:[#allocation2 + $0x70] sm:$0xff] }
 0x64f   :  { %15647 = vmatpush1.bf16.msra.mxu0 %v21889_v59  ;;  %15839 = vmatpush1.bf16.msra.mxu1 %v21890_v37 }
 0x650   :  { %15649 = vmatprep.subr.bf16.mxu0 %v21923_v61  ;;  %15841 = vmatprep.subr.bf16.mxu1 %v21924_v42 }
 0x705   :  { %v6164_v21 = vpop.f32.mrb[6].mxu0  ;;  %v7019_v18 = vpop.f32.mrb[6].mxu1 }
 0x706   :  { %v7024_v46 = vadd.f32 %v6164_v21, %v5310_v9  ;;  %v6166_v40 = vpop.f32.mrb[7].mxu0  ;;  %v7021_v17 = vpop.f32.mrb[7].mxu1  ;;  %v7026_v23 = vadd.f32 %v7019_v18, %v5312_v53 }
 0x707   :  { %v7025_v34 = vadd.f32 %v6166_v40, %v5311_v36  ;;  %v7027_v59 = vadd.f32 %v7021_v17, %v5313_v22 }
 0x708   :  { %v14065_v14 = vmul.f32 -1.442695, %v7024_v46 }
 0x709   :  { %v14066_v16 = vmul.f32 -1.442695, %v7025_v34  ;;  %v14067_v37 = vmul.f32 -1.442695, %v7027_v59 }
 0x70a   :  { %17367 = vpow2.f32 %v14065_v14 }
 0x70b   :  { %17369 = vpow2.f32 %v14066_v16  ;;  %v21927_v16 = vld [vmem:[#allocation49_spill] sm:$0xff] }
 0x70c   :  { %17371 = vpow2.f32 %v14067_v37 }
 0x70d   :  { %17373 = vtanh.f32 %v7026_v23 }
 0x714   :  { %v17368_v61 = vpop.eup %17367 }
 0x715   :  { %v17370_v50 = vpop.eup %17369  ;;  %v7031_v42 = vadd.f32 1.0, %v17368_v61  ;;  %v21928_v61 = vld [vmem:[#allocation50_spill] sm:$0xff] }
 0x716   :  { %v7037_v30 = vadd.f32 1.0, %v17370_v50  ;;  %v17372_v9 = vpop.eup %17371  ;;  %v21925_v50 = vld [vmem:[#allocation44_spill] sm:$0xff] }
 0x717   :  { %17375 = vrcp.f32 %v7031_v42  ;;  %v17374_v21 = vpop.eup %17373  ;;  %v7044_v14 = vadd.f32 1.0, %v17372_v9  ;;  %v21929_v9 = vld [vmem:[#allocation93_spill] sm:$0xff] }
 0x718   :  { %17377 = vrcp.f32 %v7037_v30  ;;  %v21926_v30 = vld [vmem:[#allocation47_spill] sm:$0xff] }
 0x719   :  { %17379 = vrcp.f32 %v7044_v14  ;;  %v21934_v14 = vld [vmem:[#allocation98_spill] sm:$0xff] }
 0x721   :  { %v17376_v36 = vpop.eup %17375 }
 0x722   :  { %v17378_v46 = vpop.eup %17377  ;;  %v7048_v34 = vmul.f32 %v17376_v36, %v17374_v21  ;;  %v21930_v21 = vld [vmem:[#allocation94_spill] sm:$0xff]  ;;  %v21931_v36 = vld [vmem:[#allocation95_spill] sm:$0xff] }
 0x723   :  { %v7047_v40 = vmul.f32 %v17378_v46, %v19646_v12  ;;  %v17380_v18 = vpop.eup %17379  ;;  %v21932_v46 = vld [vmem:[#allocation55_spill] sm:$0xff] }
 0x725   :  { %v19874_v17 = vadd.f32 %v7048_v34, %v7047_v40  ;;  %v21933_v34 = vld [vmem:[#allocation96_spill] sm:$0xff] }
 0x726   :  { %v21935_v40 = vld [vmem:[#allocation100_spill] sm:$0xff] }
 0x727   :  { %17381 = vtanh.f32 %v19874_v17 }
 0x731   :  { %v17382_v22 = vpop.eup %17381 }
 0x732   :  { %v7051_v53 = vmul.f32 %v17382_v22, %v17380_v18  ;;  %v21936_v18 = vld [vmem:[#allocation107_spill] sm:$0xff]  ;;  %v21937_v22 = vld [vmem:[#allocation97_spill] sm:$0xff] }
 0x734   :  { %v19877_v23 = vand.u32 4294901760, %v7051_v53 }
 0x736   :  { %v19880_v59 = vsub.f32 %v7051_v53, %v19877_v23  ;;  %v21938_v53 = vld [vmem:[#allocation64_spill] sm:$0xff] }
 0x738   :  { %v19883_v37 = vand.u32 4294901760, %v19880_v59 }
 0x73a   :  { %v7157_v42 = vsub.f32 %v19880_v59, %v19883_v37 }
 0x73c   :  { %v7158_v12 = vand.u32 4294901760, %v7157_v42  ;;  %v21939_v42 = vld [vmem:[#allocation65_spill] sm:$0xff] }
 0x73e   :  { %7159 = vmatmul.mubr.f32.vlgmr.msra.gmra.mrb[8].mxu0 %v7158_v12  ;;  %8014 = vmatmul.mubr.f32.vlgmr.msra.gmra.mrb[8].mxu1 %v7158_v12  ;;  %v21940_v12 = vld [vmem:[#allocation66_spill] sm:$0xff] }
 0x73f   :  { %15651 = vmatpush1.bf16.msra.mxu0 %v21671_v51  ;;  %15843 = vmatpush1.bf16.msra.mxu1 %v21672_v25 }
 0x740   :  { %15653 = vmatprep.subr.bf16.mxu0 %v21673_v5  ;;  %15845 = vmatprep.subr.bf16.mxu1 %v21674_v58 }
 0x741   :  { %7389 = vmatprep.mubr.f32.mxu0 %v21338_v6  ;;  %8244 = vmatprep.mubr.f32.mxu1 %v21338_v6 }
 0x743   :  { %15655 = vmatpush1.bf16.msra.mxu0 %v21755_v15  ;;  %15847 = vmatpush1.bf16.msra.mxu1 %v21756_v29 }
 0x744   :  { %15657 = vmatprep.subr.bf16.mxu0 %v21757_v31  ;;  %15849 = vmatprep.subr.bf16.mxu1 %v21758_v52 }
 0x747   :  { %15659 = vmatpush1.bf16.msra.mxu0 %v21759_v54  ;;  %15851 = vmatpush1.bf16.msra.mxu1 %v21840_v38 }
 0x748   :  { %15661 = vmatprep.subr.bf16.mxu0 %v21761_v57  ;;  %15853 = vmatprep.subr.bf16.mxu1 %v21762_v11 }
 0x74b   :  { %15663 = vmatpush1.bf16.msra.mxu0 %v21841_v1  ;;  %15855 = vmatpush1.bf16.msra.mxu1 %v21842_v60 }
 0x74c   :  { %15665 = vmatprep.subr.bf16.mxu0 %v21843_v35  ;;  %15857 = vmatprep.subr.bf16.mxu1 %v21844_v44 }
 0x74f   :  { %15667 = vmatpush1.bf16.msra.mxu0 %v21845_v47  ;;  %15859 = vmatpush1.bf16.msra.mxu1 %v21846_v0 }
 0x750   :  { %15669 = vmatprep.subr.bf16.mxu0 %v21925_v50  ;;  %15861 = vmatprep.subr.bf16.mxu1 %v21926_v30  ;;  %v21991_v30 = vld [vmem:[#allocation83_spill] sm:$0xff]  ;;  %v21992_v50 = vld [vmem:[#allocation85_spill] sm:$0xff] }
 0x753   :  { %15671 = vmatpush1.bf16.msra.mxu0 %v21927_v16  ;;  %15863 = vmatpush1.bf16.msra.mxu1 %v21928_v61  ;;  %v21982_v61 = vld [vmem:[#allocation20_spill] sm:$0xff]  ;;  %v21985_v16 = vld [vmem:[#allocation114_spill] sm:$0xff] }
 0x754   :  { %15673 = vmatprep.subr.bf16.mxu0 %v21929_v9  ;;  %15865 = vmatprep.subr.bf16.mxu1 %v21930_v21  ;;  %v21953_v21 = vld [vmem:[#allocation112_spill] sm:$0xff]  ;;  %v21981_v9 = vld [vmem:[#allocation19_spill] sm:$0xff] }
 0x757   :  { %15675 = vmatpush1.bf16.msra.mxu0 %v21931_v36  ;;  %15867 = vmatpush1.bf16.msra.mxu1 %v21932_v46  ;;  %v21941_v46 = vld [vmem:[#allocation99_spill] sm:$0xff]  ;;  %v21952_v36 = vld [vmem:[#allocation121_spill] sm:$0xff] }
 0x758   :  { %15677 = vmatprep.subr.bf16.mxu0 %v21933_v34  ;;  %15869 = vmatprep.subr.bf16.mxu1 %v21934_v14  ;;  %v21942_v34 = vld [vmem:[#allocation101_spill] sm:$0xff]  ;;  %v21947_v14 = vld [vmem:[#allocation106_spill] sm:$0xff] }
 0x75b   :  { %15679 = vmatpush1.bf16.msra.mxu0 %v21935_v40  ;;  %15871 = vmatpush1.bf16.msra.mxu1 %v21936_v18  ;;  %v21943_v18 = vld [vmem:[#allocation102_spill] sm:$0xff]  ;;  %v21946_v40 = vld [vmem:[#allocation105_spill] sm:$0xff] }
 0x75c   :  { %15681 = vmatprep.subr.bf16.mxu0 %v21937_v22  ;;  %15873 = vmatprep.subr.bf16.mxu1 %v21938_v53  ;;  %v21944_v22 = vld [vmem:[#allocation103_spill] sm:$0xff]  ;;  %v21945_v53 = vld [vmem:[#allocation104_spill] sm:$0xff] }
 0x75e   :  { %7391 = vmatmul.mubr.f32.vlgmr.msra.gmra.mrb[8].mxu0 %v19877_v23  ;;  %8246 = vmatmul.mubr.f32.vlgmr.msra.gmra.mrb[8].mxu1 %v19877_v23 }
 0x75f   :  { %15683 = vmatpush1.bf16.msra.mxu0 %v21939_v42  ;;  %15875 = vmatpush1.bf16.msra.mxu1 %v21940_v12  ;;  %v21948_v42 = vld [vmem:[#allocation108_spill] sm:$0xff]  ;;  %v21949_v12 = vld [vmem:[#allocation109_spill] sm:$0xff] }
 0x760   :  { %15685 = vmatprep.subr.bf16.mxu0 %v21941_v46  ;;  %15877 = vmatprep.subr.bf16.mxu1 %v21942_v34  ;;  %v21950_v46 = vld [vmem:[#allocation110_spill] sm:$0xff]  ;;  %v21951_v34 = vld [vmem:[#allocation111_spill] sm:$0xff] }
 0x761   :  { %7525 = vmatprep.mubr.f32.mxu0 %v21338_v6  ;;  %8380 = vmatprep.mubr.f32.mxu1 %v21338_v6 }
 0x763   :  { %15687 = vmatpush1.bf16.msra.mxu0 %v21943_v18  ;;  %15879 = vmatpush1.bf16.msra.mxu1 %v21944_v22  ;;  %v21954_v18 = vld [vmem:[#allocation124_spill] sm:$0xff]  ;;  %v21955_v22 = vld [vmem:[#allocation125_spill] sm:$0xff] }
 0x764   :  { %15689 = vmatprep.subr.bf16.mxu0 %v21945_v53  ;;  %15881 = vmatprep.subr.bf16.mxu1 %v21946_v40  ;;  %v21956_v53 = vld [vmem:[#allocation127_spill] sm:$0xff]  ;;  %v21957_v40 = vld [vmem:[#allocation126_spill] sm:$0xff] }
 0x767   :  { %15691 = vmatpush1.bf16.msra.mxu0 %v21947_v14  ;;  %15883 = vmatpush1.bf16.msra.mxu1 %v21948_v42  ;;  %v21958_v14 = vld [vmem:[#allocation128_spill] sm:$0xff]  ;;  %v21959_v42 = vld [vmem:[#allocation129_spill] sm:$0xff] }
 0x768   :  { %15693 = vmatprep.subr.bf16.mxu0 %v21949_v12  ;;  %15885 = vmatprep.subr.bf16.mxu1 %v21950_v46  ;;  %v21960_v12 = vld [vmem:[#allocation131_spill] sm:$0xff]  ;;  %v21961_v46 = vld [vmem:[#allocation130_spill] sm:$0xff] }
 0x76b   :  { %15695 = vmatpush1.bf16.msra.mxu0 %v21951_v34  ;;  %15887 = vmatpush1.bf16.msra.mxu1 %v21952_v36  ;;  %v21962_v34 = vld [vmem:[#allocation132_spill] sm:$0xff]  ;;  %v21963_v36 = vld [vmem:[#allocation133_spill] sm:$0xff] }
 0x76c   :  { %15697 = vmatprep.subr.bf16.mxu0 %v21953_v21  ;;  %15889 = vmatprep.subr.bf16.mxu1 %v21954_v18  ;;  %v21964_v21 = vld [vmem:[#allocation135_spill] sm:$0xff]  ;;  %v21965_v18 = vld [vmem:[#allocation134_spill] sm:$0xff] }
 0x76f   :  { %15699 = vmatpush1.bf16.msra.mxu0 %v21955_v22  ;;  %15891 = vmatpush1.bf16.msra.mxu1 %v21956_v53  ;;  %v21966_v22 = vld [vmem:[#allocation136_spill] sm:$0xff]  ;;  %v21967_v53 = vld [vmem:[#allocation137_spill] sm:$0xff] }
 0x770   :  { %15701 = vmatprep.subr.bf16.mxu0 %v21957_v40  ;;  %15893 = vmatprep.subr.bf16.mxu1 %v21958_v14  ;;  %v21968_v40 = vld [vmem:[#allocation138_spill] sm:$0xff] }
 0x771   :  { %v21980_v14 = vld [vmem:[#allocation18_spill] sm:$0xff] }
 0x773   :  { %15703 = vmatpush1.bf16.msra.mxu0 %v21959_v42  ;;  %15895 = vmatpush1.bf16.msra.mxu1 %v21960_v12  ;;  %v21978_v12 = vld [vmem:[#allocation16_spill] sm:$0xff]  ;;  %v21979_v42 = vld [vmem:[#allocation17_spill] sm:$0xff] }
 0x774   :  { %15705 = vmatprep.subr.bf16.mxu0 %v21961_v46  ;;  %15897 = vmatprep.subr.bf16.mxu1 %v21962_v34  ;;  %v21976_v34 = vld [vmem:[#allocation14_spill] sm:$0xff]  ;;  %v21977_v46 = vld [vmem:[#allocation15_spill] sm:$0xff] }
 0x777   :  { %15707 = vmatpush1.bf16.msra.mxu0 %v21963_v36  ;;  %15899 = vmatpush1.bf16.msra.mxu1 %v21964_v21  ;;  %v21974_v21 = vld [vmem:[#allocation62_spill] sm:$0xff]  ;;  %v21975_v36 = vld [vmem:[#allocation63_spill] sm:$0xff] }
 0x778   :  { %15709 = vmatprep.subr.bf16.mxu0 %v21965_v18  ;;  %15901 = vmatprep.subr.bf16.mxu1 %v21966_v22  ;;  %v21972_v22 = vld [vmem:[#allocation60_spill] sm:$0xff]  ;;  %v21973_v18 = vld [vmem:[#allocation61_spill] sm:$0xff] }
 0x77b   :  { %15711 = vmatpush1.bf16.msra.mxu0 %v21967_v53  ;;  %15903 = vmatpush1.bf16.msra.mxu1 %v21968_v40  ;;  %v21970_v40 = vld [vmem:[#allocation58_spill] sm:$0xff]  ;;  %v21971_v53 = vld [vmem:[#allocation59_spill] sm:$0xff] }
 0x77c   :  { %15713 = vmatprep.subr.bf16.mxu0 %v21593_v45  ;;  %15905 = vmatprep.subr.bf16.mxu1 %v21594_v32 }
 0x77e   :  { %7528 = vmatmul.mubr.f32.vlgmr.msra.gmra.mrb[8].mxu0 %v19880_v59  ;;  %8383 = vmatmul.mubr.f32.vlgmr.msra.gmra.mrb[8].mxu1 %v19880_v59  ;;  %v21969_v59 = vld [vmem:[#allocation57_spill] sm:$0xff] }
 0x77f   :  { %15715 = vmatpush1.bf16.msra.mxu0 %v21595_v3  ;;  %15907 = vmatpush1.bf16.msra.mxu1 %v21597_v33 }
 0x780   :  { %15717 = vmatprep.subr.bf16.mxu0 %v21596_v56  ;;  %15909 = vmatprep.subr.bf16.mxu1 %v21598_v7 }
 0x781   :  { %7630 = vmatprep.mubr.f32.mxu0 %v21338_v6  ;;  %8485 = vmatprep.mubr.f32.mxu1 %v21338_v6 }
 0x783   :  { %15719 = vmatpush1.bf16.msra.mxu0 %v21599_v20  ;;  %15911 = vmatpush1.bf16.msra.mxu1 %v21601_v39 }
 0x784   :  { %15721 = vmatprep.subr.bf16.mxu0 %v21600_v28  ;;  %15913 = vmatprep.subr.bf16.mxu1 %v21602_v62 }
 0x787   :  { %15723 = vmatpush1.bf16.msra.mxu0 %v21603_v55  ;;  %15915 = vmatpush1.bf16.msra.mxu1 %v21605_v43 }
 0x788   :  { %15725 = vmatprep.subr.bf16.mxu0 %v21604_v24  ;;  %15917 = vmatprep.subr.bf16.mxu1 %v21606_v19 }
 0x78b   :  { %15727 = vmatpush1.bf16.msra.mxu0 %v21607_v10  ;;  %15919 = vmatpush1.bf16.msra.mxu1 %v21609_v49 }
 0x78c   :  { %15729 = vmatprep.subr.bf16.mxu0 %v21608_v48  ;;  %15921 = vmatprep.subr.bf16.mxu1 %v21610_v2 }
 0x78f   :  { %15731 = vmatpush1.bf16.msra.mxu0 %v21611_v8  ;;  %15923 = vmatpush1.bf16.msra.mxu1 %v21613_v41 }
 0x790   :  { %15733 = vmatprep.subr.bf16.mxu0 %v21612_v4  ;;  %15925 = vmatprep.subr.bf16.mxu1 %v21614_v13 }
 0x793   :  { %15735 = vmatpush1.bf16.msra.mxu0 %v21615_v27  ;;  %15927 = vmatpush1.bf16.msra.mxu1 %v21617_v63 }
 0x794   :  { %15737 = vmatprep.subr.bf16.mxu0 %v21616_v26  ;;  %15929 = vmatprep.subr.bf16.mxu1 %v21969_v59 }
 0x797   :  { %15739 = vmatpush1.bf16.msra.mxu0 %v21970_v40  ;;  %15931 = vmatpush1.bf16.msra.mxu1 %v21971_v53 }
 0x798   :  { %15741 = vmatprep.subr.bf16.mxu0 %v21972_v22  ;;  %15933 = vmatprep.subr.bf16.mxu1 %v21973_v18 }
 0x79b   :  { %15743 = vmatpush1.bf16.msra.mxu0 %v21974_v21  ;;  %15935 = vmatpush1.bf16.msra.mxu1 %v21975_v36 }
 0x79c   :  { %15745 = vmatprep.subr.bf16.mxu0 %v21976_v34  ;;  %15937 = vmatprep.subr.bf16.mxu1 %v21977_v46  ;;  %v21983_v34 = vld [vmem:[#allocation22_spill] sm:$0xff]  ;;  %v21984_v46 = vld [vmem:[#allocation113_spill] sm:$0xff] }
 0x79e   :  { %7634 = vmatmul.mubr.f32.vlgmr.msra.gmra.mrb[8].mxu0 %v19883_v37  ;;  %8489 = vmatmul.mubr.f32.vlgmr.msra.gmra.mrb[8].mxu1 %v19883_v37  ;;  %v21986_v37 = vld [vmem:[#allocation115_spill] sm:$0xff] }
 0x79f   :  { %15747 = vmatpush1.bf16.msra.mxu0 %v21978_v12  ;;  %15939 = vmatpush1.bf16.msra.mxu1 %v21979_v42  ;;  %v21987_v12 = vld [vmem:[#allocation116_spill] sm:$0xff]  ;;  %v21988_v42 = vld [vmem:[#allocation117_spill] sm:$0xff] }
 0x7a0   :  { %15749 = vmatprep.subr.bf16.mxu0 %v21980_v14  ;;  %15941 = vmatprep.subr.bf16.mxu1 %v21981_v9  ;;  %v21989_v14 = vld [vmem:[#allocation118_spill] sm:$0xff]  ;;  %v21990_v9 = vld [vmem:[#allocation119_spill] sm:$0xff] }
 0x7a1   :  { %7800 = vmatprep.mubr.f32.mxu0 %v21338_v6  ;;  %8655 = vmatprep.mubr.f32.mxu1 %v21338_v6 }
 0x7a3   :  { %15751 = vmatpush1.bf16.msra.mxu0 %v21982_v61  ;;  %15943 = vmatpush1.bf16.msra.mxu1 %v21983_v34  ;;  %v21993_v61 = vld [vmem:[#allocation26_spill] sm:$0xff]  ;;  %v21994_v34 = vld [vmem:[#allocation27_spill] sm:$0xff] }
 0x7a4   :  { %15753 = vmatprep.subr.bf16.mxu0 %v21984_v46  ;;  %15945 = vmatprep.subr.bf16.mxu1 %v21985_v16  ;;  %v21995_v46 = vld [vmem:[#allocation29_spill] sm:$0xff]  ;;  %v21996_v16 = vld [vmem:[#allocation31_spill] sm:$0xff] }
 0x7a7   :  { %15755 = vmatpush1.bf16.msra.mxu0 %v21986_v37  ;;  %15947 = vmatpush1.bf16.msra.mxu1 %v21987_v12  ;;  %v21997_v37 = vld [vmem:[#allocation34_spill] sm:$0xff]  ;;  %v21998_v12 = vld [vmem:[#allocation35_spill] sm:$0xff] }
 0x7a8   :  { %15757 = vmatprep.subr.bf16.mxu0 %v21988_v42  ;;  %15949 = vmatprep.subr.bf16.mxu1 %v21989_v14  ;;  %v21999_v42 = vld [vmem:[#allocation36_spill] sm:$0xff]  ;;  %v22000_v14 = vld [vmem:[#allocation38_spill] sm:$0xff] }
 0x7ab   :  { %15759 = vmatpush1.bf16.msra.mxu0 %v21990_v9  ;;  %15951 = vmatpush1.bf16.msra.mxu1 %v21991_v30  ;;  %v22001_v9 = vld [vmem:[#allocation39_spill] sm:$0xff]  ;;  %v22002_v30 = vld [vmem:[#allocation40_spill] sm:$0xff] }
 0x7ac   :  { %15761 = vmatprep.subr.bf16.mxu0 %v21992_v50  ;;  %15953 = vmatprep.subr.bf16.mxu1 %v21993_v61  ;;  %v22003_v50 = vld [vmem:[#allocation42_spill] sm:$0xff]  ;;  %v22004_v61 = vld [vmem:[#allocation92_spill] sm:$0xff] }
 0x7af   :  { %15763 = vmatpush1.bf16.msra.mxu0 %v21994_v34  ;;  %15955 = vmatpush1.bf16.msra.mxu1 %v21995_v46  ;;  %v22005_v34 = vld [vmem:[#allocation120_spill] sm:$0xff]  ;;  %v22006_v46 = vld [vmem:[#allocation122_spill] sm:$0xff] }
 0x7b0   :  { %15765 = vmatprep.subr.bf16.mxu0 %v21996_v16  ;;  %15957 = vmatprep.subr.bf16.mxu1 %v21997_v37  ;;  %v22007_v16 = vld [vmem:[#allocation123_spill] sm:$0xff] }
 0x7b3   :  { %15767 = vmatpush1.bf16.msra.mxu0 %v21998_v12  ;;  %15959 = vmatpush1.bf16.msra.mxu1 %v21999_v42 }
 0x7b4   :  { %15769 = vmatprep.subr.bf16.mxu0 %v22000_v14  ;;  %15961 = vmatprep.subr.bf16.mxu1 %v22001_v9 }
 0x7b7   :  { %15771 = vmatpush1.bf16.msra.mxu0 %v22002_v30  ;;  %15963 = vmatpush1.bf16.msra.mxu1 %v22003_v50 }
 0x7b8   :  { %15773 = vmatprep.subr.bf16.mxu0 %v22004_v61  ;;  %15965 = vmatprep.subr.bf16.mxu1 %v22005_v34  ;;  %v7054_v34 = vld [vmem:[#allocation2 + $0x88] sm:$0xff] }
 0x7bb   :  { %15775 = vmatpush1.bf16.msra.mxu0 %v22006_v46  ;;  %15967 = vmatpush1.bf16.msra.mxu1 %v22007_v16  ;;  %v22009_v16 = vld [vmem:[#allocation68_spill] sm:$0xff] }
 0x7bc   :  { %15777 = vmatprep.subr.bf16.mxu0 %v21593_v45  ;;  %15969 = vmatprep.subr.bf16.mxu1 %v21594_v32  ;;  %v7053_v46 = vld [vmem:[#allocation2 + $0x80] sm:$0xff] }
 0x7be   :  { %7802 = vmatmul.mubr.f32.vlgmr.msra.gmra.mrb[8].mxu0 %v19877_v23  ;;  %8657 = vmatmul.mubr.f32.vlgmr.msra.gmra.mrb[8].mxu1 %v19877_v23 }
 0x7bf   :  { %15779 = vmatpush1.bf16.msra.mxu0 %v21595_v3  ;;  %15971 = vmatpush1.bf16.msra.mxu1 %v21597_v33 }
 0x7c0   :  { %15781 = vmatprep.subr.bf16.mxu0 %v21596_v56  ;;  %15973 = vmatprep.subr.bf16.mxu1 %v21598_v7 }
 0x7c1   :  { %7904 = vmatprep.mubr.f32.mxu0 %v21338_v6  ;;  %8759 = vmatprep.mubr.f32.mxu1 %v21338_v6 }
 0x7c3   :  { %15783 = vmatpush1.bf16.msra.mxu0 %v21599_v20  ;;  %15975 = vmatpush1.bf16.msra.mxu1 %v21601_v39 }
 0x7c4   :  { %15785 = vmatprep.subr.bf16.mxu0 %v21600_v28  ;;  %15977 = vmatprep.subr.bf16.mxu1 %v21602_v62 }
 0x7c7   :  { %15787 = vmatpush1.bf16.msra.mxu0 %v21603_v55  ;;  %15979 = vmatpush1.bf16.msra.mxu1 %v21605_v43 }
 0x7c8   :  { %15789 = vmatprep.subr.bf16.mxu0 %v21604_v24  ;;  %15981 = vmatprep.subr.bf16.mxu1 %v21606_v19 }
 0x7cb   :  { %15791 = vmatpush1.bf16.msra.mxu0 %v21607_v10  ;;  %15983 = vmatpush1.bf16.msra.mxu1 %v21609_v49 }
 0x7cc   :  { %15793 = vmatprep.subr.bf16.mxu0 %v21608_v48  ;;  %15985 = vmatprep.subr.bf16.mxu1 %v21610_v2 }
 0x7cf   :  { %15795 = vmatpush1.bf16.msra.mxu0 %v21611_v8  ;;  %15987 = vmatpush1.bf16.msra.mxu1 %v21613_v41 }
 0x7d0   :  { %15797 = vmatprep.subr.bf16.mxu0 %v21612_v4  ;;  %15989 = vmatprep.subr.bf16.mxu1 %v21614_v13 }
 0x7d3   :  { %15799 = vmatpush1.bf16.msra.mxu0 %v21615_v27  ;;  %15991 = vmatpush1.bf16.msra.mxu1 %v21617_v63 }
 0x7d4   :  { %15801 = vmatprep.subr.bf16.mxu0 %v21616_v26  ;;  %15993 = vmatprep.subr.bf16.mxu1 %v21969_v59 }
 0x7d7   :  { %15803 = vmatpush1.bf16.msra.mxu0 %v21970_v40  ;;  %15995 = vmatpush1.bf16.msra.mxu1 %v21971_v53 }
 0x7d8   :  { %15805 = vmatprep.subr.bf16.mxu0 %v21972_v22  ;;  %15997 = vmatprep.subr.bf16.mxu1 %v21973_v18 }
 0x7db   :  { %15807 = vmatpush1.bf16.msra.mxu0 %v21974_v21  ;;  %15999 = vmatpush1.bf16.msra.mxu1 %v21975_v36 }
 0x7dc   :  { %16001 = vmatprep.subr.bf16.mxu0 %v21593_v45  ;;  %16193 = vmatprep.subr.bf16.mxu1 %v21594_v32 }
 0x7de   :  { %7906 = vmatmul.mubr.f32.vlgmr.msra.gmra.mrb[8].mxu0 %v19877_v23  ;;  %8761 = vmatmul.mubr.f32.vlgmr.msra.gmra.mrb[8].mxu1 %v19877_v23  ;;  %v22008_v23 = vld [vmem:[#allocation67_spill] sm:$0xff] }
 0x7df   :  { %16003 = vmatpush1.bf16.msra.mxu0 %v21595_v3  ;;  %16195 = vmatpush1.bf16.msra.mxu1 %v21597_v33 }
 0x7e0   :  { %16005 = vmatprep.subr.bf16.mxu0 %v21596_v56  ;;  %16197 = vmatprep.subr.bf16.mxu1 %v21598_v7 }
 0x7e1   :  { %8896 = vmatprep.mubr.f32.mxu0 %v21338_v6  ;;  %9751 = vmatprep.mubr.f32.mxu1 %v21338_v6 }
 0x7e3   :  { %16007 = vmatpush1.bf16.msra.mxu0 %v21599_v20  ;;  %16199 = vmatpush1.bf16.msra.mxu1 %v21601_v39 }
 0x7e4   :  { %16009 = vmatprep.subr.bf16.mxu0 %v21600_v28  ;;  %16201 = vmatprep.subr.bf16.mxu1 %v21602_v62 }
 0x7e7   :  { %16011 = vmatpush1.bf16.msra.mxu0 %v21603_v55  ;;  %16203 = vmatpush1.bf16.msra.mxu1 %v21605_v43 }
 0x7e8   :  { %16013 = vmatprep.subr.bf16.mxu0 %v21604_v24  ;;  %16205 = vmatprep.subr.bf16.mxu1 %v21606_v19 }
 0x7eb   :  { %16015 = vmatpush1.bf16.msra.mxu0 %v21607_v10  ;;  %16207 = vmatpush1.bf16.msra.mxu1 %v21609_v49 }
 0x7ec   :  { %16017 = vmatprep.subr.bf16.mxu0 %v21608_v48  ;;  %16209 = vmatprep.subr.bf16.mxu1 %v21610_v2 }
 0x7ef   :  { %16019 = vmatpush1.bf16.msra.mxu0 %v21611_v8  ;;  %16211 = vmatpush1.bf16.msra.mxu1 %v21613_v41 }
 0x7f0   :  { %16021 = vmatprep.subr.bf16.mxu0 %v21612_v4  ;;  %16213 = vmatprep.subr.bf16.mxu1 %v21614_v13 }
 0x7f3   :  { %16023 = vmatpush1.bf16.msra.mxu0 %v21615_v27  ;;  %16215 = vmatpush1.bf16.msra.mxu1 %v21617_v63 }
 0x7f4   :  { %16025 = vmatprep.subr.bf16.mxu0 %v21616_v26  ;;  %16217 = vmatprep.subr.bf16.mxu1 %v21969_v59 }
 0x7f7   :  { %16027 = vmatpush1.bf16.msra.mxu0 %v21970_v40  ;;  %16219 = vmatpush1.bf16.msra.mxu1 %v21971_v53 }
 0x7f8   :  { %16029 = vmatprep.subr.bf16.mxu0 %v21972_v22  ;;  %16221 = vmatprep.subr.bf16.mxu1 %v21973_v18  ;;  %v7056_v18 = vld [vmem:[#allocation2 + $0x98] sm:$0xff]  ;;  %v7055_v22 = vld [vmem:[#allocation2 + $0x90] sm:$0xff] }
 0x7fb   :  { %16031 = vmatpush1.bf16.msra.mxu0 %v21974_v21  ;;  %16223 = vmatpush1.bf16.msra.mxu1 %v21975_v36 }
 0x7fc   :  { %16033 = vmatprep.subr.bf16.mxu0 %v22008_v23  ;;  %16225 = vmatprep.subr.bf16.mxu1 %v22009_v16 }
 0x8b1   :  { %v7907_v61 = vpop.f32.mrb[8].mxu0  ;;  %v8762_v50 = vpop.f32.mrb[8].mxu1 }
 0x8b2   :  { %v8767_v30 = vadd.f32 %v7907_v61, %v7053_v46  ;;  %v7909_v9 = vpop.f32.mrb[9].mxu0  ;;  %v8764_v14 = vpop.f32.mrb[9].mxu1  ;;  %v8769_v53 = vadd.f32 %v8762_v50, %v7055_v22 }
 0x8b3   :  { %v8768_v42 = vadd.f32 %v7909_v9, %v7054_v34  ;;  %v8770_v21 = vadd.f32 %v8764_v14, %v7056_v18 }
 0x8b4   :  { %v14068_v12 = vmul.f32 -1.442695, %v8767_v30 }
 0x8b5   :  { %v14069_v37 = vmul.f32 -1.442695, %v8768_v42  ;;  %v14070_v36 = vmul.f32 -1.442695, %v8770_v21 }
 0x8b6   :  { %17383 = vpow2.f32 %v14068_v12 }
 0x8b7   :  { %17385 = vpow2.f32 %v14069_v37  ;;  %v22012_v37 = vld [vmem:[#allocation49_spill] sm:$0xff] }
 0x8b8   :  { %17387 = vpow2.f32 %v14070_v36 }
 0x8b9   :  { %17389 = vtanh.f32 %v8769_v53  ;;  %v22010_v53 = vld [vmem:[#allocation44_spill] sm:$0xff] }
 0x8c0   :  { %v17384_v23 = vpop.eup %17383 }
 0x8c1   :  { %v17386_v40 = vpop.eup %17385  ;;  %v8774_v16 = vadd.f32 1.0, %v17384_v23  ;;  %v22013_v23 = vld [vmem:[#allocation50_spill] sm:$0xff] }
 0x8c2   :  { %v8780_v59 = vadd.f32 1.0, %v17386_v40  ;;  %v17388_v61 = vpop.eup %17387 }
 0x8c3   :  { %17391 = vrcp.f32 %v8774_v16  ;;  %v17390_v46 = vpop.eup %17389  ;;  %v8787_v42 = vadd.f32 1.0, %v17388_v61  ;;  %v22014_v61 = vld [vmem:[#allocation93_spill] sm:$0xff] }
 0x8c4   :  { %17393 = vrcp.f32 %v8780_v59  ;;  %v22011_v59 = vld [vmem:[#allocation47_spill] sm:$0xff] }
 0x8c5   :  { %17395 = vrcp.f32 %v8787_v42  ;;  %v22019_v42 = vld [vmem:[#allocation98_spill] sm:$0xff] }
 0x8cd   :  { %v17392_v9 = vpop.eup %17391 }
 0x8ce   :  { %v17394_v30 = vpop.eup %17393  ;;  %v8791_v34 = vmul.f32 %v17392_v9, %v17390_v46  ;;  %v22015_v46 = vld [vmem:[#allocation94_spill] sm:$0xff]  ;;  %v22016_v9 = vld [vmem:[#allocation95_spill] sm:$0xff] }
 0x8cf   :  { %v8790_v12 = vmul.f32 %v17394_v30, %v19874_v17  ;;  %v17396_v50 = vpop.eup %17395  ;;  %v22017_v30 = vld [vmem:[#allocation55_spill] sm:$0xff] }
 0x8d1   :  { %v20102_v14 = vadd.f32 %v8791_v34, %v8790_v12  ;;  %v22018_v34 = vld [vmem:[#allocation96_spill] sm:$0xff] }
 0x8d2   :  { %v22020_v12 = vld [vmem:[#allocation100_spill] sm:$0xff] }
 0x8d3   :  { %17397 = vtanh.f32 %v20102_v14 }
 0x8dd   :  { %v17398_v21 = vpop.eup %17397 }
 0x8de   :  { %v8794_v36 = vmul.f32 %v17398_v21, %v17396_v50  ;;  %v22021_v50 = vld [vmem:[#allocation107_spill] sm:$0xff]  ;;  %v22022_v21 = vld [vmem:[#allocation97_spill] sm:$0xff] }
 0x8e0   :  { %v20105_v18 = vand.u32 4294901760, %v8794_v36 }
 0x8e2   :  { %v20108_v16 = vsub.f32 %v8794_v36, %v20105_v18  ;;  %v22023_v36 = vld [vmem:[#allocation64_spill] sm:$0xff] }
 0x8e4   :  { %v20111_v40 = vand.u32 4294901760, %v20108_v16 }
 0x8e6   :  { %v8900_v22 = vsub.f32 %v20108_v16, %v20111_v40 }
 0x8e8   :  { %v8901_v17 = vand.u32 4294901760, %v8900_v22  ;;  %v22024_v22 = vld [vmem:[#allocation65_spill] sm:$0xff] }
 0x8ea   :  { %8902 = vmatmul.mubr.f32.vlgmr.msra.gmra.mrb[10].mxu0 %v8901_v17  ;;  %9757 = vmatmul.mubr.f32.vlgmr.msra.gmra.mrb[10].mxu1 %v8901_v17  ;;  %v22025_v17 = vld [vmem:[#allocation66_spill] sm:$0xff] }
 0x8eb   :  { %16035 = vmatpush1.bf16.msra.mxu0 %v21671_v51  ;;  %16227 = vmatpush1.bf16.msra.mxu1 %v21672_v25 }
 0x8ec   :  { %16037 = vmatprep.subr.bf16.mxu0 %v21673_v5  ;;  %16229 = vmatprep.subr.bf16.mxu1 %v21674_v58 }
 0x8ed   :  { %9132 = vmatprep.mubr.f32.mxu0 %v21338_v6  ;;  %9987 = vmatprep.mubr.f32.mxu1 %v21338_v6 }
 0x8ef   :  { %16039 = vmatpush1.bf16.msra.mxu0 %v21755_v15  ;;  %16231 = vmatpush1.bf16.msra.mxu1 %v21756_v29 }
 0x8f0   :  { %16041 = vmatprep.subr.bf16.mxu0 %v21757_v31  ;;  %16233 = vmatprep.subr.bf16.mxu1 %v21758_v52 }
 0x8f3   :  { %16043 = vmatpush1.bf16.msra.mxu0 %v21759_v54  ;;  %16235 = vmatpush1.bf16.msra.mxu1 %v21840_v38 }
 0x8f4   :  { %16045 = vmatprep.subr.bf16.mxu0 %v21761_v57  ;;  %16237 = vmatprep.subr.bf16.mxu1 %v21762_v11 }
 0x8f7   :  { %16047 = vmatpush1.bf16.msra.mxu0 %v21841_v1  ;;  %16239 = vmatpush1.bf16.msra.mxu1 %v21842_v60 }
 0x8f8   :  { %16049 = vmatprep.subr.bf16.mxu0 %v21843_v35  ;;  %16241 = vmatprep.subr.bf16.mxu1 %v21844_v44 }
 0x8fb   :  { %16051 = vmatpush1.bf16.msra.mxu0 %v21845_v47  ;;  %16243 = vmatpush1.bf16.msra.mxu1 %v21846_v0 }
 0x8fc   :  { %16053 = vmatprep.subr.bf16.mxu0 %v22010_v53  ;;  %16245 = vmatprep.subr.bf16.mxu1 %v22011_v59  ;;  %v22076_v59 = vld [vmem:[#allocation83_spill] sm:$0xff]  ;;  %v22077_v53 = vld [vmem:[#allocation85_spill] sm:$0xff] }
 0x8ff   :  { %16055 = vmatpush1.bf16.msra.mxu0 %v22012_v37  ;;  %16247 = vmatpush1.bf16.msra.mxu1 %v22013_v23  ;;  %v22067_v23 = vld [vmem:[#allocation20_spill] sm:$0xff]  ;;  %v22070_v37 = vld [vmem:[#allocation114_spill] sm:$0xff] }
 0x900   :  { %16057 = vmatprep.subr.bf16.mxu0 %v22014_v61  ;;  %16249 = vmatprep.subr.bf16.mxu1 %v22015_v46  ;;  %v22038_v46 = vld [vmem:[#allocation112_spill] sm:$0xff]  ;;  %v22066_v61 = vld [vmem:[#allocation19_spill] sm:$0xff] }
 0x903   :  { %16059 = vmatpush1.bf16.msra.mxu0 %v22016_v9  ;;  %16251 = vmatpush1.bf16.msra.mxu1 %v22017_v30  ;;  %v22026_v30 = vld [vmem:[#allocation99_spill] sm:$0xff]  ;;  %v22037_v9 = vld [vmem:[#allocation121_spill] sm:$0xff] }
 0x904   :  { %16061 = vmatprep.subr.bf16.mxu0 %v22018_v34  ;;  %16253 = vmatprep.subr.bf16.mxu1 %v22019_v42  ;;  %v22027_v34 = vld [vmem:[#allocation101_spill] sm:$0xff]  ;;  %v22032_v42 = vld [vmem:[#allocation106_spill] sm:$0xff] }
 0x907   :  { %16063 = vmatpush1.bf16.msra.mxu0 %v22020_v12  ;;  %16255 = vmatpush1.bf16.msra.mxu1 %v22021_v50  ;;  %v22028_v50 = vld [vmem:[#allocation102_spill] sm:$0xff]  ;;  %v22031_v12 = vld [vmem:[#allocation105_spill] sm:$0xff] }
 0x908   :  { %16065 = vmatprep.subr.bf16.mxu0 %v22022_v21  ;;  %16257 = vmatprep.subr.bf16.mxu1 %v22023_v36  ;;  %v22029_v21 = vld [vmem:[#allocation103_spill] sm:$0xff]  ;;  %v22030_v36 = vld [vmem:[#allocation104_spill] sm:$0xff] }
 0x90a   :  { %9134 = vmatmul.mubr.f32.vlgmr.msra.gmra.mrb[10].mxu0 %v20105_v18  ;;  %9989 = vmatmul.mubr.f32.vlgmr.msra.gmra.mrb[10].mxu1 %v20105_v18 }
 0x90b   :  { %16067 = vmatpush1.bf16.msra.mxu0 %v22024_v22  ;;  %16259 = vmatpush1.bf16.msra.mxu1 %v22025_v17  ;;  %v22033_v22 = vld [vmem:[#allocation108_spill] sm:$0xff]  ;;  %v22034_v17 = vld [vmem:[#allocation109_spill] sm:$0xff] }
 0x90c   :  { %16069 = vmatprep.subr.bf16.mxu0 %v22026_v30  ;;  %16261 = vmatprep.subr.bf16.mxu1 %v22027_v34  ;;  %v22035_v30 = vld [vmem:[#allocation110_spill] sm:$0xff]  ;;  %v22036_v34 = vld [vmem:[#allocation111_spill] sm:$0xff] }
 0x90d   :  { %9268 = vmatprep.mubr.f32.mxu0 %v21338_v6  ;;  %10123 = vmatprep.mubr.f32.mxu1 %v21338_v6 }
 0x90f   :  { %16071 = vmatpush1.bf16.msra.mxu0 %v22028_v50  ;;  %16263 = vmatpush1.bf16.msra.mxu1 %v22029_v21  ;;  %v22039_v50 = vld [vmem:[#allocation124_spill] sm:$0xff]  ;;  %v22040_v21 = vld [vmem:[#allocation125_spill] sm:$0xff] }
 0x910   :  { %16073 = vmatprep.subr.bf16.mxu0 %v22030_v36  ;;  %16265 = vmatprep.subr.bf16.mxu1 %v22031_v12  ;;  %v22041_v36 = vld [vmem:[#allocation127_spill] sm:$0xff]  ;;  %v22042_v12 = vld [vmem:[#allocation126_spill] sm:$0xff] }
 0x913   :  { %16075 = vmatpush1.bf16.msra.mxu0 %v22032_v42  ;;  %16267 = vmatpush1.bf16.msra.mxu1 %v22033_v22  ;;  %v22043_v42 = vld [vmem:[#allocation128_spill] sm:$0xff]  ;;  %v22044_v22 = vld [vmem:[#allocation129_spill] sm:$0xff] }
 0x914   :  { %16077 = vmatprep.subr.bf16.mxu0 %v22034_v17  ;;  %16269 = vmatprep.subr.bf16.mxu1 %v22035_v30  ;;  %v22045_v17 = vld [vmem:[#allocation131_spill] sm:$0xff]  ;;  %v22046_v30 = vld [vmem:[#allocation130_spill] sm:$0xff] }
 0x917   :  { %16079 = vmatpush1.bf16.msra.mxu0 %v22036_v34  ;;  %16271 = vmatpush1.bf16.msra.mxu1 %v22037_v9  ;;  %v22047_v34 = vld [vmem:[#allocation132_spill] sm:$0xff]  ;;  %v22048_v9 = vld [vmem:[#allocation133_spill] sm:$0xff] }
 0x918   :  { %16081 = vmatprep.subr.bf16.mxu0 %v22038_v46  ;;  %16273 = vmatprep.subr.bf16.mxu1 %v22039_v50  ;;  %v22049_v46 = vld [vmem:[#allocation135_spill] sm:$0xff]  ;;  %v22050_v50 = vld [vmem:[#allocation134_spill] sm:$0xff] }
 0x91b   :  { %16083 = vmatpush1.bf16.msra.mxu0 %v22040_v21  ;;  %16275 = vmatpush1.bf16.msra.mxu1 %v22041_v36  ;;  %v22051_v21 = vld [vmem:[#allocation136_spill] sm:$0xff]  ;;  %v22052_v36 = vld [vmem:[#allocation137_spill] sm:$0xff] }
 0x91c   :  { %16085 = vmatprep.subr.bf16.mxu0 %v22042_v12  ;;  %16277 = vmatprep.subr.bf16.mxu1 %v22043_v42  ;;  %v22053_v12 = vld [vmem:[#allocation138_spill] sm:$0xff] }
 0x91d   :  { %v22065_v42 = vld [vmem:[#allocation18_spill] sm:$0xff] }
 0x91f   :  { %16087 = vmatpush1.bf16.msra.mxu0 %v22044_v22  ;;  %16279 = vmatpush1.bf16.msra.mxu1 %v22045_v17  ;;  %v22063_v17 = vld [vmem:[#allocation16_spill] sm:$0xff]  ;;  %v22064_v22 = vld [vmem:[#allocation17_spill] sm:$0xff] }
 0x920   :  { %16089 = vmatprep.subr.bf16.mxu0 %v22046_v30  ;;  %16281 = vmatprep.subr.bf16.mxu1 %v22047_v34  ;;  %v22061_v34 = vld [vmem:[#allocation14_spill] sm:$0xff]  ;;  %v22062_v30 = vld [vmem:[#allocation15_spill] sm:$0xff] }
 0x923   :  { %16091 = vmatpush1.bf16.msra.mxu0 %v22048_v9  ;;  %16283 = vmatpush1.bf16.msra.mxu1 %v22049_v46  ;;  %v22059_v46 = vld [vmem:[#allocation62_spill] sm:$0xff]  ;;  %v22060_v9 = vld [vmem:[#allocation63_spill] sm:$0xff] }
 0x924   :  { %16093 = vmatprep.subr.bf16.mxu0 %v22050_v50  ;;  %16285 = vmatprep.subr.bf16.mxu1 %v22051_v21  ;;  %v22057_v21 = vld [vmem:[#allocation60_spill] sm:$0xff]  ;;  %v22058_v50 = vld [vmem:[#allocation61_spill] sm:$0xff] }
 0x927   :  { %16095 = vmatpush1.bf16.msra.mxu0 %v22052_v36  ;;  %16287 = vmatpush1.bf16.msra.mxu1 %v22053_v12  ;;  %v22055_v12 = vld [vmem:[#allocation58_spill] sm:$0xff]  ;;  %v22056_v36 = vld [vmem:[#allocation59_spill] sm:$0xff] }
 0x928   :  { %16097 = vmatprep.subr.bf16.mxu0 %v21593_v45  ;;  %16289 = vmatprep.subr.bf16.mxu1 %v21594_v32 }
 0x92a   :  { %9271 = vmatmul.mubr.f32.vlgmr.msra.gmra.mrb[10].mxu0 %v20108_v16  ;;  %10126 = vmatmul.mubr.f32.vlgmr.msra.gmra.mrb[10].mxu1 %v20108_v16  ;;  %v22054_v16 = vld [vmem:[#allocation57_spill] sm:$0xff] }
 0x92b   :  { %16099 = vmatpush1.bf16.msra.mxu0 %v21595_v3  ;;  %16291 = vmatpush1.bf16.msra.mxu1 %v21597_v33 }
 0x92c   :  { %16101 = vmatprep.subr.bf16.mxu0 %v21596_v56  ;;  %16293 = vmatprep.subr.bf16.mxu1 %v21598_v7 }
 0x92d   :  { %9373 = vmatprep.mubr.f32.mxu0 %v21338_v6  ;;  %10228 = vmatprep.mubr.f32.mxu1 %v21338_v6 }
 0x92f   :  { %16103 = vmatpush1.bf16.msra.mxu0 %v21599_v20  ;;  %16295 = vmatpush1.bf16.msra.mxu1 %v21601_v39 }
 0x930   :  { %16105 = vmatprep.subr.bf16.mxu0 %v21600_v28  ;;  %16297 = vmatprep.subr.bf16.mxu1 %v21602_v62 }
 0x933   :  { %16107 = vmatpush1.bf16.msra.mxu0 %v21603_v55  ;;  %16299 = vmatpush1.bf16.msra.mxu1 %v21605_v43 }
 0x934   :  { %16109 = vmatprep.subr.bf16.mxu0 %v21604_v24  ;;  %16301 = vmatprep.subr.bf16.mxu1 %v21606_v19 }
 0x937   :  { %16111 = vmatpush1.bf16.msra.mxu0 %v21607_v10  ;;  %16303 = vmatpush1.bf16.msra.mxu1 %v21609_v49 }
 0x938   :  { %16113 = vmatprep.subr.bf16.mxu0 %v21608_v48  ;;  %16305 = vmatprep.subr.bf16.mxu1 %v21610_v2 }
 0x93b   :  { %16115 = vmatpush1.bf16.msra.mxu0 %v21611_v8  ;;  %16307 = vmatpush1.bf16.msra.mxu1 %v21613_v41 }
 0x93c   :  { %16117 = vmatprep.subr.bf16.mxu0 %v21612_v4  ;;  %16309 = vmatprep.subr.bf16.mxu1 %v21614_v13 }
 0x93f   :  { %16119 = vmatpush1.bf16.msra.mxu0 %v21615_v27  ;;  %16311 = vmatpush1.bf16.msra.mxu1 %v21617_v63 }
 0x940   :  { %16121 = vmatprep.subr.bf16.mxu0 %v21616_v26  ;;  %16313 = vmatprep.subr.bf16.mxu1 %v22054_v16 }
 0x943   :  { %16123 = vmatpush1.bf16.msra.mxu0 %v22055_v12  ;;  %16315 = vmatpush1.bf16.msra.mxu1 %v22056_v36 }
 0x944   :  { %16125 = vmatprep.subr.bf16.mxu0 %v22057_v21  ;;  %16317 = vmatprep.subr.bf16.mxu1 %v22058_v50 }
 0x947   :  { %16127 = vmatpush1.bf16.msra.mxu0 %v22059_v46  ;;  %16319 = vmatpush1.bf16.msra.mxu1 %v22060_v9 }
 0x948   :  { %16129 = vmatprep.subr.bf16.mxu0 %v22061_v34  ;;  %16321 = vmatprep.subr.bf16.mxu1 %v22062_v30  ;;  %v22068_v34 = vld [vmem:[#allocation22_spill] sm:$0xff]  ;;  %v22069_v30 = vld [vmem:[#allocation113_spill] sm:$0xff] }
 0x94a   :  { %9377 = vmatmul.mubr.f32.vlgmr.msra.gmra.mrb[10].mxu0 %v20111_v40  ;;  %10232 = vmatmul.mubr.f32.vlgmr.msra.gmra.mrb[10].mxu1 %v20111_v40  ;;  %v22071_v40 = vld [vmem:[#allocation115_spill] sm:$0xff] }
 0x94b   :  { %16131 = vmatpush1.bf16.msra.mxu0 %v22063_v17  ;;  %16323 = vmatpush1.bf16.msra.mxu1 %v22064_v22  ;;  %v22072_v17 = vld [vmem:[#allocation116_spill] sm:$0xff]  ;;  %v22073_v22 = vld [vmem:[#allocation117_spill] sm:$0xff] }
 0x94c   :  { %16133 = vmatprep.subr.bf16.mxu0 %v22065_v42  ;;  %16325 = vmatprep.subr.bf16.mxu1 %v22066_v61  ;;  %v22074_v42 = vld [vmem:[#allocation118_spill] sm:$0xff]  ;;  %v22075_v61 = vld [vmem:[#allocation119_spill] sm:$0xff] }
 0x94d   :  { %9543 = vmatprep.mubr.f32.mxu0 %v21338_v6  ;;  %10398 = vmatprep.mubr.f32.mxu1 %v21338_v6 }
 0x94f   :  { %16135 = vmatpush1.bf16.msra.mxu0 %v22067_v23  ;;  %16327 = vmatpush1.bf16.msra.mxu1 %v22068_v34  ;;  %v22078_v23 = vld [vmem:[#allocation26_spill] sm:$0xff]  ;;  %v22079_v34 = vld [vmem:[#allocation27_spill] sm:$0xff] }
 0x950   :  { %16137 = vmatprep.subr.bf16.mxu0 %v22069_v30  ;;  %16329 = vmatprep.subr.bf16.mxu1 %v22070_v37  ;;  %v22080_v30 = vld [vmem:[#allocation29_spill] sm:$0xff]  ;;  %v22081_v37 = vld [vmem:[#allocation31_spill] sm:$0xff] }
 0x953   :  { %16139 = vmatpush1.bf16.msra.mxu0 %v22071_v40  ;;  %16331 = vmatpush1.bf16.msra.mxu1 %v22072_v17  ;;  %v22082_v40 = vld [vmem:[#allocation34_spill] sm:$0xff]  ;;  %v22083_v17 = vld [vmem:[#allocation35_spill] sm:$0xff] }
 0x954   :  { %16141 = vmatprep.subr.bf16.mxu0 %v22073_v22  ;;  %16333 = vmatprep.subr.bf16.mxu1 %v22074_v42  ;;  %v22084_v22 = vld [vmem:[#allocation36_spill] sm:$0xff]  ;;  %v22085_v42 = vld [vmem:[#allocation38_spill] sm:$0xff] }
 0x957   :  { %16143 = vmatpush1.bf16.msra.mxu0 %v22075_v61  ;;  %16335 = vmatpush1.bf16.msra.mxu1 %v22076_v59  ;;  %v22086_v61 = vld [vmem:[#allocation39_spill] sm:$0xff]  ;;  %v22087_v59 = vld [vmem:[#allocation40_spill] sm:$0xff] }
 0x958   :  { %16145 = vmatprep.subr.bf16.mxu0 %v22077_v53  ;;  %16337 = vmatprep.subr.bf16.mxu1 %v22078_v23  ;;  %v22088_v53 = vld [vmem:[#allocation42_spill] sm:$0xff]  ;;  %v22089_v23 = vld [vmem:[#allocation92_spill] sm:$0xff] }
 0x95b   :  { %16147 = vmatpush1.bf16.msra.mxu0 %v22079_v34  ;;  %16339 = vmatpush1.bf16.msra.mxu1 %v22080_v30  ;;  %v22090_v34 = vld [vmem:[#allocation120_spill] sm:$0xff]  ;;  %v22091_v30 = vld [vmem:[#allocation122_spill] sm:$0xff] }
 0x95c   :  { %16149 = vmatprep.subr.bf16.mxu0 %v22081_v37  ;;  %16341 = vmatprep.subr.bf16.mxu1 %v22082_v40  ;;  %v22092_v37 = vld [vmem:[#allocation123_spill] sm:$0xff] }
 0x95f   :  { %16151 = vmatpush1.bf16.msra.mxu0 %v22083_v17  ;;  %16343 = vmatpush1.bf16.msra.mxu1 %v22084_v22 }
 0x960   :  { %16153 = vmatprep.subr.bf16.mxu0 %v22085_v42  ;;  %16345 = vmatprep.subr.bf16.mxu1 %v22086_v61 }
 0x963   :  { %16155 = vmatpush1.bf16.msra.mxu0 %v22087_v59  ;;  %16347 = vmatpush1.bf16.msra.mxu1 %v22088_v53 }
 0x964   :  { %16157 = vmatprep.subr.bf16.mxu0 %v22089_v23  ;;  %16349 = vmatprep.subr.bf16.mxu1 %v22090_v34  ;;  %v8797_v34 = vld [vmem:[#allocation2 + $0xa8] sm:$0xff] }
 0x967   :  { %16159 = vmatpush1.bf16.msra.mxu0 %v22091_v30  ;;  %16351 = vmatpush1.bf16.msra.mxu1 %v22092_v37  ;;  %v22094_v37 = vld [vmem:[#allocation68_spill] sm:$0xff] }
 0x968   :  { %16161 = vmatprep.subr.bf16.mxu0 %v21593_v45  ;;  %16353 = vmatprep.subr.bf16.mxu1 %v21594_v32  ;;  %v8796_v30 = vld [vmem:[#allocation2 + $0xa0] sm:$0xff] }
 0x96a   :  { %9545 = vmatmul.mubr.f32.vlgmr.msra.gmra.mrb[10].mxu0 %v20105_v18  ;;  %10400 = vmatmul.mubr.f32.vlgmr.msra.gmra.mrb[10].mxu1 %v20105_v18 }
 0x96b   :  { %16163 = vmatpush1.bf16.msra.mxu0 %v21595_v3  ;;  %16355 = vmatpush1.bf16.msra.mxu1 %v21597_v33 }
 0x96c   :  { %16165 = vmatprep.subr.bf16.mxu0 %v21596_v56  ;;  %16357 = vmatprep.subr.bf16.mxu1 %v21598_v7 }
 0x96d   :  { %9647 = vmatprep.mubr.f32.mxu0 %v21338_v6  ;;  %10502 = vmatprep.mubr.f32.mxu1 %v21338_v6 }
 0x96f   :  { %16167 = vmatpush1.bf16.msra.mxu0 %v21599_v20  ;;  %16359 = vmatpush1.bf16.msra.mxu1 %v21601_v39 }
 0x970   :  { %16169 = vmatprep.subr.bf16.mxu0 %v21600_v28  ;;  %16361 = vmatprep.subr.bf16.mxu1 %v21602_v62 }
 0x973   :  { %16171 = vmatpush1.bf16.msra.mxu0 %v21603_v55  ;;  %16363 = vmatpush1.bf16.msra.mxu1 %v21605_v43 }
 0x974   :  { %16173 = vmatprep.subr.bf16.mxu0 %v21604_v24  ;;  %16365 = vmatprep.subr.bf16.mxu1 %v21606_v19 }
 0x977   :  { %16175 = vmatpush1.bf16.msra.mxu0 %v21607_v10  ;;  %16367 = vmatpush1.bf16.msra.mxu1 %v21609_v49 }
 0x978   :  { %16177 = vmatprep.subr.bf16.mxu0 %v21608_v48  ;;  %16369 = vmatprep.subr.bf16.mxu1 %v21610_v2 }
 0x97b   :  { %16179 = vmatpush1.bf16.msra.mxu0 %v21611_v8  ;;  %16371 = vmatpush1.bf16.msra.mxu1 %v21613_v41 }
 0x97c   :  { %16181 = vmatprep.subr.bf16.mxu0 %v21612_v4  ;;  %16373 = vmatprep.subr.bf16.mxu1 %v21614_v13 }
 0x97f   :  { %16183 = vmatpush1.bf16.msra.mxu0 %v21615_v27  ;;  %16375 = vmatpush1.bf16.msra.mxu1 %v21617_v63 }
 0x980   :  { %16185 = vmatprep.subr.bf16.mxu0 %v21616_v26  ;;  %16377 = vmatprep.subr.bf16.mxu1 %v22054_v16 }
 0x983   :  { %16187 = vmatpush1.bf16.msra.mxu0 %v22055_v12  ;;  %16379 = vmatpush1.bf16.msra.mxu1 %v22056_v36 }
 0x984   :  { %16189 = vmatprep.subr.bf16.mxu0 %v22057_v21  ;;  %16381 = vmatprep.subr.bf16.mxu1 %v22058_v50 }
 0x987   :  { %16191 = vmatpush1.bf16.msra.mxu0 %v22059_v46  ;;  %16383 = vmatpush1.bf16.msra.mxu1 %v22060_v9 }
 0x988   :  { %16385 = vmatprep.subr.bf16.mxu0 %v21593_v45  ;;  %16577 = vmatprep.subr.bf16.mxu1 %v21594_v32 }
 0x98a   :  { %9649 = vmatmul.mubr.f32.vlgmr.msra.gmra.mrb[10].mxu0 %v20105_v18  ;;  %10504 = vmatmul.mubr.f32.vlgmr.msra.gmra.mrb[10].mxu1 %v20105_v18  ;;  %v22093_v18 = vld [vmem:[#allocation67_spill] sm:$0xff] }
 0x98b   :  { %16387 = vmatpush1.bf16.msra.mxu0 %v21595_v3  ;;  %16579 = vmatpush1.bf16.msra.mxu1 %v21597_v33 }
 0x98c   :  { %16389 = vmatprep.subr.bf16.mxu0 %v21596_v56  ;;  %16581 = vmatprep.subr.bf16.mxu1 %v21598_v7 }
 0x98d   :  { %10639 = vmatprep.mubr.f32.mxu0 %v21338_v6  ;;  %11494 = vmatprep.mubr.f32.mxu1 %v21338_v6 }
 0x98f   :  { %16391 = vmatpush1.bf16.msra.mxu0 %v21599_v20  ;;  %16583 = vmatpush1.bf16.msra.mxu1 %v21601_v39 }
 0x990   :  { %16393 = vmatprep.subr.bf16.mxu0 %v21600_v28  ;;  %16585 = vmatprep.subr.bf16.mxu1 %v21602_v62 }
 0x993   :  { %16395 = vmatpush1.bf16.msra.mxu0 %v21603_v55  ;;  %16587 = vmatpush1.bf16.msra.mxu1 %v21605_v43 }
 0x994   :  { %16397 = vmatprep.subr.bf16.mxu0 %v21604_v24  ;;  %16589 = vmatprep.subr.bf16.mxu1 %v21606_v19 }
 0x997   :  { %16399 = vmatpush1.bf16.msra.mxu0 %v21607_v10  ;;  %16591 = vmatpush1.bf16.msra.mxu1 %v21609_v49 }
 0x998   :  { %16401 = vmatprep.subr.bf16.mxu0 %v21608_v48  ;;  %16593 = vmatprep.subr.bf16.mxu1 %v21610_v2 }
 0x99b   :  { %16403 = vmatpush1.bf16.msra.mxu0 %v21611_v8  ;;  %16595 = vmatpush1.bf16.msra.mxu1 %v21613_v41 }
 0x99c   :  { %16405 = vmatprep.subr.bf16.mxu0 %v21612_v4  ;;  %16597 = vmatprep.subr.bf16.mxu1 %v21614_v13 }
 0x99f   :  { %16407 = vmatpush1.bf16.msra.mxu0 %v21615_v27  ;;  %16599 = vmatpush1.bf16.msra.mxu1 %v21617_v63 }
 0x9a0   :  { %16409 = vmatprep.subr.bf16.mxu0 %v21616_v26  ;;  %16601 = vmatprep.subr.bf16.mxu1 %v22054_v16 }
 0x9a3   :  { %16411 = vmatpush1.bf16.msra.mxu0 %v22055_v12  ;;  %16603 = vmatpush1.bf16.msra.mxu1 %v22056_v36 }
 0x9a4   :  { %16413 = vmatprep.subr.bf16.mxu0 %v22057_v21  ;;  %16605 = vmatprep.subr.bf16.mxu1 %v22058_v50  ;;  %v8799_v50 = vld [vmem:[#allocation2 + $0xb8] sm:$0xff]  ;;  %v8798_v21 = vld [vmem:[#allocation2 + $0xb0] sm:$0xff] }
 0x9a7   :  { %16415 = vmatpush1.bf16.msra.mxu0 %v22059_v46  ;;  %16607 = vmatpush1.bf16.msra.mxu1 %v22060_v9 }
 0x9a8   :  { %16417 = vmatprep.subr.bf16.mxu0 %v22093_v18  ;;  %16609 = vmatprep.subr.bf16.mxu1 %v22094_v37 }
 0xa5d   :  { %v9650_v23 = vpop.f32.mrb[10].mxu0  ;;  %v10505_v53 = vpop.f32.mrb[10].mxu1 }
 0xa5e   :  { %v10510_v59 = vadd.f32 %v9650_v23, %v8796_v30  ;;  %v9652_v61 = vpop.f32.mrb[11].mxu0  ;;  %v10507_v42 = vpop.f32.mrb[11].mxu1  ;;  %v10512_v36 = vadd.f32 %v10505_v53, %v8798_v21 }
 0xa5f   :  { %v10511_v22 = vadd.f32 %v9652_v61, %v8797_v34  ;;  %v10513_v46 = vadd.f32 %v10507_v42, %v8799_v50 }
 0xa60   :  { %v14071_v17 = vmul.f32 -1.442695, %v10510_v59 }
 0xa61   :  { %v14072_v40 = vmul.f32 -1.442695, %v10511_v22  ;;  %v14073_v9 = vmul.f32 -1.442695, %v10513_v46 }
 0xa62   :  { %17399 = vpow2.f32 %v14071_v17 }
 0xa63   :  { %17401 = vpow2.f32 %v14072_v40  ;;  %v22097_v40 = vld [vmem:[#allocation49_spill] sm:$0xff] }
 0xa64   :  { %17403 = vpow2.f32 %v14073_v9 }
 0xa65   :  { %17405 = vtanh.f32 %v10512_v36  ;;  %v22095_v36 = vld [vmem:[#allocation44_spill] sm:$0xff] }
 0xa6c   :  { %v17400_v18 = vpop.eup %17399 }
 0xa6d   :  { %v17402_v12 = vpop.eup %17401  ;;  %v10517_v37 = vadd.f32 1.0, %v17400_v18  ;;  %v22098_v18 = vld [vmem:[#allocation50_spill] sm:$0xff] }
 0xa6e   :  { %v10523_v16 = vadd.f32 1.0, %v17402_v12  ;;  %v17404_v23 = vpop.eup %17403 }
 0xa6f   :  { %17407 = vrcp.f32 %v10517_v37  ;;  %v17406_v30 = vpop.eup %17405  ;;  %v10530_v22 = vadd.f32 1.0, %v17404_v23  ;;  %v22099_v23 = vld [vmem:[#allocation93_spill] sm:$0xff] }
 0xa70   :  { %17409 = vrcp.f32 %v10523_v16  ;;  %v22096_v16 = vld [vmem:[#allocation47_spill] sm:$0xff] }
 0xa71   :  { %17411 = vrcp.f32 %v10530_v22  ;;  %v22104_v22 = vld [vmem:[#allocation98_spill] sm:$0xff] }
 0xa79   :  { %v17408_v61 = vpop.eup %17407 }
 0xa7a   :  { %v17410_v59 = vpop.eup %17409  ;;  %v10534_v34 = vmul.f32 %v17408_v61, %v17406_v30  ;;  %v22100_v30 = vld [vmem:[#allocation94_spill] sm:$0xff]  ;;  %v22101_v61 = vld [vmem:[#allocation95_spill] sm:$0xff] }
 0xa7b   :  { %v10533_v17 = vmul.f32 %v17410_v59, %v20102_v14  ;;  %v17412_v53 = vpop.eup %17411  ;;  %v22102_v59 = vld [vmem:[#allocation55_spill] sm:$0xff] }
 0xa7d   :  { %v20330_v42 = vadd.f32 %v10534_v34, %v10533_v17  ;;  %v22103_v34 = vld [vmem:[#allocation96_spill] sm:$0xff] }
 0xa7e   :  { %v22105_v17 = vld [vmem:[#allocation100_spill] sm:$0xff] }
 0xa7f   :  { %17413 = vtanh.f32 %v20330_v42 }
 0xa89   :  { %v17414_v46 = vpop.eup %17413 }
 0xa8a   :  { %v10537_v9 = vmul.f32 %v17414_v46, %v17412_v53  ;;  %v22106_v53 = vld [vmem:[#allocation107_spill] sm:$0xff]  ;;  %v22107_v46 = vld [vmem:[#allocation97_spill] sm:$0xff] }
 0xa8c   :  { %v20333_v50 = vand.u32 4294901760, %v10537_v9 }
 0xa8e   :  { %v20336_v37 = vsub.f32 %v10537_v9, %v20333_v50  ;;  %v22108_v9 = vld [vmem:[#allocation64_spill] sm:$0xff] }
 0xa90   :  { %v20339_v12 = vand.u32 4294901760, %v20336_v37 }
 0xa92   :  { %v10643_v21 = vsub.f32 %v20336_v37, %v20339_v12 }
 0xa94   :  { %v10644_v14 = vand.u32 4294901760, %v10643_v21  ;;  %v22109_v21 = vld [vmem:[#allocation65_spill] sm:$0xff] }
 0xa96   :  { %10645 = vmatmul.mubr.f32.vlgmr.msra.gmra.mrb[12].mxu0 %v10644_v14  ;;  %11500 = vmatmul.mubr.f32.vlgmr.msra.gmra.mrb[12].mxu1 %v10644_v14  ;;  %v22110_v14 = vld [vmem:[#allocation66_spill] sm:$0xff] }
 0xa97   :  { %16419 = vmatpush1.bf16.msra.mxu0 %v21671_v51  ;;  %16611 = vmatpush1.bf16.msra.mxu1 %v21672_v25 }
 0xa98   :  { %16421 = vmatprep.subr.bf16.mxu0 %v21673_v5  ;;  %16613 = vmatprep.subr.bf16.mxu1 %v21674_v58 }
 0xa99   :  { %10875 = vmatprep.mubr.f32.mxu0 %v21338_v6  ;;  %11730 = vmatprep.mubr.f32.mxu1 %v21338_v6 }
 0xa9b   :  { %16423 = vmatpush1.bf16.msra.mxu0 %v21755_v15  ;;  %16615 = vmatpush1.bf16.msra.mxu1 %v21756_v29 }
 0xa9c   :  { %16425 = vmatprep.subr.bf16.mxu0 %v21757_v31  ;;  %16617 = vmatprep.subr.bf16.mxu1 %v21758_v52 }
 0xa9f   :  { %16427 = vmatpush1.bf16.msra.mxu0 %v21759_v54  ;;  %16619 = vmatpush1.bf16.msra.mxu1 %v21840_v38 }
 0xaa0   :  { %16429 = vmatprep.subr.bf16.mxu0 %v21761_v57  ;;  %16621 = vmatprep.subr.bf16.mxu1 %v21762_v11 }
 0xaa3   :  { %16431 = vmatpush1.bf16.msra.mxu0 %v21841_v1  ;;  %16623 = vmatpush1.bf16.msra.mxu1 %v21842_v60 }
 0xaa4   :  { %16433 = vmatprep.subr.bf16.mxu0 %v21843_v35  ;;  %16625 = vmatprep.subr.bf16.mxu1 %v21844_v44 }
 0xaa7   :  { %16435 = vmatpush1.bf16.msra.mxu0 %v21845_v47  ;;  %16627 = vmatpush1.bf16.msra.mxu1 %v21846_v0 }
 0xaa8   :  { %16437 = vmatprep.subr.bf16.mxu0 %v22095_v36  ;;  %16629 = vmatprep.subr.bf16.mxu1 %v22096_v16  ;;  %v22161_v16 = vld [vmem:[#allocation83_spill] sm:$0xff]  ;;  %v22162_v36 = vld [vmem:[#allocation85_spill] sm:$0xff] }
 0xaab   :  { %16439 = vmatpush1.bf16.msra.mxu0 %v22097_v40  ;;  %16631 = vmatpush1.bf16.msra.mxu1 %v22098_v18  ;;  %v22152_v18 = vld [vmem:[#allocation20_spill] sm:$0xff]  ;;  %v22155_v40 = vld [vmem:[#allocation114_spill] sm:$0xff] }
 0xaac   :  { %16441 = vmatprep.subr.bf16.mxu0 %v22099_v23  ;;  %16633 = vmatprep.subr.bf16.mxu1 %v22100_v30  ;;  %v22123_v30 = vld [vmem:[#allocation112_spill] sm:$0xff]  ;;  %v22151_v23 = vld [vmem:[#allocation19_spill] sm:$0xff] }
 0xaaf   :  { %16443 = vmatpush1.bf16.msra.mxu0 %v22101_v61  ;;  %16635 = vmatpush1.bf16.msra.mxu1 %v22102_v59  ;;  %v22111_v59 = vld [vmem:[#allocation99_spill] sm:$0xff]  ;;  %v22122_v61 = vld [vmem:[#allocation121_spill] sm:$0xff] }
 0xab0   :  { %16445 = vmatprep.subr.bf16.mxu0 %v22103_v34  ;;  %16637 = vmatprep.subr.bf16.mxu1 %v22104_v22  ;;  %v22112_v34 = vld [vmem:[#allocation101_spill] sm:$0xff]  ;;  %v22117_v22 = vld [vmem:[#allocation106_spill] sm:$0xff] }
 0xab3   :  { %16447 = vmatpush1.bf16.msra.mxu0 %v22105_v17  ;;  %16639 = vmatpush1.bf16.msra.mxu1 %v22106_v53  ;;  %v22113_v53 = vld [vmem:[#allocation102_spill] sm:$0xff]  ;;  %v22116_v17 = vld [vmem:[#allocation105_spill] sm:$0xff] }
 0xab4   :  { %16449 = vmatprep.subr.bf16.mxu0 %v22107_v46  ;;  %16641 = vmatprep.subr.bf16.mxu1 %v22108_v9  ;;  %v22114_v46 = vld [vmem:[#allocation103_spill] sm:$0xff]  ;;  %v22115_v9 = vld [vmem:[#allocation104_spill] sm:$0xff] }
 0xab6   :  { %10877 = vmatmul.mubr.f32.vlgmr.msra.gmra.mrb[12].mxu0 %v20333_v50  ;;  %11732 = vmatmul.mubr.f32.vlgmr.msra.gmra.mrb[12].mxu1 %v20333_v50 }
 0xab7   :  { %16451 = vmatpush1.bf16.msra.mxu0 %v22109_v21  ;;  %16643 = vmatpush1.bf16.msra.mxu1 %v22110_v14  ;;  %v22118_v21 = vld [vmem:[#allocation108_spill] sm:$0xff]  ;;  %v22119_v14 = vld [vmem:[#allocation109_spill] sm:$0xff] }
 0xab8   :  { %16453 = vmatprep.subr.bf16.mxu0 %v22111_v59  ;;  %16645 = vmatprep.subr.bf16.mxu1 %v22112_v34  ;;  %v22120_v59 = vld [vmem:[#allocation110_spill] sm:$0xff]  ;;  %v22121_v34 = vld [vmem:[#allocation111_spill] sm:$0xff] }
 0xab9   :  { %11011 = vmatprep.mubr.f32.mxu0 %v21338_v6  ;;  %11866 = vmatprep.mubr.f32.mxu1 %v21338_v6 }
 0xabb   :  { %16455 = vmatpush1.bf16.msra.mxu0 %v22113_v53  ;;  %16647 = vmatpush1.bf16.msra.mxu1 %v22114_v46  ;;  %v22124_v53 = vld [vmem:[#allocation124_spill] sm:$0xff]  ;;  %v22125_v46 = vld [vmem:[#allocation125_spill] sm:$0xff] }
 0xabc   :  { %16457 = vmatprep.subr.bf16.mxu0 %v22115_v9  ;;  %16649 = vmatprep.subr.bf16.mxu1 %v22116_v17  ;;  %v22126_v9 = vld [vmem:[#allocation127_spill] sm:$0xff]  ;;  %v22127_v17 = vld [vmem:[#allocation126_spill] sm:$0xff] }
 0xabf   :  { %16459 = vmatpush1.bf16.msra.mxu0 %v22117_v22  ;;  %16651 = vmatpush1.bf16.msra.mxu1 %v22118_v21  ;;  %v22128_v22 = vld [vmem:[#allocation128_spill] sm:$0xff]  ;;  %v22129_v21 = vld [vmem:[#allocation129_spill] sm:$0xff] }
 0xac0   :  { %16461 = vmatprep.subr.bf16.mxu0 %v22119_v14  ;;  %16653 = vmatprep.subr.bf16.mxu1 %v22120_v59  ;;  %v22130_v14 = vld [vmem:[#allocation131_spill] sm:$0xff]  ;;  %v22131_v59 = vld [vmem:[#allocation130_spill] sm:$0xff] }
 0xac3   :  { %16463 = vmatpush1.bf16.msra.mxu0 %v22121_v34  ;;  %16655 = vmatpush1.bf16.msra.mxu1 %v22122_v61  ;;  %v22132_v34 = vld [vmem:[#allocation132_spill] sm:$0xff]  ;;  %v22133_v61 = vld [vmem:[#allocation133_spill] sm:$0xff] }
 0xac4   :  { %16465 = vmatprep.subr.bf16.mxu0 %v22123_v30  ;;  %16657 = vmatprep.subr.bf16.mxu1 %v22124_v53  ;;  %v22134_v30 = vld [vmem:[#allocation135_spill] sm:$0xff]  ;;  %v22135_v53 = vld [vmem:[#allocation134_spill] sm:$0xff] }
 0xac7   :  { %16467 = vmatpush1.bf16.msra.mxu0 %v22125_v46  ;;  %16659 = vmatpush1.bf16.msra.mxu1 %v22126_v9  ;;  %v22136_v46 = vld [vmem:[#allocation136_spill] sm:$0xff]  ;;  %v22137_v9 = vld [vmem:[#allocation137_spill] sm:$0xff] }
 0xac8   :  { %16469 = vmatprep.subr.bf16.mxu0 %v22127_v17  ;;  %16661 = vmatprep.subr.bf16.mxu1 %v22128_v22  ;;  %v22138_v17 = vld [vmem:[#allocation138_spill] sm:$0xff] }
 0xac9   :  { %v22150_v22 = vld [vmem:[#allocation18_spill] sm:$0xff] }
 0xacb   :  { %16471 = vmatpush1.bf16.msra.mxu0 %v22129_v21  ;;  %16663 = vmatpush1.bf16.msra.mxu1 %v22130_v14  ;;  %v22148_v14 = vld [vmem:[#allocation16_spill] sm:$0xff]  ;;  %v22149_v21 = vld [vmem:[#allocation17_spill] sm:$0xff] }
 0xacc   :  { %16473 = vmatprep.subr.bf16.mxu0 %v22131_v59  ;;  %16665 = vmatprep.subr.bf16.mxu1 %v22132_v34  ;;  %v22146_v34 = vld [vmem:[#allocation14_spill] sm:$0xff]  ;;  %v22147_v59 = vld [vmem:[#allocation15_spill] sm:$0xff] }
 0xacf   :  { %16475 = vmatpush1.bf16.msra.mxu0 %v22133_v61  ;;  %16667 = vmatpush1.bf16.msra.mxu1 %v22134_v30  ;;  %v22144_v30 = vld [vmem:[#allocation62_spill] sm:$0xff]  ;;  %v22145_v61 = vld [vmem:[#allocation63_spill] sm:$0xff] }
 0xad0   :  { %16477 = vmatprep.subr.bf16.mxu0 %v22135_v53  ;;  %16669 = vmatprep.subr.bf16.mxu1 %v22136_v46  ;;  %v22142_v46 = vld [vmem:[#allocation60_spill] sm:$0xff]  ;;  %v22143_v53 = vld [vmem:[#allocation61_spill] sm:$0xff] }
 0xad3   :  { %16479 = vmatpush1.bf16.msra.mxu0 %v22137_v9  ;;  %16671 = vmatpush1.bf16.msra.mxu1 %v22138_v17  ;;  %v22140_v17 = vld [vmem:[#allocation58_spill] sm:$0xff]  ;;  %v22141_v9 = vld [vmem:[#allocation59_spill] sm:$0xff] }
 0xad4   :  { %16481 = vmatprep.subr.bf16.mxu0 %v21593_v45  ;;  %16673 = vmatprep.subr.bf16.mxu1 %v21594_v32 }
 0xad6   :  { %11014 = vmatmul.mubr.f32.vlgmr.msra.gmra.mrb[12].mxu0 %v20336_v37  ;;  %11869 = vmatmul.mubr.f32.vlgmr.msra.gmra.mrb[12].mxu1 %v20336_v37  ;;  %v22139_v37 = vld [vmem:[#allocation57_spill] sm:$0xff] }
 0xad7   :  { %16483 = vmatpush1.bf16.msra.mxu0 %v21595_v3  ;;  %16675 = vmatpush1.bf16.msra.mxu1 %v21597_v33 }
 0xad8   :  { %16485 = vmatprep.subr.bf16.mxu0 %v21596_v56  ;;  %16677 = vmatprep.subr.bf16.mxu1 %v21598_v7 }
 0xad9   :  { %11116 = vmatprep.mubr.f32.mxu0 %v21338_v6  ;;  %11971 = vmatprep.mubr.f32.mxu1 %v21338_v6 }
 0xadb   :  { %16487 = vmatpush1.bf16.msra.mxu0 %v21599_v20  ;;  %16679 = vmatpush1.bf16.msra.mxu1 %v21601_v39 }
 0xadc   :  { %16489 = vmatprep.subr.bf16.mxu0 %v21600_v28  ;;  %16681 = vmatprep.subr.bf16.mxu1 %v21602_v62 }
 0xadf   :  { %16491 = vmatpush1.bf16.msra.mxu0 %v21603_v55  ;;  %16683 = vmatpush1.bf16.msra.mxu1 %v21605_v43 }
 0xae0   :  { %16493 = vmatprep.subr.bf16.mxu0 %v21604_v24  ;;  %16685 = vmatprep.subr.bf16.mxu1 %v21606_v19 }
 0xae3   :  { %16495 = vmatpush1.bf16.msra.mxu0 %v21607_v10  ;;  %16687 = vmatpush1.bf16.msra.mxu1 %v21609_v49 }
 0xae4   :  { %16497 = vmatprep.subr.bf16.mxu0 %v21608_v48  ;;  %16689 = vmatprep.subr.bf16.mxu1 %v21610_v2 }
 0xae7   :  { %16499 = vmatpush1.bf16.msra.mxu0 %v21611_v8  ;;  %16691 = vmatpush1.bf16.msra.mxu1 %v21613_v41 }
 0xae8   :  { %16501 = vmatprep.subr.bf16.mxu0 %v21612_v4  ;;  %16693 = vmatprep.subr.bf16.mxu1 %v21614_v13 }
 0xaeb   :  { %16503 = vmatpush1.bf16.msra.mxu0 %v21615_v27  ;;  %16695 = vmatpush1.bf16.msra.mxu1 %v21617_v63 }
 0xaec   :  { %16505 = vmatprep.subr.bf16.mxu0 %v21616_v26  ;;  %16697 = vmatprep.subr.bf16.mxu1 %v22139_v37 }
 0xaef   :  { %16507 = vmatpush1.bf16.msra.mxu0 %v22140_v17  ;;  %16699 = vmatpush1.bf16.msra.mxu1 %v22141_v9 }
 0xaf0   :  { %16509 = vmatprep.subr.bf16.mxu0 %v22142_v46  ;;  %16701 = vmatprep.subr.bf16.mxu1 %v22143_v53 }
 0xaf3   :  { %16511 = vmatpush1.bf16.msra.mxu0 %v22144_v30  ;;  %16703 = vmatpush1.bf16.msra.mxu1 %v22145_v61 }
 0xaf4   :  { %16513 = vmatprep.subr.bf16.mxu0 %v22146_v34  ;;  %16705 = vmatprep.subr.bf16.mxu1 %v22147_v59  ;;  %v22153_v34 = vld [vmem:[#allocation22_spill] sm:$0xff]  ;;  %v22154_v59 = vld [vmem:[#allocation113_spill] sm:$0xff] }
 0xaf6   :  { %11120 = vmatmul.mubr.f32.vlgmr.msra.gmra.mrb[12].mxu0 %v20339_v12  ;;  %11975 = vmatmul.mubr.f32.vlgmr.msra.gmra.mrb[12].mxu1 %v20339_v12  ;;  %v22156_v12 = vld [vmem:[#allocation115_spill] sm:$0xff] }
 0xaf7   :  { %16515 = vmatpush1.bf16.msra.mxu0 %v22148_v14  ;;  %16707 = vmatpush1.bf16.msra.mxu1 %v22149_v21  ;;  %v22157_v14 = vld [vmem:[#allocation116_spill] sm:$0xff]  ;;  %v22158_v21 = vld [vmem:[#allocation117_spill] sm:$0xff] }
 0xaf8   :  { %16517 = vmatprep.subr.bf16.mxu0 %v22150_v22  ;;  %16709 = vmatprep.subr.bf16.mxu1 %v22151_v23  ;;  %v22159_v22 = vld [vmem:[#allocation118_spill] sm:$0xff]  ;;  %v22160_v23 = vld [vmem:[#allocation119_spill] sm:$0xff] }
 0xaf9   :  { %11286 = vmatprep.mubr.f32.mxu0 %v21338_v6  ;;  %12141 = vmatprep.mubr.f32.mxu1 %v21338_v6 }
 0xafb   :  { %16519 = vmatpush1.bf16.msra.mxu0 %v22152_v18  ;;  %16711 = vmatpush1.bf16.msra.mxu1 %v22153_v34  ;;  %v22163_v18 = vld [vmem:[#allocation26_spill] sm:$0xff]  ;;  %v22164_v34 = vld [vmem:[#allocation27_spill] sm:$0xff] }
 0xafc   :  { %16521 = vmatprep.subr.bf16.mxu0 %v22154_v59  ;;  %16713 = vmatprep.subr.bf16.mxu1 %v22155_v40  ;;  %v22165_v59 = vld [vmem:[#allocation29_spill] sm:$0xff]  ;;  %v22166_v40 = vld [vmem:[#allocation31_spill] sm:$0xff] }
 0xaff   :  { %16523 = vmatpush1.bf16.msra.mxu0 %v22156_v12  ;;  %16715 = vmatpush1.bf16.msra.mxu1 %v22157_v14  ;;  %v22167_v12 = vld [vmem:[#allocation34_spill] sm:$0xff]  ;;  %v22168_v14 = vld [vmem:[#allocation35_spill] sm:$0xff] }
 0xb00   :  { %16525 = vmatprep.subr.bf16.mxu0 %v22158_v21  ;;  %16717 = vmatprep.subr.bf16.mxu1 %v22159_v22  ;;  %v22169_v21 = vld [vmem:[#allocation36_spill] sm:$0xff]  ;;  %v22170_v22 = vld [vmem:[#allocation38_spill] sm:$0xff] }
 0xb03   :  { %16527 = vmatpush1.bf16.msra.mxu0 %v22160_v23  ;;  %16719 = vmatpush1.bf16.msra.mxu1 %v22161_v16  ;;  %v22171_v23 = vld [vmem:[#allocation39_spill] sm:$0xff]  ;;  %v22172_v16 = vld [vmem:[#allocation40_spill] sm:$0xff] }
 0xb04   :  { %16529 = vmatprep.subr.bf16.mxu0 %v22162_v36  ;;  %16721 = vmatprep.subr.bf16.mxu1 %v22163_v18  ;;  %v22173_v36 = vld [vmem:[#allocation42_spill] sm:$0xff]  ;;  %v22174_v18 = vld [vmem:[#allocation92_spill] sm:$0xff] }
 0xb07   :  { %16531 = vmatpush1.bf16.msra.mxu0 %v22164_v34  ;;  %16723 = vmatpush1.bf16.msra.mxu1 %v22165_v59  ;;  %v22175_v34 = vld [vmem:[#allocation120_spill] sm:$0xff]  ;;  %v22176_v59 = vld [vmem:[#allocation122_spill] sm:$0xff] }
 0xb08   :  { %16533 = vmatprep.subr.bf16.mxu0 %v22166_v40  ;;  %16725 = vmatprep.subr.bf16.mxu1 %v22167_v12  ;;  %v22177_v40 = vld [vmem:[#allocation123_spill] sm:$0xff] }
 0xb0b   :  { %16535 = vmatpush1.bf16.msra.mxu0 %v22168_v14  ;;  %16727 = vmatpush1.bf16.msra.mxu1 %v22169_v21 }
 0xb0c   :  { %16537 = vmatprep.subr.bf16.mxu0 %v22170_v22  ;;  %16729 = vmatprep.subr.bf16.mxu1 %v22171_v23 }
 0xb0f   :  { %16539 = vmatpush1.bf16.msra.mxu0 %v22172_v16  ;;  %16731 = vmatpush1.bf16.msra.mxu1 %v22173_v36 }
 0xb10   :  { %16541 = vmatprep.subr.bf16.mxu0 %v22174_v18  ;;  %16733 = vmatprep.subr.bf16.mxu1 %v22175_v34  ;;  %v10540_v34 = vld [vmem:[#allocation2 + $0xc8] sm:$0xff] }
 0xb13   :  { %16543 = vmatpush1.bf16.msra.mxu0 %v22176_v59  ;;  %16735 = vmatpush1.bf16.msra.mxu1 %v22177_v40  ;;  %v22179_v40 = vld [vmem:[#allocation68_spill] sm:$0xff] }
 0xb14   :  { %16545 = vmatprep.subr.bf16.mxu0 %v21593_v45  ;;  %16737 = vmatprep.subr.bf16.mxu1 %v21594_v32  ;;  %v10539_v59 = vld [vmem:[#allocation2 + $0xc0] sm:$0xff] }
 0xb16   :  { %11288 = vmatmul.mubr.f32.vlgmr.msra.gmra.mrb[12].mxu0 %v20333_v50  ;;  %12143 = vmatmul.mubr.f32.vlgmr.msra.gmra.mrb[12].mxu1 %v20333_v50 }
 0xb17   :  { %16547 = vmatpush1.bf16.msra.mxu0 %v21595_v3  ;;  %16739 = vmatpush1.bf16.msra.mxu1 %v21597_v33 }
 0xb18   :  { %16549 = vmatprep.subr.bf16.mxu0 %v21596_v56  ;;  %16741 = vmatprep.subr.bf16.mxu1 %v21598_v7 }
 0xb19   :  { %11390 = vmatprep.mubr.f32.mxu0 %v21338_v6  ;;  %12245 = vmatprep.mubr.f32.mxu1 %v21338_v6 }
 0xb1b   :  { %16551 = vmatpush1.bf16.msra.mxu0 %v21599_v20  ;;  %16743 = vmatpush1.bf16.msra.mxu1 %v21601_v39 }
 0xb1c   :  { %16553 = vmatprep.subr.bf16.mxu0 %v21600_v28  ;;  %16745 = vmatprep.subr.bf16.mxu1 %v21602_v62 }
 0xb1f   :  { %16555 = vmatpush1.bf16.msra.mxu0 %v21603_v55  ;;  %16747 = vmatpush1.bf16.msra.mxu1 %v21605_v43 }
 0xb20   :  { %16557 = vmatprep.subr.bf16.mxu0 %v21604_v24  ;;  %16749 = vmatprep.subr.bf16.mxu1 %v21606_v19 }
 0xb23   :  { %16559 = vmatpush1.bf16.msra.mxu0 %v21607_v10  ;;  %16751 = vmatpush1.bf16.msra.mxu1 %v21609_v49 }
 0xb24   :  { %16561 = vmatprep.subr.bf16.mxu0 %v21608_v48  ;;  %16753 = vmatprep.subr.bf16.mxu1 %v21610_v2 }
 0xb27   :  { %16563 = vmatpush1.bf16.msra.mxu0 %v21611_v8  ;;  %16755 = vmatpush1.bf16.msra.mxu1 %v21613_v41 }
 0xb28   :  { %16565 = vmatprep.subr.bf16.mxu0 %v21612_v4  ;;  %16757 = vmatprep.subr.bf16.mxu1 %v21614_v13 }
 0xb2b   :  { %16567 = vmatpush1.bf16.msra.mxu0 %v21615_v27  ;;  %16759 = vmatpush1.bf16.msra.mxu1 %v21617_v63 }
 0xb2c   :  { %16569 = vmatprep.subr.bf16.mxu0 %v21616_v26  ;;  %16761 = vmatprep.subr.bf16.mxu1 %v22139_v37 }
 0xb2f   :  { %16571 = vmatpush1.bf16.msra.mxu0 %v22140_v17  ;;  %16763 = vmatpush1.bf16.msra.mxu1 %v22141_v9 }
 0xb30   :  { %16573 = vmatprep.subr.bf16.mxu0 %v22142_v46  ;;  %16765 = vmatprep.subr.bf16.mxu1 %v22143_v53 }
 0xb33   :  { %16575 = vmatpush1.bf16.msra.mxu0 %v22144_v30  ;;  %16767 = vmatpush1.bf16.msra.mxu1 %v22145_v61 }
 0xb34   :  { %16769 = vmatprep.subr.bf16.mxu0 %v21593_v45  ;;  %16961 = vmatprep.subr.bf16.mxu1 %v21594_v32 }
 0xb36   :  { %11392 = vmatmul.mubr.f32.vlgmr.msra.gmra.mrb[12].mxu0 %v20333_v50  ;;  %12247 = vmatmul.mubr.f32.vlgmr.msra.gmra.mrb[12].mxu1 %v20333_v50  ;;  %v22178_v50 = vld [vmem:[#allocation67_spill] sm:$0xff] }
 0xb37   :  { %16771 = vmatpush1.bf16.msra.mxu0 %v21595_v3  ;;  %16963 = vmatpush1.bf16.msra.mxu1 %v21597_v33 }
 0xb38   :  { %16773 = vmatprep.subr.bf16.mxu0 %v21596_v56  ;;  %16965 = vmatprep.subr.bf16.mxu1 %v21598_v7 }
 0xb39   :  { %12382 = vmatprep.mubr.f32.mxu0 %v21338_v6  ;;  %13237 = vmatprep.mubr.f32.mxu1 %v21338_v6 }
 0xb3b   :  { %16775 = vmatpush1.bf16.msra.mxu0 %v21599_v20  ;;  %16967 = vmatpush1.bf16.msra.mxu1 %v21601_v39 }
 0xb3c   :  { %16777 = vmatprep.subr.bf16.mxu0 %v21600_v28  ;;  %16969 = vmatprep.subr.bf16.mxu1 %v21602_v62 }
 0xb3f   :  { %16779 = vmatpush1.bf16.msra.mxu0 %v21603_v55  ;;  %16971 = vmatpush1.bf16.msra.mxu1 %v21605_v43 }
 0xb40   :  { %16781 = vmatprep.subr.bf16.mxu0 %v21604_v24  ;;  %16973 = vmatprep.subr.bf16.mxu1 %v21606_v19 }
 0xb43   :  { %16783 = vmatpush1.bf16.msra.mxu0 %v21607_v10  ;;  %16975 = vmatpush1.bf16.msra.mxu1 %v21609_v49 }
 0xb44   :  { %16785 = vmatprep.subr.bf16.mxu0 %v21608_v48  ;;  %16977 = vmatprep.subr.bf16.mxu1 %v21610_v2 }
 0xb47   :  { %16787 = vmatpush1.bf16.msra.mxu0 %v21611_v8  ;;  %16979 = vmatpush1.bf16.msra.mxu1 %v21613_v41 }
 0xb48   :  { %16789 = vmatprep.subr.bf16.mxu0 %v21612_v4  ;;  %16981 = vmatprep.subr.bf16.mxu1 %v21614_v13 }
 0xb4b   :  { %16791 = vmatpush1.bf16.msra.mxu0 %v21615_v27  ;;  %16983 = vmatpush1.bf16.msra.mxu1 %v21617_v63 }
 0xb4c   :  { %16793 = vmatprep.subr.bf16.mxu0 %v21616_v26  ;;  %16985 = vmatprep.subr.bf16.mxu1 %v22139_v37 }
 0xb4f   :  { %16795 = vmatpush1.bf16.msra.mxu0 %v22140_v17  ;;  %16987 = vmatpush1.bf16.msra.mxu1 %v22141_v9 }
 0xb50   :  { %16797 = vmatprep.subr.bf16.mxu0 %v22142_v46  ;;  %16989 = vmatprep.subr.bf16.mxu1 %v22143_v53  ;;  %v10542_v53 = vld [vmem:[#allocation2 + $0xd8] sm:$0xff]  ;;  %v10541_v46 = vld [vmem:[#allocation2 + $0xd0] sm:$0xff] }
 0xb53   :  { %16799 = vmatpush1.bf16.msra.mxu0 %v22144_v30  ;;  %16991 = vmatpush1.bf16.msra.mxu1 %v22145_v61 }
 0xb54   :  { %16801 = vmatprep.subr.bf16.mxu0 %v22178_v50  ;;  %16993 = vmatprep.subr.bf16.mxu1 %v22179_v40 }
 0xc09   :  { %v11393_v18 = vpop.f32.mrb[12].mxu0  ;;  %v12248_v36 = vpop.f32.mrb[12].mxu1 }
 0xc0a   :  { %v12253_v16 = vadd.f32 %v11393_v18, %v10539_v59  ;;  %v11395_v23 = vpop.f32.mrb[13].mxu0  ;;  %v12250_v22 = vpop.f32.mrb[13].mxu1  ;;  %v12255_v9 = vadd.f32 %v12248_v36, %v10541_v46 }
 0xc0b   :  { %v12254_v21 = vadd.f32 %v11395_v23, %v10540_v34  ;;  %v12256_v30 = vadd.f32 %v12250_v22, %v10542_v53 }
 0xc0c   :  { %v14074_v14 = vmul.f32 -1.442695, %v12253_v16 }
 0xc0d   :  { %v14075_v12 = vmul.f32 -1.442695, %v12254_v21  ;;  %v14076_v61 = vmul.f32 -1.442695, %v12256_v30 }
 0xc0e   :  { %17415 = vpow2.f32 %v14074_v14 }
 0xc0f   :  { %17417 = vpow2.f32 %v14075_v12  ;;  %v22199_v12 = vld [vmem:[#allocation103_spill] sm:$0xff] }
 0xc10   :  { %17419 = vpow2.f32 %v14076_v61 }
 0xc11   :  { %17421 = vtanh.f32 %v12255_v9 }
 0xc18   :  { %v17416_v50 = vpop.eup %17415 }
 0xc19   :  { %v17418_v17 = vpop.eup %17417  ;;  %v12260_v40 = vadd.f32 1.0, %v17416_v50  ;;  %v22200_v50 = vld [vmem:[#allocation104_spill] sm:$0xff] }
 0xc1a   :  { %v12266_v37 = vadd.f32 1.0, %v17418_v17  ;;  %v17420_v18 = vpop.eup %17419 }
 0xc1b   :  { %17423 = vrcp.f32 %v12260_v40  ;;  %v17422_v59 = vpop.eup %17421  ;;  %v12273_v21 = vadd.f32 1.0, %v17420_v18  ;;  %v22201_v40 = vld [vmem:[#allocation105_spill] sm:$0xff]  ;;  %v22202_v18 = vld [vmem:[#allocation106_spill] sm:$0xff] }
 0xc1c   :  { %17425 = vrcp.f32 %v12266_v37  ;;  %v22198_v37 = vld [vmem:[#allocation102_spill] sm:$0xff] }
 0xc1d   :  { %17427 = vrcp.f32 %v12273_v21  ;;  %v22207_v21 = vld [vmem:[#allocation121_spill] sm:$0xff] }
 0xc25   :  { %v17424_v23 = vpop.eup %17423 }
 0xc26   :  { %v17426_v16 = vpop.eup %17425  ;;  %v12277_v34 = vmul.f32 %v17424_v23, %v17422_v59  ;;  %v22203_v59 = vld [vmem:[#allocation108_spill] sm:$0xff]  ;;  %v22204_v23 = vld [vmem:[#allocation109_spill] sm:$0xff] }
 0xc27   :  { %v12276_v14 = vmul.f32 %v17426_v16, %v20330_v42  ;;  %v17428_v36 = vpop.eup %17427  ;;  %v22205_v16 = vld [vmem:[#allocation110_spill] sm:$0xff] }
 0xc29   :  { %v20558_v22 = vadd.f32 %v12277_v34, %v12276_v14  ;;  %v22206_v34 = vld [vmem:[#allocation111_spill] sm:$0xff]  ;;  %v22208_v14 = vld [vmem:[#allocation112_spill] sm:$0xff] }
 0xc2b   :  { %17429 = vtanh.f32 %v20558_v22 }
 0xc35   :  { %v17430_v30 = vpop.eup %17429 }
 0xc36   :  { %v12280_v61 = vmul.f32 %v17430_v30, %v17428_v36  ;;  %v22209_v36 = vld [vmem:[#allocation124_spill] sm:$0xff]  ;;  %v22210_v30 = vld [vmem:[#allocation125_spill] sm:$0xff] }
 0xc38   :  { %v20561_v53 = vand.u32 4294901760, %v12280_v61 }
 0xc3a   :  { %v20564_v17 = vsub.f32 %v12280_v61, %v20561_v53  ;;  %v22211_v61 = vld [vmem:[#allocation127_spill] sm:$0xff] }
 0xc3c   :  { %v20567_v46 = vand.u32 4294901760, %v20564_v17 }
 0xc3e   :  { %v12386_v9 = vsub.f32 %v20564_v17, %v20567_v46 }
 0xc40   :  { %v12387_v42 = vand.u32 4294901760, %v12386_v9  ;;  %v22212_v9 = vld [vmem:[#allocation126_spill] sm:$0xff] }
 0xc42   :  { %12388 = vmatmul.mubr.f32.vlgmr.msra.gmra.mrb[14].mxu0 %v12387_v42  ;;  %13243 = vmatmul.mubr.f32.vlgmr.msra.gmra.mrb[14].mxu1 %v12387_v42  ;;  %v22213_v42 = vld [vmem:[#allocation128_spill] sm:$0xff] }
 0xc43   :  { %16803 = vmatpush1.bf16.msra.mxu0 %v21671_v51  ;;  %16995 = vmatpush1.bf16.msra.mxu1 %v21672_v25  ;;  %v22180_v51 = vld [vmem:[#allocation44_spill] sm:$0xff]  ;;  %v22181_v25 = vld [vmem:[#allocation47_spill] sm:$0xff] }
 0xc44   :  { %16805 = vmatprep.subr.bf16.mxu0 %v21673_v5  ;;  %16997 = vmatprep.subr.bf16.mxu1 %v21674_v58  ;;  %v22182_v5 = vld [vmem:[#allocation49_spill] sm:$0xff]  ;;  %v22183_v58 = vld [vmem:[#allocation50_spill] sm:$0xff] }
 0xc45   :  { %12618 = vmatprep.mubr.f32.mxu0 %v21338_v6  ;;  %13473 = vmatprep.mubr.f32.mxu1 %v21338_v6 }
 0xc47   :  { %16807 = vmatpush1.bf16.msra.mxu0 %v21755_v15  ;;  %16999 = vmatpush1.bf16.msra.mxu1 %v21756_v29  ;;  %v22184_v15 = vld [vmem:[#allocation93_spill] sm:$0xff]  ;;  %v22185_v29 = vld [vmem:[#allocation94_spill] sm:$0xff] }
 0xc48   :  { %16809 = vmatprep.subr.bf16.mxu0 %v21757_v31  ;;  %17001 = vmatprep.subr.bf16.mxu1 %v21758_v52  ;;  %v22186_v31 = vld [vmem:[#allocation95_spill] sm:$0xff] }
 0xc49   :  { %v22187_v52 = vld [vmem:[#allocation55_spill] sm:$0xff] }
 0xc4b   :  { %16811 = vmatpush1.bf16.msra.mxu0 %v21759_v54  ;;  %17003 = vmatpush1.bf16.msra.mxu1 %v21840_v38  ;;  %v22188_v54 = vld [vmem:[#allocation96_spill] sm:$0xff]  ;;  %v22191_v38 = vld [vmem:[#allocation107_spill] sm:$0xff] }
 0xc4c   :  { %16813 = vmatprep.subr.bf16.mxu0 %v21761_v57  ;;  %17005 = vmatprep.subr.bf16.mxu1 %v21762_v11  ;;  %v22189_v57 = vld [vmem:[#allocation98_spill] sm:$0xff]  ;;  %v22190_v11 = vld [vmem:[#allocation100_spill] sm:$0xff] }
 0xc4f   :  { %16815 = vmatpush1.bf16.msra.mxu0 %v21841_v1  ;;  %17007 = vmatpush1.bf16.msra.mxu1 %v21842_v60  ;;  %v22192_v1 = vld [vmem:[#allocation97_spill] sm:$0xff]  ;;  %v22193_v60 = vld [vmem:[#allocation64_spill] sm:$0xff] }
 0xc50   :  { %16817 = vmatprep.subr.bf16.mxu0 %v21843_v35  ;;  %17009 = vmatprep.subr.bf16.mxu1 %v21844_v44  ;;  %v22194_v35 = vld [vmem:[#allocation65_spill] sm:$0xff]  ;;  %v22195_v44 = vld [vmem:[#allocation66_spill] sm:$0xff] }
 0xc53   :  { %16819 = vmatpush1.bf16.msra.mxu0 %v21845_v47  ;;  %17011 = vmatpush1.bf16.msra.mxu1 %v21846_v0  ;;  %v22196_v47 = vld [vmem:[#allocation99_spill] sm:$0xff]  ;;  %v22197_v0 = vld [vmem:[#allocation101_spill] sm:$0xff] }
 0xc54   :  { %16821 = vmatprep.subr.bf16.mxu0 %v22180_v51  ;;  %17013 = vmatprep.subr.bf16.mxu1 %v22181_v25  ;;  %v22214_v51 = vld [vmem:[#allocation129_spill] sm:$0xff]  ;;  %v22215_v25 = vld [vmem:[#allocation131_spill] sm:$0xff] }
 0xc57   :  { %16823 = vmatpush1.bf16.msra.mxu0 %v22182_v5  ;;  %17015 = vmatpush1.bf16.msra.mxu1 %v22183_v58  ;;  %v22216_v5 = vld [vmem:[#allocation130_spill] sm:$0xff]  ;;  %v22217_v58 = vld [vmem:[#allocation132_spill] sm:$0xff] }
 0xc58   :  { %16825 = vmatprep.subr.bf16.mxu0 %v22184_v15  ;;  %17017 = vmatprep.subr.bf16.mxu1 %v22185_v29  ;;  %v22218_v15 = vld [vmem:[#allocation133_spill] sm:$0xff]  ;;  %v22219_v29 = vld [vmem:[#allocation135_spill] sm:$0xff] }
 0xc5b   :  { %16827 = vmatpush1.bf16.msra.mxu0 %v22186_v31  ;;  %17019 = vmatpush1.bf16.msra.mxu1 %v22187_v52  ;;  %v22220_v31 = vld [vmem:[#allocation134_spill] sm:$0xff]  ;;  %v22221_v52 = vld [vmem:[#allocation136_spill] sm:$0xff] }
 0xc5c   :  { %16829 = vmatprep.subr.bf16.mxu0 %v22188_v54  ;;  %17021 = vmatprep.subr.bf16.mxu1 %v22189_v57  ;;  %v22222_v54 = vld [vmem:[#allocation137_spill] sm:$0xff]  ;;  %v22223_v57 = vld [vmem:[#allocation138_spill] sm:$0xff] }
 0xc5f   :  { %16831 = vmatpush1.bf16.msra.mxu0 %v22190_v11  ;;  %17023 = vmatpush1.bf16.msra.mxu1 %v22191_v38  ;;  %v22225_v11 = vld [vmem:[#allocation58_spill] sm:$0xff]  ;;  %v22226_v38 = vld [vmem:[#allocation59_spill] sm:$0xff] }
 0xc60   :  { %16833 = vmatprep.subr.bf16.mxu0 %v22192_v1  ;;  %17025 = vmatprep.subr.bf16.mxu1 %v22193_v60  ;;  %v22227_v1 = vld [vmem:[#allocation60_spill] sm:$0xff]  ;;  %v22228_v60 = vld [vmem:[#allocation61_spill] sm:$0xff] }
 0xc62   :  { %12620 = vmatmul.mubr.f32.vlgmr.msra.gmra.mrb[14].mxu0 %v20561_v53  ;;  %13475 = vmatmul.mubr.f32.vlgmr.msra.gmra.mrb[14].mxu1 %v20561_v53 }
 0xc63   :  { %16835 = vmatpush1.bf16.msra.mxu0 %v22194_v35  ;;  %17027 = vmatpush1.bf16.msra.mxu1 %v22195_v44  ;;  %v22229_v35 = vld [vmem:[#allocation62_spill] sm:$0xff]  ;;  %v22230_v44 = vld [vmem:[#allocation63_spill] sm:$0xff] }
 0xc64   :  { %16837 = vmatprep.subr.bf16.mxu0 %v22196_v47  ;;  %17029 = vmatprep.subr.bf16.mxu1 %v22197_v0  ;;  %v22231_v47 = vld [vmem:[#allocation14_spill] sm:$0xff]  ;;  %v22232_v0 = vld [vmem:[#allocation15_spill] sm:$0xff] }
 0xc65   :  { %12754 = vmatprep.mubr.f32.mxu0 %v21338_v6  ;;  %13609 = vmatprep.mubr.f32.mxu1 %v21338_v6 }
 0xc67   :  { %16839 = vmatpush1.bf16.msra.mxu0 %v22198_v37  ;;  %17031 = vmatpush1.bf16.msra.mxu1 %v22199_v12  ;;  %v22233_v37 = vld [vmem:[#allocation16_spill] sm:$0xff]  ;;  %v22234_v12 = vld [vmem:[#allocation17_spill] sm:$0xff] }
 0xc68   :  { %16841 = vmatprep.subr.bf16.mxu0 %v22200_v50  ;;  %17033 = vmatprep.subr.bf16.mxu1 %v22201_v40  ;;  %v22235_v50 = vld [vmem:[#allocation18_spill] sm:$0xff]  ;;  %v22236_v40 = vld [vmem:[#allocation19_spill] sm:$0xff] }
 0xc6b   :  { %16843 = vmatpush1.bf16.msra.mxu0 %v22202_v18  ;;  %17035 = vmatpush1.bf16.msra.mxu1 %v22203_v59  ;;  %v22237_v18 = vld [vmem:[#allocation20_spill] sm:$0xff]  ;;  %v22238_v59 = vld [vmem:[#allocation22_spill] sm:$0xff] }
 0xc6c   :  { %16845 = vmatprep.subr.bf16.mxu0 %v22204_v23  ;;  %17037 = vmatprep.subr.bf16.mxu1 %v22205_v16  ;;  %v22239_v23 = vld [vmem:[#allocation113_spill] sm:$0xff]  ;;  %v22240_v16 = vld [vmem:[#allocation114_spill] sm:$0xff] }
 0xc6f   :  { %16847 = vmatpush1.bf16.msra.mxu0 %v22206_v34  ;;  %17039 = vmatpush1.bf16.msra.mxu1 %v22207_v21  ;;  %v22242_v34 = vld [vmem:[#allocation116_spill] sm:$0xff]  ;;  %v22243_v21 = vld [vmem:[#allocation117_spill] sm:$0xff] }
 0xc70   :  { %16849 = vmatprep.subr.bf16.mxu0 %v22208_v14  ;;  %17041 = vmatprep.subr.bf16.mxu1 %v22209_v36  ;;  %v22244_v14 = vld [vmem:[#allocation118_spill] sm:$0xff]  ;;  %v22245_v36 = vld [vmem:[#allocation119_spill] sm:$0xff] }
 0xc73   :  { %16851 = vmatpush1.bf16.msra.mxu0 %v22210_v30  ;;  %17043 = vmatpush1.bf16.msra.mxu1 %v22211_v61  ;;  %v22246_v30 = vld [vmem:[#allocation83_spill] sm:$0xff]  ;;  %v22247_v61 = vld [vmem:[#allocation85_spill] sm:$0xff] }
 0xc74   :  { %16853 = vmatprep.subr.bf16.mxu0 %v22212_v9  ;;  %17045 = vmatprep.subr.bf16.mxu1 %v22213_v42  ;;  %v22248_v9 = vld [vmem:[#allocation26_spill] sm:$0xff]  ;;  %v22249_v42 = vld [vmem:[#allocation27_spill] sm:$0xff] }
 0xc77   :  { %16855 = vmatpush1.bf16.msra.mxu0 %v22214_v51  ;;  %17047 = vmatpush1.bf16.msra.mxu1 %v22215_v25  ;;  %v22250_v51 = vld [vmem:[#allocation29_spill] sm:$0xff]  ;;  %v22251_v25 = vld [vmem:[#allocation31_spill] sm:$0xff] }
 0xc78   :  { %16857 = vmatprep.subr.bf16.mxu0 %v22216_v5  ;;  %17049 = vmatprep.subr.bf16.mxu1 %v22217_v58  ;;  %v22252_v5 = vld [vmem:[#allocation34_spill] sm:$0xff]  ;;  %v22253_v58 = vld [vmem:[#allocation35_spill] sm:$0xff] }
 0xc7b   :  { %16859 = vmatpush1.bf16.msra.mxu0 %v22218_v15  ;;  %17051 = vmatpush1.bf16.msra.mxu1 %v22219_v29  ;;  %v22254_v15 = vld [vmem:[#allocation36_spill] sm:$0xff]  ;;  %v22255_v29 = vld [vmem:[#allocation38_spill] sm:$0xff] }
 0xc7c   :  { %16861 = vmatprep.subr.bf16.mxu0 %v22220_v31  ;;  %17053 = vmatprep.subr.bf16.mxu1 %v22221_v52  ;;  %v22256_v31 = vld [vmem:[#allocation39_spill] sm:$0xff]  ;;  %v22257_v52 = vld [vmem:[#allocation40_spill] sm:$0xff] }
 0xc7f   :  { %16863 = vmatpush1.bf16.msra.mxu0 %v22222_v54  ;;  %17055 = vmatpush1.bf16.msra.mxu1 %v22223_v57  ;;  %v22258_v54 = vld [vmem:[#allocation42_spill] sm:$0xff]  ;;  %v22259_v57 = vld [vmem:[#allocation92_spill] sm:$0xff] }
 0xc80   :  { %16865 = vmatprep.subr.bf16.mxu0 %v21593_v45  ;;  %17057 = vmatprep.subr.bf16.mxu1 %v21594_v32 }
 0xc82   :  { %12757 = vmatmul.mubr.f32.vlgmr.msra.gmra.mrb[14].mxu0 %v20564_v17  ;;  %13612 = vmatmul.mubr.f32.vlgmr.msra.gmra.mrb[14].mxu1 %v20564_v17  ;;  %v22224_v17 = vld [vmem:[#allocation57_spill] sm:$0xff] }
 0xc83   :  { %16867 = vmatpush1.bf16.msra.mxu0 %v21595_v3  ;;  %17059 = vmatpush1.bf16.msra.mxu1 %v21597_v33 }
 0xc84   :  { %16869 = vmatprep.subr.bf16.mxu0 %v21596_v56  ;;  %17061 = vmatprep.subr.bf16.mxu1 %v21598_v7 }
 0xc85   :  { %12859 = vmatprep.mubr.f32.mxu0 %v21338_v6  ;;  %13714 = vmatprep.mubr.f32.mxu1 %v21338_v6 }
 0xc87   :  { %16871 = vmatpush1.bf16.msra.mxu0 %v21599_v20  ;;  %17063 = vmatpush1.bf16.msra.mxu1 %v21601_v39 }
 0xc88   :  { %16873 = vmatprep.subr.bf16.mxu0 %v21600_v28  ;;  %17065 = vmatprep.subr.bf16.mxu1 %v21602_v62 }
 0xc8b   :  { %16875 = vmatpush1.bf16.msra.mxu0 %v21603_v55  ;;  %17067 = vmatpush1.bf16.msra.mxu1 %v21605_v43 }
 0xc8c   :  { %16877 = vmatprep.subr.bf16.mxu0 %v21604_v24  ;;  %17069 = vmatprep.subr.bf16.mxu1 %v21606_v19 }
 0xc8f   :  { %16879 = vmatpush1.bf16.msra.mxu0 %v21607_v10  ;;  %17071 = vmatpush1.bf16.msra.mxu1 %v21609_v49 }
 0xc90   :  { %16881 = vmatprep.subr.bf16.mxu0 %v21608_v48  ;;  %17073 = vmatprep.subr.bf16.mxu1 %v21610_v2 }
 0xc93   :  { %16883 = vmatpush1.bf16.msra.mxu0 %v21611_v8  ;;  %17075 = vmatpush1.bf16.msra.mxu1 %v21613_v41 }
 0xc94   :  { %16885 = vmatprep.subr.bf16.mxu0 %v21612_v4  ;;  %17077 = vmatprep.subr.bf16.mxu1 %v21614_v13 }
 0xc97   :  { %16887 = vmatpush1.bf16.msra.mxu0 %v21615_v27  ;;  %17079 = vmatpush1.bf16.msra.mxu1 %v21617_v63 }
 0xc98   :  { %16889 = vmatprep.subr.bf16.mxu0 %v21616_v26  ;;  %17081 = vmatprep.subr.bf16.mxu1 %v22224_v17 }
 0xc9b   :  { %16891 = vmatpush1.bf16.msra.mxu0 %v22225_v11  ;;  %17083 = vmatpush1.bf16.msra.mxu1 %v22226_v38 }
 0xc9c   :  { %16893 = vmatprep.subr.bf16.mxu0 %v22227_v1  ;;  %17085 = vmatprep.subr.bf16.mxu1 %v22228_v60 }
 0xc9f   :  { %16895 = vmatpush1.bf16.msra.mxu0 %v22229_v35  ;;  %17087 = vmatpush1.bf16.msra.mxu1 %v22230_v44 }
 0xca0   :  { %16897 = vmatprep.subr.bf16.mxu0 %v22231_v47  ;;  %17089 = vmatprep.subr.bf16.mxu1 %v22232_v0  ;;  %v22260_v47 = vld [vmem:[#allocation120_spill] sm:$0xff]  ;;  %v22261_v0 = vld [vmem:[#allocation122_spill] sm:$0xff] }
 0xca2   :  { %12863 = vmatmul.mubr.f32.vlgmr.msra.gmra.mrb[14].mxu0 %v20567_v46  ;;  %13718 = vmatmul.mubr.f32.vlgmr.msra.gmra.mrb[14].mxu1 %v20567_v46  ;;  %v22241_v46 = vld [vmem:[#allocation115_spill] sm:$0xff] }
 0xca3   :  { %16899 = vmatpush1.bf16.msra.mxu0 %v22233_v37  ;;  %17091 = vmatpush1.bf16.msra.mxu1 %v22234_v12  ;;  %v22262_v37 = vld [vmem:[#allocation123_spill] sm:$0xff] }
 0xca4   :  { %16901 = vmatprep.subr.bf16.mxu0 %v22235_v50  ;;  %17093 = vmatprep.subr.bf16.mxu1 %v22236_v40 }
 0xca5   :  { %13029 = vmatprep.mubr.f32.mxu0 %v21338_v6  ;;  %13884 = vmatprep.mubr.f32.mxu1 %v21338_v6 }
 0xca7   :  { %16903 = vmatpush1.bf16.msra.mxu0 %v22237_v18  ;;  %17095 = vmatpush1.bf16.msra.mxu1 %v22238_v59 }
 0xca8   :  { %16905 = vmatprep.subr.bf16.mxu0 %v22239_v23  ;;  %17097 = vmatprep.subr.bf16.mxu1 %v22240_v16 }
 0xcab   :  { %16907 = vmatpush1.bf16.msra.mxu0 %v22241_v46  ;;  %17099 = vmatpush1.bf16.msra.mxu1 %v22242_v34 }
 0xcac   :  { %16909 = vmatprep.subr.bf16.mxu0 %v22243_v21  ;;  %17101 = vmatprep.subr.bf16.mxu1 %v22244_v14 }
 0xcaf   :  { %16911 = vmatpush1.bf16.msra.mxu0 %v22245_v36  ;;  %17103 = vmatpush1.bf16.msra.mxu1 %v22246_v30 }
 0xcb0   :  { %16913 = vmatprep.subr.bf16.mxu0 %v22247_v61  ;;  %17105 = vmatprep.subr.bf16.mxu1 %v22248_v9 }
 0xcb3   :  { %16915 = vmatpush1.bf16.msra.mxu0 %v22249_v42  ;;  %17107 = vmatpush1.bf16.msra.mxu1 %v22250_v51 }
 0xcb4   :  { %16917 = vmatprep.subr.bf16.mxu0 %v22251_v25  ;;  %17109 = vmatprep.subr.bf16.mxu1 %v22252_v5 }
 0xcb7   :  { %16919 = vmatpush1.bf16.msra.mxu0 %v22253_v58  ;;  %17111 = vmatpush1.bf16.msra.mxu1 %v22254_v15 }
 0xcb8   :  { %16921 = vmatprep.subr.bf16.mxu0 %v22255_v29  ;;  %17113 = vmatprep.subr.bf16.mxu1 %v22256_v31 }
 0xcbb   :  { %16923 = vmatpush1.bf16.msra.mxu0 %v22257_v52  ;;  %17115 = vmatpush1.bf16.msra.mxu1 %v22258_v54 }
 0xcbc   :  { %16925 = vmatprep.subr.bf16.mxu0 %v22259_v57  ;;  %17117 = vmatprep.subr.bf16.mxu1 %v22260_v47 }
 0xcbf   :  { %16927 = vmatpush1.bf16.msra.mxu0 %v22261_v0  ;;  %17119 = vmatpush1.bf16.msra.mxu1 %v22262_v37 }
 0xcc0   :  { %16929 = vmatprep.subr.bf16.mxu0 %v21593_v45  ;;  %17121 = vmatprep.subr.bf16.mxu1 %v21594_v32 }
 0xcc2   :  { %13031 = vmatmul.mubr.f32.vlgmr.msra.gmra.mrb[14].mxu0 %v20561_v53  ;;  %13886 = vmatmul.mubr.f32.vlgmr.msra.gmra.mrb[14].mxu1 %v20561_v53 }
 0xcc3   :  { %16931 = vmatpush1.bf16.msra.mxu0 %v21595_v3  ;;  %17123 = vmatpush1.bf16.msra.mxu1 %v21597_v33 }
 0xcc4   :  { %16933 = vmatprep.subr.bf16.mxu0 %v21596_v56  ;;  %17125 = vmatprep.subr.bf16.mxu1 %v21598_v7 }
 0xcc5   :  { %13133 = vmatprep.mubr.f32.mxu0 %v21338_v6  ;;  %13988 = vmatprep.mubr.f32.mxu1 %v21338_v6  ;;  %v12282_v6 = vld [vmem:[#allocation2 + $0xe0] sm:$0xff] }
 0xcc7   :  { %16935 = vmatpush1.bf16.msra.mxu0 %v21599_v20  ;;  %17127 = vmatpush1.bf16.msra.mxu1 %v21601_v39 }
 0xcc8   :  { %16937 = vmatprep.subr.bf16.mxu0 %v21600_v28  ;;  %17129 = vmatprep.subr.bf16.mxu1 %v21602_v62  ;;  %v12285_v28 = vld [vmem:[#allocation2 + $0xf8] sm:$0xff]  ;;  %v12284_v62 = vld [vmem:[#allocation2 + $0xf0] sm:$0xff] }
 0xccb   :  { %16939 = vmatpush1.bf16.msra.mxu0 %v21603_v55  ;;  %17131 = vmatpush1.bf16.msra.mxu1 %v21605_v43 }
 0xccc   :  { %16941 = vmatprep.subr.bf16.mxu0 %v21604_v24  ;;  %17133 = vmatprep.subr.bf16.mxu1 %v21606_v19 }
 0xccf   :  { %16943 = vmatpush1.bf16.msra.mxu0 %v21607_v10  ;;  %17135 = vmatpush1.bf16.msra.mxu1 %v21609_v49 }
 0xcd0   :  { %16945 = vmatprep.subr.bf16.mxu0 %v21608_v48  ;;  %17137 = vmatprep.subr.bf16.mxu1 %v21610_v2 }
 0xcd3   :  { %16947 = vmatpush1.bf16.msra.mxu0 %v21611_v8  ;;  %17139 = vmatpush1.bf16.msra.mxu1 %v21613_v41 }
 0xcd4   :  { %16949 = vmatprep.subr.bf16.mxu0 %v21612_v4  ;;  %17141 = vmatprep.subr.bf16.mxu1 %v21614_v13 }
 0xcd7   :  { %16951 = vmatpush1.bf16.msra.mxu0 %v21615_v27  ;;  %17143 = vmatpush1.bf16.msra.mxu1 %v21617_v63  ;;  %v12283_v63 = vld [vmem:[#allocation2 + $0xe8] sm:$0xff] }
 0xcd8   :  { %16953 = vmatprep.subr.bf16.mxu0 %v21616_v26  ;;  %17145 = vmatprep.subr.bf16.mxu1 %v22224_v17 }
 0xcdb   :  { %16955 = vmatpush1.bf16.msra.mxu0 %v22225_v11  ;;  %17147 = vmatpush1.bf16.msra.mxu1 %v22226_v38 }
 0xcdc   :  { %16957 = vmatprep.subr.bf16.mxu0 %v22227_v1  ;;  %17149 = vmatprep.subr.bf16.mxu1 %v22228_v60 }
 0xcdf   :  { %16959 = vmatpush1.bf16.msra.mxu0 %v22229_v35  ;;  %17151 = vmatpush1.bf16.msra.mxu1 %v22230_v44 }
 0xce2   :  { %13135 = vmatmul.mubr.f32.vlgmr.msra.gmra.mrb[14].mxu0 %v20561_v53  ;;  %13990 = vmatmul.mubr.f32.vlgmr.msra.gmra.mrb[14].mxu1 %v20561_v53 }
 0xdb5   :  { %v13136_v26 = vpop.f32.mrb[14].mxu0  ;;  %v13991_v45 = vpop.f32.mrb[14].mxu1 }
 0xdb6   :  { %v13996_v32 = vadd.f32 %v13136_v26, %v12282_v6  ;;  %v13138_v3 = vpop.f32.mrb[15].mxu0  ;;  %v13993_v56 = vpop.f32.mrb[15].mxu1  ;;  %v13998_v24 = vadd.f32 %v13991_v45, %v12284_v62 }
 0xdb7   :  { %v13997_v33 = vadd.f32 %v13138_v3, %v12283_v63  ;;  %v13999_v39 = vadd.f32 %v13993_v56, %v12285_v28 }
 0xdb8   :  { %v14077_v7 = vmul.f32 -1.442695, %v13996_v32 }
 0xdb9   :  { %v14078_v20 = vmul.f32 -1.442695, %v13997_v33  ;;  %v14079_v55 = vmul.f32 -1.442695, %v13999_v39 }
 0xdba   :  { %17431 = vpow2.f32 %v14077_v7 }
 0xdbb   :  { %17433 = vpow2.f32 %v14078_v20 }
 0xdbc   :  { %17435 = vpow2.f32 %v14079_v55 }
 0xdbd   :  { %17437 = vtanh.f32 %v13998_v24 }
 0xdc4   :  { %v17432_v43 = vpop.eup %17431 }
 0xdc5   :  { %v17434_v19 = vpop.eup %17433  ;;  %v14003_v10 = vadd.f32 1.0, %v17432_v43 }
 0xdc6   :  { %v14009_v48 = vadd.f32 1.0, %v17434_v19  ;;  %v17436_v49 = vpop.eup %17435 }
 0xdc7   :  { %17439 = vrcp.f32 %v14003_v10  ;;  %v17438_v2 = vpop.eup %17437  ;;  %v14016_v13 = vadd.f32 1.0, %v17436_v49 }
 0xdc8   :  { %17441 = vrcp.f32 %v14009_v48 }
 0xdc9   :  { %17443 = vrcp.f32 %v14016_v13 }
 0xdd1   :  { %v17440_v8 = vpop.eup %17439 }
 0xdd2   :  { %v17442_v4 = vpop.eup %17441  ;;  %v14020_v41 = vmul.f32 %v17440_v8, %v17438_v2 }
 0xdd3   :  { %v14019_v27 = vmul.f32 %v17442_v4, %v20558_v22 }
 0xdd5   :  { %v14021_v53 = vadd.f32 %v14020_v41, %v14019_v27 }
 0xdd7   :  { %17445 = vtanh.f32 %v14021_v53  ;;  %14025 = vst [vmem:[#allocation8] sm:$0xff] %v14021_v53 }
 0xdd8   :  { %17502 = shalt.err (!%p17499_p6)
}
 0xdd9   :  { %s17503_s14 = scalar_lea.hbm %s20777_s3, 128 }
 0xdda   :  { %p17504_p7 = scmp.ne.s32.totalorder %s20777_s3, %s17503_s14  ;;  %p17507_p8 = scmp.lt.u32.totalorder %s17503_s14, %s20777_s3 }
 0xddc   :  { %p17509_p9 = pnand %p17507_p8, %p17504_p7 }
 0xdde   :  { %17512 = shalt.err (!%p17509_p9)
}
 0xddf   :  { %14045 = dma.vmem_to_hbm [thread:$0]  %s14043_s10, 128, %s20777_s3, [#allocation9]   ;;  %v17444_v22 = vpop.eup %17443 }
 0xde0   :  { %s17549_s21 = smov [#allocation7]  }
 0xde1   :  { %s14032_s22 = sshll.u32 %s17549_s21, 4  ;;  %v17446_v17 = vpop.eup %17445  ;;  %s14033_s22 = int_to_ptr.vmem [resolvable:$true] %s14032_s22 }
 0xde2   :  { %v14023_v11 = vmul.f32 %v17446_v17, %v17444_v22  ;;  %s17513_s23 = scalar_lea.vmem %s14033_s22, 128  ;;  %p17518_p11 = scmp.lt.s32.totalorder %s14033_s22, %s14033_s22 }
 0xde3   :  { %p17514_p10 = scmp.ne.s32.totalorder %s14033_s22, %s17513_s23  ;;  %p17519_p12 = scmp.lt.s32.totalorder %s17513_s23, %s17513_s23 }
 0xde4   :  { %14024 = vst [vmem:[#allocation7] sm:$0xff] %v14023_v11 }
 0xde5   :  { %p17520_p13 = por %p17519_p12, %p17518_p11 }
 0xde7   :  { %p17521_p0 = pnand %p17520_p13, %p17514_p10 }
 0xde9   :  { %17524 = shalt.err (!%p17521_p0)
}
 0xdea   :  { %s17525_s26 = scalar_lea.hbm %s20776_s2, 128 }
 0xdeb   :  { %p17526_p1 = scmp.ne.s32.totalorder %s20776_s2, %s17525_s26  ;;  %p17529_p2 = scmp.lt.u32.totalorder %s17525_s26, %s20776_s2 }
 0xded   :  { %p17531_p3 = pnand %p17529_p2, %p17526_p1 }
 0xdef   :  { %17534 = shalt.err (!%p17531_p3)
}
 0xdf0   :  { %14035 = dma.vmem_to_hbm [thread:$0]  %s14033_s22, 128, %s20776_s2, [#allocation4]  }
 0xdf1   :  { %17539 = dma.done.wait [#allocation4], 128  }
 0xdf2   :  { %17540 = vsyncadd [#allocation4], 4294967168 }
 0xdf3   :  { %17541 = dma.done.wait [#allocation9], 128  }
 0xdf4   :  { %17542 = vsyncadd [#allocation9], 4294967168 }
 0xdf5   :  { %14052 = vsyncpa [#allocation3], 1 }
 0xdf6   :  { %14053 = vsyncpa [#allocation6], 1 }
 0xdf7   :  { %14054 = vsyncpa [#allocation4], 1 }
 0xdf8   :  { %14055 = vsyncpa [#allocation9], 1 }

</bundles_post_ra>
